<compile_context>
chip_gen: v6e
topology: v6e:2x2x1
jax: 0.10.0
libtpu: 0.0.40
codegen_flags: <defaults>
</compile_context>

<pallas_src>
import functools
from typing import NamedTuple

import numpy as np
import jax
import jax.numpy as jnp
from jax import lax
from jax.experimental import pallas as pl
from jax.experimental.pallas import tpu as pltpu


def _rup(x, m):
    return (x + m - 1) // m * m


class CriticLayout(NamedTuple):
    """Static slice offsets (python ints) into the packed weight slabs."""
    n1: int      # H1*C1*W : conv1 output features, flattened
    n2: int      # H2*C2*W : conv2 output features, flattened
    w: int       # state_dim[1]
    a: int       # action_dim
    mid: int     # mid_dim
    r_l1f: int   # tail-slab row offsets (8-aligned)
    r_l1a: int
    r_l2: int
    r_l3: int
    r_l4: int
    o_b1: int    # bias-row lane offsets (128-aligned)
    o_b2: int
    o_b3: int
    o_lb1: int
    o_lb2: int
    o_lb3: int
    o_lb4: int


# ---------------------------------------------------------------------------
# Fused Critic kernel (one batch tile per grid step).
#   x_ref    : (Bt, H*W) f32   state, NCHW-contiguous flatten (streamed)
#   act_ref  : (Bt, A)   f32   action (streamed)
#   band1_ref: (H*W, n1)       conv1 folded over the flat (day, col) axis
#   band2_ref: (n1, n2)        conv2 folded
#   tail_ref : (rows, max(mid,W))  band3 + lw1f + lw1a + lw2 + lw3 + lw4-row
#   bias_ref : (1, nb)         every bias, 128-lane-aligned segments
#   out_ref  : (1, 1, Bt)      lane-dense output row for this tile
# ---------------------------------------------------------------------------
def _critic_kernel(lo, x_ref, act_ref, band1_ref, band2_ref, tail_ref,
                   bias_ref, out_ref):
    f32 = jnp.float32
    x = x_ref[...]                                                 # (Bt, H*W)

    # cd2 conv stack as three dense banded matmuls; batch stays on sublanes.
    a1 = jnp.maximum(
        jnp.dot(x, band1_ref[...], preferred_element_type=f32)
        + bias_ref[:, lo.o_b1:lo.o_b1 + lo.n1], 0.0)               # (Bt, n1)
    a2 = jnp.maximum(
        jnp.dot(a1, band2_ref[...], preferred_element_type=f32)
        + bias_ref[:, lo.o_b2:lo.o_b2 + lo.n2], 0.0)               # (Bt, n2)
    feat = jnp.maximum(
        jnp.dot(a2, tail_ref[0:lo.n2, 0:lo.w], preferred_element_type=f32)
        + bias_ref[:, lo.o_b3:lo.o_b3 + lo.w], 0.0)                # (Bt, W)

    # MLP head; torch.cat([feat, action], 1) @ lw1 == feat@lw1f + action@lw1a.
    h = jnp.maximum(
        jnp.dot(feat, tail_ref[lo.r_l1f:lo.r_l1f + lo.w, 0:lo.mid],
                preferred_element_type=f32)
        + jnp.dot(act_ref[...], tail_ref[lo.r_l1a:lo.r_l1a + lo.a, 0:lo.mid],
                  preferred_element_type=f32)
        + bias_ref[:, lo.o_lb1:lo.o_lb1 + lo.mid], 0.0)
    h = jnp.maximum(
        jnp.dot(h, tail_ref[lo.r_l2:lo.r_l2 + lo.mid, 0:lo.mid],
                preferred_element_type=f32)
        + bias_ref[:, lo.o_lb2:lo.o_lb2 + lo.mid], 0.0)
    u = (jnp.dot(h, tail_ref[lo.r_l3:lo.r_l3 + lo.mid, 0:lo.mid],
                 preferred_element_type=f32)
         + bias_ref[:, lo.o_lb3:lo.o_lb3 + lo.mid])
    h = u * jnp.clip(u + 3.0, 0.0, 6.0) * (1.0 / 6.0)              # Hardswish

    # Final Linear(mid, 1), emitted lane-dense as a (1, Bt) row: only the small
    # (Bt, mid) activation is transposed (not the large conv intermediates).
    row = (jnp.dot(tail_ref[lo.r_l4:lo.r_l4 + 1, 0:lo.mid], h.T,
                   preferred_element_type=f32)
           + bias_ref[:, lo.o_lb4:lo.o_lb4 + 1])                   # (1, Bt)
    out_ref[0] = row


def _pick_block_b(batch):
    for cand in (256, 128, 64, 32, 16, 8):
        if batch % cand == 0:
            return cand
    return batch


@functools.partial(jax.jit, static_argnames=("layout", "block_b"))
def critic_forward(state, action, arrays, layout, block_b=None):
    """state: (B, 1, H, W) NCHW f32, action: (B, A) f32  ->  (B, 1) f32."""
    B, _, H, W = state.shape
    A = action.shape[1]
    HW = H * W
    if block_b is None:
        block_b = _pick_block_b(B)
    if B % block_b != 0:
        raise ValueError(f"batch {B} must be a multiple of block_b {block_b}")
    n_tiles = B // block_b

    # NCHW -> (B, H*W): contiguous flatten (free), lanes pad 336 -> 384 only.
    x_flat = state.reshape(B, HW)

    band1, band2 = arrays["band1"], arrays["band2"]
    tail, bias_row = arrays["tail"], arrays["bias_row"]

    kernel = functools.partial(_critic_kernel, layout)
    out_rows = pl.pallas_call(
        kernel,
        out_shape=jax.ShapeDtypeStruct((n_tiles, 1, block_b), jnp.float32),
        grid=(n_tiles,),
        in_specs=[
            pl.BlockSpec((block_b, HW), lambda i: (i, 0)),      # streamed
            pl.BlockSpec((block_b, A), lambda i: (i, 0)),       # streamed
            pl.BlockSpec(band1.shape, lambda i: (0, 0)),        # resident
            pl.BlockSpec(band2.shape, lambda i: (0, 0)),        # resident
            pl.BlockSpec(tail.shape, lambda i: (0, 0)),         # resident
            pl.BlockSpec(bias_row.shape, lambda i: (0, 0)),     # resident
        ],
        out_specs=pl.BlockSpec((1, 1, block_b), lambda i: (i, 0, 0)),
        compiler_params=pltpu.CompilerParams(
            dimension_semantics=("parallel",),
            vmem_limit_bytes=32 * 1024 * 1024),
    )(x_flat, action, band1, band2, tail, bias_row)

    return out_rows.reshape(B, 1)


# ---------------------------------------------------------------------------
# Parameters.
# ---------------------------------------------------------------------------
def init_torch_params(key, mid_dim, state_dim, action_dim):
    """Synthetic params in PyTorch layouts (conv OIHW; linear stored as (in, out))."""
    W = state_dim[1]
    in_dim = W + action_dim
    ks = jax.random.split(key, 14)

    def w(k, shape, scale):
        return jax.random.normal(k, shape, jnp.float32) * scale

    return {
        "cw1": w(ks[0], (8, 1, 3, 1), 0.2),   "cb1": w(ks[1], (8,), 0.05),
        "cw2": w(ks[2], (16, 8, 3, 1), 0.1),  "cb2": w(ks[3], (16,), 0.05),
        "cw3": w(ks[4], (1, 16, 3, 1), 0.1),  "cb3": w(ks[5], (1,), 0.05),
        "lw1": w(ks[6], (in_dim, mid_dim), 0.1),  "lb1": w(ks[7], (mid_dim,), 0.05),
        "lw2": w(ks[8], (mid_dim, mid_dim), 0.1), "lb2": w(ks[9], (mid_dim,), 0.05),
        "lw3": w(ks[10], (mid_dim, mid_dim), 0.1), "lb3": w(ks[11], (mid_dim,), 0.05),
        "lw4": w(ks[12], (mid_dim, 1), 0.1),  "lb4": w(ks[13], (1,), 0.05),
    }


def build_kernel_params(tp, H, W, mid_dim, action_dim):
    """Fold cd2 into three dense band matrices over the flattened (H*W) axis
    and pack every small weight/bias into two slabs (static offsets)."""
    C1, C2, K = 8, 16, 3
    H1 = (H - K) // 2 + 1
    H2 = (H1 - K) // 3 + 1
    H3 = (H2 - K) // 3 + 1
    assert H3 == 1, "Critic requires the conv stack to reduce the day axis to 1"

    cw1, cb1 = np.asarray(tp["cw1"]), np.asarray(tp["cb1"])
    cw2, cb2 = np.asarray(tp["cw2"]), np.asarray(tp["cb2"])
    cw3, cb3 = np.asarray(tp["cw3"]), np.asarray(tp["cb3"])

    # Per-column (days-axis only) band matrices: the (3,1) kernels never mix
    # columns, so each conv is a small (in_day*ch, out_day*ch) matrix.
    m1 = np.zeros((H, H1 * C1), np.float32)
    b1 = np.zeros((H1 * C1,), np.float32)
    for h1 in range(H1):
        for o in range(C1):
            j = h1 * C1 + o
            m1[2 * h1:2 * h1 + K, j] = cw1[o, 0, :, 0]
            b1[j] = cb1[o]

    m2 = np.zeros((H1 * C1, H2 * C2), np.float32)
    b2 = np.zeros((H2 * C2,), np.float32)
    for h2 in range(H2):
        for o in range(C2):
            j = h2 * C2 + o
            b2[j] = cb2[o]
            for kh in range(K):
                h1 = 3 * h2 + kh
                m2[h1 * C1:(h1 + 1) * C1, j] = cw2[o, :, kh, 0]

    m3 = np.zeros((H2 * C2, 1), np.float32)
    for kh in range(K):
        m3[kh * C2:(kh + 1) * C2, 0] = cw3[0, :, kh, 0]

    # Inflate along the width axis (kron with I_W): features are flattened as
    # (day-block, channel, column), so feat drops out directly as (B, W).
    eye_w = np.eye(W, dtype=np.float32)
    band1 = np.kron(m1, eye_w)               # (H*W,     H1*C1*W)
    band2 = np.kron(m2, eye_w)               # (H1*C1*W, H2*C2*W)
    band3 = np.kron(m3, eye_w)               # (H2*C2*W, W)
    n1, n2 = band1.shape[1], band2.shape[1]

    lw1 = np.asarray(tp["lw1"])
    lw2 = np.asarray(tp["lw2"])
    lw3 = np.asarray(tp["lw3"])
    lw4 = np.asarray(tp["lw4"])

    # --- tail slab: band3 + all MLP weight matrices (8-aligned row offsets) --
    slab_w = max(mid_dim, W)
    r_b3 = 0
    r_l1f = _rup(r_b3 + n2, 8)
    r_l1a = _rup(r_l1f + W, 8)
    r_l2 = _rup(r_l1a + action_dim, 8)
    r_l3 = _rup(r_l2 + mid_dim, 8)
    r_l4 = _rup(r_l3 + mid_dim, 8)
    n_rows = _rup(r_l4 + 1, 8)
    tail = np.zeros((n_rows, slab_w), np.float32)
    tail[r_b3:r_b3 + n2, 0:W] = band3
    tail[r_l1f:r_l1f + W, 0:mid_dim] = lw1[:W, :]
    tail[r_l1a:r_l1a + action_dim, 0:mid_dim] = lw1[W:, :]
    tail[r_l2:r_l2 + mid_dim, 0:mid_dim] = lw2
    tail[r_l3:r_l3 + mid_dim, 0:mid_dim] = lw3
    tail[r_l4, 0:mid_dim] = lw4[:, 0]

    # --- bias row: every bias (incl. the two scalars), 128-aligned segments --
    o_b1 = 0
    o_b2 = o_b1 + _rup(n1, 128)
    o_b3 = o_b2 + _rup(n2, 128)
    o_lb1 = o_b3 + _rup(max(W, 1), 128)
    o_lb2 = o_lb1 + _rup(mid_dim, 128)
    o_lb3 = o_lb2 + _rup(mid_dim, 128)
    o_lb4 = o_lb3 + _rup(mid_dim, 128)
    total = o_lb4 + 128
    bias_row = np.zeros((1, total), np.float32)
    bias_row[0, o_b1:o_b1 + n1] = np.repeat(b1, W)
    bias_row[0, o_b2:o_b2 + n2] = np.repeat(b2, W)
    bias_row[0, o_b3:o_b3 + W] = cb3[0]
    bias_row[0, o_lb1:o_lb1 + mid_dim] = np.asarray(tp["lb1"])
    bias_row[0, o_lb2:o_lb2 + mid_dim] = np.asarray(tp["lb2"])
    bias_row[0, o_lb3:o_lb3 + mid_dim] = np.asarray(tp["lb3"])
    bias_row[0, o_lb4] = np.asarray(tp["lb4"])[0]

    arrays = {
        "band1": jnp.asarray(band1),
        "band2": jnp.asarray(band2),
        "tail": jnp.asarray(tail),
        "bias_row": jnp.asarray(bias_row),
    }
    layout = CriticLayout(n1=n1, n2=n2, w=W, a=action_dim, mid=mid_dim,
                          r_l1f=r_l1f, r_l1a=r_l1a, r_l2=r_l2, r_l3=r_l3,
                          r_l4=r_l4, o_b1=o_b1, o_b2=o_b2, o_b3=o_b3,
                          o_lb1=o_lb1, o_lb2=o_lb2, o_lb3=o_lb3, o_lb4=o_lb4)
    return arrays, layout


# ---------------------------------------------------------------------------
# Pure-JAX reference mirroring the PyTorch forward (for a correctness check).
# ---------------------------------------------------------------------------
def critic_reference(state, action, tp):
    dn = ("NCHW", "OIHW", "NCHW")
    x = lax.conv_general_dilated(state, tp["cw1"], (2, 1), "VALID", dimension_numbers=dn)
    x = jax.nn.relu(x + tp["cb1"].reshape(1, -1, 1, 1))
    x = lax.conv_general_dilated(x, tp["cw2"], (3, 1), "VALID", dimension_numbers=dn)
    x = jax.nn.relu(x + tp["cb2"].reshape(1, -1, 1, 1))
    x = lax.conv_general_dilated(x, tp["cw3"], (3, 1), "VALID", dimension_numbers=dn)
    x = jax.nn.relu(x + tp["cb3"].reshape(1, -1, 1, 1))
    B, _, _, W = state.shape
    feat = x.reshape(B, W)
    z = jnp.concatenate([feat, action], axis=1)
    h = jax.nn.relu(z @ tp["lw1"] + tp["lb1"])
    h = jax.nn.relu(h @ tp["lw2"] + tp["lb2"])
    u = h @ tp["lw3"] + tp["lb3"]
    h = u * jnp.clip(u + 3.0, 0.0, 6.0) / 6.0
    return h @ tp["lw4"] + tp["lb4"]


if __name__ == "__main__":
    mid_dim = 32
    cd2_dim = 21                     # history length H; conv stack -> H_out == 1
    state_dim = (cd2_dim, 16)        # state_dim[1] == spatial width W
    action_dim = 4
    batch = 16
    block_b = 8                      # -> grid=(2,): exercises the batch grid

    key = jax.random.PRNGKey(0)
    kp, ks, ka = jax.random.split(key, 3)
    torch_params = init_torch_params(kp, mid_dim, state_dim, action_dim)
    arrays, layout = build_kernel_params(torch_params, cd2_dim, state_dim[1],
                                         mid_dim, action_dim)

    state = jax.random.normal(ks, (batch, 1, cd2_dim, state_dim[1]), jnp.float32)
    action = jax.random.normal(ka, (batch, action_dim), jnp.float32)

    out = jax.block_until_ready(
        critic_forward(state, action, arrays, layout=layout, block_b=block_b))
    assert out.shape == (batch, 1)

    expected = jax.block_until_ready(critic_reference(state, action, torch_params))
    # Tolerance covers the TPU's default (bf16-pass) matmul precision on both
    # the banded kernel and the conv-based XLA reference.
    if not jnp.allclose(out, expected, atol=3e-3, rtol=3e-3):
        raise AssertionError(f"mismatch:\n{out}\nvs\n{expected}")

    print("KERNEL_OK")
</pallas_src>

<mosaic_0001>
module attributes {stable_mosaic.version = 11 : i64} {
  func.func @_critic_kernel(%arg0: i32, %arg1: memref<8x336xf32, #tpu.memory_space<vmem>>, %arg2: memref<8x4xf32, #tpu.memory_space<vmem>>, %arg3: memref<336x1280xf32, #tpu.memory_space<vmem>>, %arg4: memref<1280x768xf32, #tpu.memory_space<vmem>>, %arg5: memref<864x32xf32, #tpu.memory_space<vmem>>, %arg6: memref<1x2688xf32, #tpu.memory_space<vmem>>, %arg7: memref<1x1x8xf32, #tpu.memory_space<vmem>>) attributes {dimension_semantics = [#tpu.dimension_semantics<parallel>], iteration_bounds = array<i64: 2>, scalar_prefetch = 0 : i64, scratch_operands = 0 : i64, tpu.core_type = #tpu.core_type<tc>, window_params = [{transform_indices = @transform_0, window_bounds = array<i64: 8, 336>}, {transform_indices = @transform_1, window_bounds = array<i64: 8, 4>}, {pipeline_mode = #tpu.pipeline_mode<synchronous>, transform_indices = @transform_2, window_bounds = array<i64: 336, 1280>}, {pipeline_mode = #tpu.pipeline_mode<synchronous>, transform_indices = @transform_3, window_bounds = array<i64: 1280, 768>}, {pipeline_mode = #tpu.pipeline_mode<synchronous>, transform_indices = @transform_4, window_bounds = array<i64: 864, 32>}, {pipeline_mode = #tpu.pipeline_mode<synchronous>, transform_indices = @transform_5, window_bounds = array<i64: 1, 2688>}, {transform_indices = @transform_6, window_bounds = array<i64: 1, 1, 8>}]} {
    %c0 = arith.constant 0 : index
    %c0_0 = arith.constant 0 : index
    %0 = vector.load %arg1[%c0, %c0_0] : memref<8x336xf32, #tpu.memory_space<vmem>>, vector<8x336xf32>
    %c0_1 = arith.constant 0 : index
    %c0_2 = arith.constant 0 : index
    %1 = vector.load %arg3[%c0_1, %c0_2] : memref<336x1280xf32, #tpu.memory_space<vmem>>, vector<336x1280xf32>
    %cst = arith.constant dense<0.000000e+00> : vector<8x1280xf32>
    %2 = tpu.matmul %0, %1, %cst {dimension_numbers = #tpu.dot_dimension_numbers<[1], [0], [0], [1], [0, 0, 1, 1], [], []>} : vector<8x336xf32>, vector<336x1280xf32>, vector<8x1280xf32> -> vector<8x1280xf32>
    %c0_3 = arith.constant 0 : index
    %c0_4 = arith.constant 0 : index
    %3 = vector.load %arg6[%c0_3, %c0_4] : memref<1x2688xf32, #tpu.memory_space<vmem>>, vector<1x1280xf32>
    %4 = vector.broadcast %3 : vector<1x1280xf32> to vector<8x1280xf32>
    %5 = arith.addf %2, %4 : vector<8x1280xf32>
    %cst_5 = arith.constant 0.000000e+00 : f32
    %6 = vector.broadcast %cst_5 : f32 to vector<8x1280xf32>
    %7 = arith.maximumf %5, %6 : vector<8x1280xf32>
    %c0_6 = arith.constant 0 : index
    %c0_7 = arith.constant 0 : index
    %8 = vector.load %arg4[%c0_6, %c0_7] : memref<1280x768xf32, #tpu.memory_space<vmem>>, vector<1280x768xf32>
    %cst_8 = arith.constant dense<0.000000e+00> : vector<8x768xf32>
    %9 = tpu.matmul %7, %8, %cst_8 {dimension_numbers = #tpu.dot_dimension_numbers<[1], [0], [0], [1], [0, 0, 1, 1], [], []>} : vector<8x1280xf32>, vector<1280x768xf32>, vector<8x768xf32> -> vector<8x768xf32>
    %c0_9 = arith.constant 0 : index
    %c1280 = arith.constant 1280 : index
    %10 = vector.load %arg6[%c0_9, %c1280] : memref<1x2688xf32, #tpu.memory_space<vmem>>, vector<1x768xf32>
    %11 = vector.broadcast %10 : vector<1x768xf32> to vector<8x768xf32>
    %12 = arith.addf %9, %11 : vector<8x768xf32>
    %cst_10 = arith.constant 0.000000e+00 : f32
    %13 = vector.broadcast %cst_10 : f32 to vector<8x768xf32>
    %14 = arith.maximumf %12, %13 : vector<8x768xf32>
    %c0_11 = arith.constant 0 : index
    %c0_12 = arith.constant 0 : index
    %15 = vector.load %arg5[%c0_11, %c0_12] : memref<864x32xf32, #tpu.memory_space<vmem>>, vector<768x16xf32>
    %cst_13 = arith.constant dense<0.000000e+00> : vector<8x16xf32>
    %16 = tpu.matmul %14, %15, %cst_13 {dimension_numbers = #tpu.dot_dimension_numbers<[1], [0], [0], [1], [0, 0, 1, 1], [], []>} : vector<8x768xf32>, vector<768x16xf32>, vector<8x16xf32> -> vector<8x16xf32>
    %c0_14 = arith.constant 0 : index
    %c2048 = arith.constant 2048 : index
    %17 = vector.load %arg6[%c0_14, %c2048] : memref<1x2688xf32, #tpu.memory_space<vmem>>, vector<1x16xf32>
    %18 = vector.broadcast %17 : vector<1x16xf32> to vector<8x16xf32>
    %19 = arith.addf %16, %18 : vector<8x16xf32>
    %cst_15 = arith.constant 0.000000e+00 : f32
    %20 = vector.broadcast %cst_15 : f32 to vector<8x16xf32>
    %21 = arith.maximumf %19, %20 : vector<8x16xf32>
    %c768 = arith.constant 768 : index
    %c0_16 = arith.constant 0 : index
    %22 = vector.load %arg5[%c768, %c0_16] : memref<864x32xf32, #tpu.memory_space<vmem>>, vector<16x32xf32>
    %cst_17 = arith.constant dense<0.000000e+00> : vector<8x32xf32>
    %23 = tpu.matmul %21, %22, %cst_17 {dimension_numbers = #tpu.dot_dimension_numbers<[1], [0], [0], [1], [0, 0, 1, 1], [], []>} : vector<8x16xf32>, vector<16x32xf32>, vector<8x32xf32> -> vector<8x32xf32>
    %c0_18 = arith.constant 0 : index
    %c0_19 = arith.constant 0 : index
    %24 = vector.load %arg2[%c0_18, %c0_19] : memref<8x4xf32, #tpu.memory_space<vmem>>, vector<8x4xf32>
    %c784 = arith.constant 784 : index
    %c0_20 = arith.constant 0 : index
    %25 = vector.load %arg5[%c784, %c0_20] : memref<864x32xf32, #tpu.memory_space<vmem>>, vector<4x32xf32>
    %cst_21 = arith.constant dense<0.000000e+00> : vector<8x32xf32>
    %26 = tpu.matmul %24, %25, %cst_21 {dimension_numbers = #tpu.dot_dimension_numbers<[1], [0], [0], [1], [0, 0, 1, 1], [], []>} : vector<8x4xf32>, vector<4x32xf32>, vector<8x32xf32> -> vector<8x32xf32>
    %27 = arith.addf %23, %26 : vector<8x32xf32>
    %c0_22 = arith.constant 0 : index
    %c2176 = arith.constant 2176 : index
    %28 = vector.load %arg6[%c0_22, %c2176] : memref<1x2688xf32, #tpu.memory_space<vmem>>, vector<1x32xf32>
    %29 = vector.broadcast %28 : vector<1x32xf32> to vector<8x32xf32>
    %30 = arith.addf %27, %29 : vector<8x32xf32>
    %cst_23 = arith.constant 0.000000e+00 : f32
    %31 = vector.broadcast %cst_23 : f32 to vector<8x32xf32>
    %32 = arith.maximumf %30, %31 : vector<8x32xf32>
    %c792 = arith.constant 792 : index
    %c0_24 = arith.constant 0 : index
    %33 = vector.load %arg5[%c792, %c0_24] : memref<864x32xf32, #tpu.memory_space<vmem>>, vector<32x32xf32>
    %cst_25 = arith.constant dense<0.000000e+00> : vector<8x32xf32>
    %34 = tpu.matmul %32, %33, %cst_25 {dimension_numbers = #tpu.dot_dimension_numbers<[1], [0], [0], [1], [0, 0, 1, 1], [], []>} : vector<8x32xf32>, vector<32x32xf32>, vector<8x32xf32> -> vector<8x32xf32>
    %c0_26 = arith.constant 0 : index
    %c2304 = arith.constant 2304 : index
    %35 = vector.load %arg6[%c0_26, %c2304] : memref<1x2688xf32, #tpu.memory_space<vmem>>, vector<1x32xf32>
    %36 = vector.broadcast %35 : vector<1x32xf32> to vector<8x32xf32>
    %37 = arith.addf %34, %36 : vector<8x32xf32>
    %cst_27 = arith.constant 0.000000e+00 : f32
    %38 = vector.broadcast %cst_27 : f32 to vector<8x32xf32>
    %39 = arith.maximumf %37, %38 : vector<8x32xf32>
    %c824 = arith.constant 824 : index
    %c0_28 = arith.constant 0 : index
    %40 = vector.load %arg5[%c824, %c0_28] : memref<864x32xf32, #tpu.memory_space<vmem>>, vector<32x32xf32>
    %cst_29 = arith.constant dense<0.000000e+00> : vector<8x32xf32>
    %41 = tpu.matmul %39, %40, %cst_29 {dimension_numbers = #tpu.dot_dimension_numbers<[1], [0], [0], [1], [0, 0, 1, 1], [], []>} : vector<8x32xf32>, vector<32x32xf32>, vector<8x32xf32> -> vector<8x32xf32>
    %c0_30 = arith.constant 0 : index
    %c2432 = arith.constant 2432 : index
    %42 = vector.load %arg6[%c0_30, %c2432] : memref<1x2688xf32, #tpu.memory_space<vmem>>, vector<1x32xf32>
    %43 = vector.broadcast %42 : vector<1x32xf32> to vector<8x32xf32>
    %44 = arith.addf %41, %43 : vector<8x32xf32>
    %cst_31 = arith.constant 3.000000e+00 : f32
    %45 = vector.broadcast %cst_31 : f32 to vector<8x32xf32>
    %46 = arith.addf %44, %45 : vector<8x32xf32>
    %cst_32 = arith.constant 0.000000e+00 : f32
    %cst_33 = arith.constant 6.000000e+00 : f32
    %47 = vector.broadcast %cst_32 : f32 to vector<8x32xf32>
    %48 = arith.maximumf %47, %46 : vector<8x32xf32>
    %49 = vector.broadcast %cst_33 : f32 to vector<8x32xf32>
    %50 = arith.minimumf %49, %48 : vector<8x32xf32>
    %51 = arith.mulf %44, %50 : vector<8x32xf32>
    %cst_34 = arith.constant 0.166666672 : f32
    %52 = vector.broadcast %cst_34 : f32 to vector<8x32xf32>
    %53 = arith.mulf %51, %52 : vector<8x32xf32>
    %c856 = arith.constant 856 : index
    %c0_35 = arith.constant 0 : index
    %54 = vector.load %arg5[%c856, %c0_35] : memref<864x32xf32, #tpu.memory_space<vmem>>, vector<1x32xf32>
    %55 = tpu.transpose %53, [1, 0] : vector<8x32xf32> -> vector<32x8xf32>
    %cst_36 = arith.constant dense<0.000000e+00> : vector<1x8xf32>
    %56 = tpu.matmul %54, %55, %cst_36 {dimension_numbers = #tpu.dot_dimension_numbers<[1], [0], [0], [1], [0, 0, 1, 1], [], []>} : vector<1x32xf32>, vector<32x8xf32>, vector<1x8xf32> -> vector<1x8xf32>
    %c0_37 = arith.constant 0 : index
    %c2560 = arith.constant 2560 : index
    %57 = vector.load %arg6[%c0_37, %c2560] : memref<1x2688xf32, #tpu.memory_space<vmem>>, vector<1x1xf32>
    %58 = vector.broadcast %57 : vector<1x1xf32> to vector<1x8xf32>
    %59 = arith.addf %56, %58 : vector<1x8xf32>
    %c0_38 = arith.constant 0 : index
    %c0_39 = arith.constant 0 : index
    %c0_40 = arith.constant 0 : index
    %60 = vector.load %arg7[%c0_38, %c0_39, %c0_40] : memref<1x1x8xf32, #tpu.memory_space<vmem>>, vector<1x1x8xf32>
    %61 = vector.shape_cast %60 : vector<1x1x8xf32> to vector<1x8xf32>
    %62 = vector.shape_cast %59 : vector<1x8xf32> to vector<1x1x8xf32>
    tpu.vector_store %arg7[%c0_38, %c0_39, %c0_40], %62 {strides = array<i32>} : memref<1x1x8xf32, #tpu.memory_space<vmem>>, vector<1x1x8xf32>,
    return
  }
  func.func @transform_0(%arg0: i32) -> (i32, i32) {
    %c0_i32 = arith.constant 0 : i32
    %c0_i32_0 = arith.constant 0 : i32
    return %arg0, %c0_i32 : i32, i32
  }
  func.func @transform_1(%arg0: i32) -> (i32, i32) {
    %c0_i32 = arith.constant 0 : i32
    %c0_i32_0 = arith.constant 0 : i32
    return %arg0, %c0_i32 : i32, i32
  }
  func.func @transform_2(%arg0: i32) -> (i32, i32) {
    %c0_i32 = arith.constant 0 : i32
    %c0_i32_0 = arith.constant 0 : i32
    %c0_i32_1 = arith.constant 0 : i32
    return %c0_i32, %c0_i32_0 : i32, i32
  }
  func.func @transform_3(%arg0: i32) -> (i32, i32) {
    %c0_i32 = arith.constant 0 : i32
    %c0_i32_0 = arith.constant 0 : i32
    %c0_i32_1 = arith.constant 0 : i32
    return %c0_i32, %c0_i32_0 : i32, i32
  }
  func.func @transform_4(%arg0: i32) -> (i32, i32) {
    %c0_i32 = arith.constant 0 : i32
    %c0_i32_0 = arith.constant 0 : i32
    %c0_i32_1 = arith.constant 0 : i32
    return %c0_i32, %c0_i32_0 : i32, i32
  }
  func.func @transform_5(%arg0: i32) -> (i32, i32) {
    %c0_i32 = arith.constant 0 : i32
    %c0_i32_0 = arith.constant 0 : i32
    %c0_i32_1 = arith.constant 0 : i32
    return %c0_i32, %c0_i32_0 : i32, i32
  }
  func.func @transform_6(%arg0: i32) -> (i32, i32, i32) {
    %c0_i32 = arith.constant 0 : i32
    %c0_i32_0 = arith.constant 0 : i32
    %c0_i32_1 = arith.constant 0 : i32
    return %arg0, %c0_i32, %c0_i32_0 : i32, i32, i32
  }
}

</mosaic_0001>

<bundles_post_ra>
// kernel: critic_forward.1
= control target key start
LH: loop header
LB: loop body
LE: loop exit
PB: predicated region body
PF: predicated region fallthrough
CT: control target
= control target key end

     0   :  { %11 = vsyncpa [#allocation3], 0  ;;  %s5406_s0 = inlined_call_operand.vmem [shape: f32[16,336], index: 0, kind: input, shape index: {}]   ;;  %s5407_s1 = inlined_call_operand.vmem [shape: f32[16,4], index: 1, kind: input, shape index: {}]   ;;  %s5408_s2 = inlined_call_operand.hbm [shape: f32[336,1280], index: 2, kind: input, shape index: {}]   ;;  %s5409_s3 = inlined_call_operand.hbm [shape: f32[1280,768], index: 3, kind: input, shape index: {}]   ;;  %s5410_s4 = inlined_call_operand.vmem [shape: f32[864,32], index: 4, kind: input, shape index: {}]   ;;  %s5411_s5 = inlined_call_operand.hbm [shape: f32[1,2688], index: 5, kind: input, shape index: {}]   ;;  %s5412_s6 = inlined_call_operand.vmem [shape: f32[2,1,8], index: 6, kind: output, shape index: {}]  }
   0x1   :  { %12 = vsyncpa [#allocation5], 0  ;;  %s4786_s21 = smov 0  }
   0x2 LB: > { %s4741_s22 = smov [#allocation4]   ;;  %s4792_s24 = sadd.s32 4294967295, %s4739_s21   ;;  %s4739_s21 = sphi %s4786_s21, %s18_s21  }
   0x3   : > { %s210_s23 = sshll.u32 %s4741_s22, 4  ;;  %p4406_p0 = scmp.ge.s32.totalorder %s4739_s21, 1  ;;  %s211_s23 = int_to_ptr.vmem [resolvable:$true] %s210_s23 }
   0x4   : > { %p185_p1 = scmp.lt.s32.totalorder %s4739_s21, 3  ;;  %p4619_p2 = scmp.eq.s32.totalorder %s4792_s24, 0 }
   0x5   : > { %s4742_s26 = smov [#allocation2]   ;;  %s4743_s29 = smov [#allocation6]  }
   0x6   : > { %p4797_p3 = pnand %p4406_p0, %p185_p1  ;;  %s197_s27 = sshll.u32 %s4742_s26, 4  ;;  %s4803_s27 = int_to_ptr.vmem [resolvable:$true] %s197_s27 }
   0x7   : > { %s4811_s30 = sshll.u32 %s4743_s29, 4  ;;  %s4658_s7 = scalar_lea.vmem %s211_s23, 122880  ;;  %s228_s30 = int_to_ptr.vmem [resolvable:$true] %s4811_s30 }
   0x8   : > { %p4609_p4 = pneg %p4797_p3  ;;  %p4659_p7 = scmp.ne.s32.totalorder %s211_s23, %s4658_s7 }
   0x9   : > { %p4666_p10 = scmp.lt.s32.totalorder %s211_s23, %s211_s23  ;;  %p4667_p11 = scmp.lt.s32.totalorder %s4658_s7, %s4658_s7 }
   0xa   : > { %p4807_p5 = pnand %p4619_p2, %p4609_p4 }
   0xb   : > { %p4668_p12 = por %p4667_p11, %p4666_p10 }
   0xc   : > { %p4649_p6 = pneg %p4807_p5 }
   0xe   : > { %p4661_p8 = pnand %p4659_p7, %p4649_p6 }
  0x10   : > { %p4662_p9 = pneg %p4661_p8 }
  0x12   : > { %p4669_p13 = pnand %p4668_p12, %p4662_p9 }
  0x14   : > { %4672 = shalt.err (!%p4669_p13)
}
  0x15   : > { %s4744_s8 = smov 768   ;;  %s4745_s9 = smov 48  }
  0x16   : > { %4615 = dma.hbm_to_vmem [thread:$0]  (!%p4807_p5), %s5409_s3, 122880, %s211_s23, [#allocation5], %s4744_s8, %s4744_s8, %s4745_s9  }
  0x17   : > { %s4684_s12 = scalar_lea.vmem %s4803_s27, 53760  ;;  %p4692_p7 = scmp.lt.s32.totalorder %s4803_s27, %s4803_s27 }
  0x18   : > { %p4685_p0 = scmp.ne.s32.totalorder %s4803_s27, %s4684_s12  ;;  %p4693_p8 = scmp.lt.s32.totalorder %s4684_s12, %s4684_s12 }
  0x1a   : > { %p4687_p1 = pnand %p4685_p0, %p4649_p6  ;;  %p4694_p9 = por %p4693_p8, %p4692_p7 }
  0x1c   : > { %p4688_p4 = pneg %p4687_p1 }
  0x1e   : > { %p4695_p10 = pnand %p4694_p9, %p4688_p4 }
  0x20   : > { %4698 = shalt.err (!%p4695_p10)
}
  0x21   : > { %s4746_s13 = smov 1280   ;;  %s4747_s14 = smov 80  }
  0x22   : > { %4612 = dma.hbm_to_vmem [thread:$0]  (!%p4807_p5), %s5408_s2, 53760, %s4803_s27, [#allocation3], %s4746_s13, %s4746_s13, %s4747_s14  }
  0x23   : > { %s4710_s17 = scalar_lea.vmem %s228_s30, 336  ;;  %s4717_s18 = scalar_lea.vmem %s228_s30, 352 }
  0x24   : > { %p4711_p11 = scmp.ne.s32.totalorder %s228_s30, %s4710_s17  ;;  %p4718_p0 = scmp.lt.s32.totalorder %s228_s30, %s228_s30 }
  0x25   : > { %p4719_p1 = scmp.lt.s32.totalorder %s4717_s18, %s4710_s17 }
  0x26   : > { %p4713_p12 = pnand %p4711_p11, %p4649_p6 }
  0x27   : > { %p4720_p4 = por %p4719_p1, %p4718_p0 }
  0x28   : > { %p4714_p13 = pneg %p4713_p12 }
  0x2a   : > { %p4721_p7 = pnand %p4720_p4, %p4714_p13 }
  0x2c   : > { %4724 = shalt.err (!%p4721_p7)
}
  0x2d   : > { %4618 = dma.hbm_to_vmem [thread:$0]  (!%p4807_p5), %s5411_s5, 336, %s228_s30, [#allocation5]  }
  0x2e   : > { %255 = sbr.rel (%p4797_p3) target bundleno = 2027 (0x7eb), region = 44 }
  0x33   : > { %4730 = dma.done.wait (%p4619_p2), [#allocation3], 53760  }
  0x34   : > { %4732 = vsyncadd (%p4619_p2), [#allocation3], 4294913536 }
  0x35   : > { %4734 = dma.done.wait (%p4619_p2), [#allocation5], 123216  }
  0x36   : > { %4736 = vsyncadd (%p4619_p2), [#allocation5], 4294844080  ;;  %v4748_v0 = vmov 0.0   ;;  %v461_v1 = vld [vmem:[#allocation2 + $0x4b8] sm:$0xff]  ;;  %v460_v3 = vld [vmem:[#allocation2 + $0x4b0] sm:$0xff]  ;;  %p295_p2 = scmp.lt.s32.totalorder %s4792_s24, 1 }
  0x37   : > { %923 = vmatprep.mubr.f32.mxu1 %v4748_v0  ;;  %v721_v2 = vld [vmem:[#allocation2 + $0xcd8] sm:$0xff]  ;;  %788 = vmatprep.subr.mxu0 %v461_v1  ;;  %v720_v4 = vld [vmem:[#allocation2 + $0xcd0] sm:$0xff]  ;;  %v451_v5 = vld [vmem:[#allocation2 + $0x468] sm:$0xff]  ;;  %vm784_vm0 = vcmask 654336   ;;  %vm3893_vm1 = vcmask 1043456   ;;  %vm4749_vm2 = vmmov 0  }
  0x38   : > { %871 = vmatprep.subr.mxu1 %v721_v2  ;;  %v711_v6 = vld [vmem:[#allocation2 + $0xc88] sm:$0xff]  ;;  %789 = vmatpush1.msra.mxu0 %v460_v3  ;;  %v450_v7 = vld [vmem:[#allocation2 + $0x460] sm:$0xff]  ;;  %v441_v9 = vld [vmem:[#allocation2 + $0x418] sm:$0xff]  ;;  %s5416_s24 = smov (!%p295_p2, %s4792_s24), 1  ;;  %vm3889_vm3 = vcmask 31744   ;;  %vm3967_vm4 = vcmask 130048  }
  0x39   : > { %872 = vmatpush1.msra.mxu1 %v720_v4  ;;  %v710_v8 = vld [vmem:[#allocation2 + $0xc80] sm:$0xff]  ;;  %790 = vmatprep.subr.mxu0 %v451_v5  ;;  %v701_v10 = vld [vmem:[#allocation2 + $0xc38] sm:$0xff]  ;;  %v440_v11 = vld [vmem:[#allocation2 + $0x410] sm:$0xff]  ;;  %s4596_s22 = smul.u32 24, %s5416_s24  ;;  %s4416_s19 = sshll.u32 %s5416_s24, 3  ;;  %vm4061_vm5 = vcmask 261120  }
  0x3a   : > { %873 = vmatprep.subr.mxu1 %v711_v6  ;;  %v700_v12 = vld [vmem:[#allocation2 + $0xc30] sm:$0xff]  ;;  %791 = vmatpush1.msra.mxu0 %v450_v7  ;;  %v431_v13 = vld [vmem:[#allocation2 + $0x3c8] sm:$0xff]  ;;  %v430_v15 = vld [vmem:[#allocation2 + $0x3c0] sm:$0xff]  ;;  %s306_s29 = scalar_lea.vmem %s5412_s6, %s5416_s24  ;;  %vm4312_vm6 = vcmask 57344  }
  0x3b   : > { %874 = vmatpush1.msra.mxu1 %v710_v8  ;;  %v691_v14 = vld [vmem:[#allocation2 + $0xbe8] sm:$0xff]  ;;  %792 = vmatprep.subr.mxu0 %v441_v9  ;;  %v690_v16 = vld [vmem:[#allocation2 + $0xbe0] sm:$0xff]  ;;  %v421_v17 = vld [vmem:[#allocation2 + $0x378] sm:$0xff]  ;;  %s4866_s26 = scalar_lea.vmem %s5406_s0, %s4596_s22 }
  0x3c   : > { %875 = vmatprep.subr.mxu1 %v701_v10  ;;  %793 = vmatpush1.msra.mxu0 %v440_v11  ;;  %v681_v18 = vld [vmem:[#allocation2 + $0xb98] sm:$0xff]  ;;  %v420_v19 = vld [vmem:[#allocation2 + $0x370] sm:$0xff]  ;;  %v411_v21 = vld [vmem:[#allocation2 + $0x328] sm:$0xff] }
  0x3d   : > { %876 = vmatpush1.msra.mxu1 %v700_v12  ;;  %794 = vmatprep.subr.mxu0 %v431_v13  ;;  %v680_v20 = vld [vmem:[#allocation2 + $0xb90] sm:$0xff]  ;;  %v671_v22 = vld [vmem:[#allocation2 + $0xb48] sm:$0xff]  ;;  %v410_v23 = vld [vmem:[#allocation2 + $0x320] sm:$0xff] }
  0x3e   : > { %877 = vmatprep.subr.mxu1 %v691_v14  ;;  %795 = vmatpush1.msra.mxu0 %v430_v15  ;;  %v670_v24 = vld [vmem:[#allocation2 + $0xb40] sm:$0xff]  ;;  %v401_v25 = vld [vmem:[#allocation2 + $0x2d8] sm:$0xff]  ;;  %v400_v27 = vld [vmem:[#allocation2 + $0x2d0] sm:$0xff] }
  0x3f   : > { %878 = vmatpush1.msra.mxu1 %v690_v16  ;;  %796 = vmatprep.subr.mxu0 %v421_v17  ;;  %v661_v26 = vld [vmem:[#allocation2 + $0xaf8] sm:$0xff]  ;;  %v660_v28 = vld [vmem:[#allocation2 + $0xaf0] sm:$0xff]  ;;  %v391_v29 = vld [vmem:[#allocation2 + $0x288] sm:$0xff] }
  0x40   : > { %879 = vmatprep.subr.mxu1 %v681_v18  ;;  %797 = vmatpush1.msra.mxu0 %v420_v19  ;;  %v651_v30 = vld [vmem:[#allocation2 + $0xaa8] sm:$0xff]  ;;  %v390_v31 = vld [vmem:[#allocation2 + $0x280] sm:$0xff]  ;;  %v381_v33 = vld [vmem:[#allocation2 + $0x238] sm:$0xff] }
  0x41   : > { %880 = vmatpush1.msra.mxu1 %v680_v20  ;;  %798 = vmatprep.subr.mxu0 %v411_v21  ;;  %v650_v32 = vld [vmem:[#allocation2 + $0xaa0] sm:$0xff]  ;;  %v641_v34 = vld [vmem:[#allocation2 + $0xa58] sm:$0xff]  ;;  %v380_v35 = vld [vmem:[#allocation2 + $0x230] sm:$0xff] }
  0x42   : > { %881 = vmatprep.subr.mxu1 %v671_v22  ;;  %799 = vmatpush1.msra.mxu0 %v410_v23  ;;  %v640_v36 = vld [vmem:[#allocation2 + $0xa50] sm:$0xff]  ;;  %v371_v37 = vld [vmem:[#allocation2 + $0x1e8] sm:$0xff]  ;;  %v370_v39 = vld [vmem:[#allocation2 + $0x1e0] sm:$0xff] }
  0x43   : > { %882 = vmatpush1.msra.mxu1 %v670_v24  ;;  %800 = vmatprep.subr.mxu0 %v401_v25  ;;  %v631_v38 = vld [vmem:[#allocation2 + $0xa08] sm:$0xff]  ;;  %v630_v40 = vld [vmem:[#allocation2 + $0xa00] sm:$0xff]  ;;  %v361_v41 = vld [vmem:[#allocation2 + $0x198] sm:$0xff] }
  0x44   : > { %883 = vmatprep.subr.mxu1 %v661_v26  ;;  %801 = vmatpush1.msra.mxu0 %v400_v27  ;;  %v463_v42 = vld [vmem:[#allocation2 + $0x4c8] sm:$0xff]  ;;  %v360_v43 = vld [vmem:[#allocation2 + $0x190] sm:$0xff]  ;;  %v462_v45 = vld [vmem:[#allocation2 + $0x4c0] sm:$0xff] }
  0x45   : > { %884 = vmatpush1.msra.mxu1 %v660_v28  ;;  %802 = vmatprep.subr.mxu0 %v391_v29  ;;  %v4869_v44 = vld [vmem:[%s4866_s26 + $0x10] sm:$0xff]  ;;  %v351_v46 = vld [vmem:[#allocation2 + $0x148] sm:$0xff]  ;;  %v453_v47 = vld [vmem:[#allocation2 + $0x478] sm:$0xff] }
  0x46   : > { %885 = vmatprep.subr.mxu1 %v651_v30  ;;  %803 = vmatpush1.msra.mxu0 %v390_v31  ;;  %v350_v48 = vld [vmem:[#allocation2 + $0x140] sm:$0xff]  ;;  %v452_v49 = vld [vmem:[#allocation2 + $0x470] sm:$0xff]  ;;  %v341_v50 = vld [vmem:[#allocation2 + $0xf8] sm:$0xff] }
  0x47   : > { %886 = vmatpush1.msra.mxu1 %v650_v32  ;;  %804 = vmatprep.subr.mxu0 %v381_v33  ;;  %v443_v51 = vld [vmem:[#allocation2 + $0x428] sm:$0xff]  ;;  %v340_v52 = vld [vmem:[#allocation2 + $0xf0] sm:$0xff]  ;;  %v442_v53 = vld [vmem:[#allocation2 + $0x420] sm:$0xff] }
  0x48   : > { %887 = vmatprep.subr.mxu1 %v641_v34  ;;  %805 = vmatpush1.msra.mxu0 %v380_v35  ;;  %v331_v54 = vld [vmem:[#allocation2 + $0xa8] sm:$0xff]  ;;  %v433_v55 = vld [vmem:[#allocation2 + $0x3d8] sm:$0xff]  ;;  %v330_v56 = vld [vmem:[#allocation2 + $0xa0] sm:$0xff] }
  0x49   : > { %888 = vmatpush1.msra.mxu1 %v640_v36  ;;  %806 = vmatprep.subr.mxu0 %v371_v37  ;;  %v432_v57 = vld [vmem:[#allocation2 + $0x3d0] sm:$0xff]  ;;  %v321_v58 = vld [vmem:[#allocation2 + $0x58] sm:$0xff]  ;;  %v423_v59 = vld [vmem:[#allocation2 + $0x388] sm:$0xff] }
  0x4a   : > { %889 = vmatprep.subr.mxu1 %v631_v38  ;;  %807 = vmatpush1.msra.mxu0 %v370_v39  ;;  %v320_v60 = vld [vmem:[#allocation2 + $0x50] sm:$0xff]  ;;  %v422_v61 = vld [vmem:[#allocation2 + $0x380] sm:$0xff]  ;;  %v311_v62 = vld [vmem:[#allocation2 + $0x8] sm:$0xff] }
  0x4b   : > { %890 = vmatpush1.msra.mxu1 %v630_v40  ;;  %808 = vmatprep.subr.mxu0 %v361_v41  ;;  %v413_v63 = vld [vmem:[#allocation2 + $0x338] sm:$0xff]  ;;  %v310_v1 = vld [vmem:[#allocation2] sm:$0xff]  ;;  %v412_v2 = vld [vmem:[#allocation2 + $0x330] sm:$0xff] }
  0x4c   : > { %930 = vmatprep.subr.mxu1 %v463_v42  ;;  %809 = vmatpush1.msra.mxu0 %v360_v43  ;;  %v621_v3 = vld [vmem:[#allocation2 + $0x9b8] sm:$0xff]  ;;  %v403_v4 = vld [vmem:[#allocation2 + $0x2e8] sm:$0xff]  ;;  %v620_v5 = vld [vmem:[#allocation2 + $0x9b0] sm:$0xff] }
  0x4d   : > { %4417 = vmatmul.mubr.msk.f32.vlgmr.msra.gmra.mxu1 %vm784_vm0, %v4869_v44  ;;  %810 = vmatprep.subr.mxu0 %v351_v46  ;;  %v402_v6 = vld [vmem:[#allocation2 + $0x2e0] sm:$0xff]  ;;  %v611_v7 = vld [vmem:[#allocation2 + $0x968] sm:$0xff]  ;;  %v393_v8 = vld [vmem:[#allocation2 + $0x298] sm:$0xff] }
  0x4e   : > { %931 = vmatpush1.msra.mxu1 %v462_v45  ;;  %811 = vmatpush1.msra.mxu0 %v350_v48  ;;  %v610_v9 = vld [vmem:[#allocation2 + $0x960] sm:$0xff]  ;;  %v392_v10 = vld [vmem:[#allocation2 + $0x290] sm:$0xff]  ;;  %v601_v11 = vld [vmem:[#allocation2 + $0x918] sm:$0xff] }
  0x4f   : > { %932 = vmatprep.subr.mxu1 %v453_v47  ;;  %812 = vmatprep.subr.mxu0 %v341_v50  ;;  %v383_v12 = vld [vmem:[#allocation2 + $0x248] sm:$0xff]  ;;  %v600_v13 = vld [vmem:[#allocation2 + $0x910] sm:$0xff]  ;;  %v382_v14 = vld [vmem:[#allocation2 + $0x240] sm:$0xff] }
  0x50   : > { %933 = vmatpush1.msra.mxu1 %v452_v49  ;;  %813 = vmatpush1.msra.mxu0 %v340_v52  ;;  %v591_v15 = vld [vmem:[#allocation2 + $0x8c8] sm:$0xff]  ;;  %v373_v16 = vld [vmem:[#allocation2 + $0x1f8] sm:$0xff]  ;;  %v590_v17 = vld [vmem:[#allocation2 + $0x8c0] sm:$0xff] }
  0x51   : > { %934 = vmatprep.subr.mxu1 %v443_v51  ;;  %814 = vmatprep.subr.mxu0 %v331_v54  ;;  %v372_v18 = vld [vmem:[#allocation2 + $0x1f0] sm:$0xff]  ;;  %v581_v19 = vld [vmem:[#allocation2 + $0x878] sm:$0xff]  ;;  %v363_v20 = vld [vmem:[#allocation2 + $0x1a8] sm:$0xff] }
  0x52   : > { %935 = vmatpush1.msra.mxu1 %v442_v53  ;;  %815 = vmatpush1.msra.mxu0 %v330_v56  ;;  %v580_v21 = vld [vmem:[#allocation2 + $0x870] sm:$0xff]  ;;  %v362_v22 = vld [vmem:[#allocation2 + $0x1a0] sm:$0xff]  ;;  %v571_v23 = vld [vmem:[#allocation2 + $0x828] sm:$0xff] }
  0x53   : > { %936 = vmatprep.subr.mxu1 %v433_v55  ;;  %816 = vmatprep.subr.mxu0 %v321_v58  ;;  %v353_v24 = vld [vmem:[#allocation2 + $0x158] sm:$0xff]  ;;  %v570_v25 = vld [vmem:[#allocation2 + $0x820] sm:$0xff]  ;;  %v352_v26 = vld [vmem:[#allocation2 + $0x150] sm:$0xff] }
  0x54   : > { %937 = vmatpush1.msra.mxu1 %v432_v57  ;;  %817 = vmatpush1.msra.mxu0 %v320_v60  ;;  %v561_v27 = vld [vmem:[#allocation2 + $0x7d8] sm:$0xff]  ;;  %v343_v28 = vld [vmem:[#allocation2 + $0x108] sm:$0xff]  ;;  %v560_v29 = vld [vmem:[#allocation2 + $0x7d0] sm:$0xff] }
  0x55   : > { %938 = vmatprep.subr.mxu1 %v423_v59  ;;  %818 = vmatprep.subr.mxu0 %v311_v62  ;;  %v342_v30 = vld [vmem:[#allocation2 + $0x100] sm:$0xff]  ;;  %v551_v31 = vld [vmem:[#allocation2 + $0x788] sm:$0xff]  ;;  %v333_v32 = vld [vmem:[#allocation2 + $0xb8] sm:$0xff] }
  0x56   : > { %939 = vmatpush1.msra.mxu1 %v422_v61  ;;  %819 = vmatpush1.msra.mxu0 %v310_v1  ;;  %v550_v33 = vld [vmem:[#allocation2 + $0x780] sm:$0xff]  ;;  %v332_v34 = vld [vmem:[#allocation2 + $0xb0] sm:$0xff]  ;;  %v541_v35 = vld [vmem:[#allocation2 + $0x738] sm:$0xff] }
  0x57   : > { %940 = vmatprep.subr.mxu1 %v413_v63  ;;  %820 = vmatprep.subr.mxu0 %v621_v3  ;;  %v323_v36 = vld [vmem:[#allocation2 + $0x68] sm:$0xff]  ;;  %v540_v37 = vld [vmem:[#allocation2 + $0x730] sm:$0xff]  ;;  %v322_v38 = vld [vmem:[#allocation2 + $0x60] sm:$0xff] }
  0x58   : > { %941 = vmatpush1.msra.mxu1 %v412_v2  ;;  %821 = vmatpush2.msra.mxu0 %v620_v5  ;;  %v531_v39 = vld [vmem:[#allocation2 + $0x6e8] sm:$0xff]  ;;  %v313_v40 = vld [vmem:[#allocation2 + $0x18] sm:$0xff]  ;;  %v530_v41 = vld [vmem:[#allocation2 + $0x6e0] sm:$0xff] }
  0x59   : > { %942 = vmatprep.subr.mxu1 %v403_v4  ;;  %822 = vmatprep.subr.mxu0 %v611_v7  ;;  %v312_v42 = vld [vmem:[#allocation2 + $0x10] sm:$0xff]  ;;  %v521_v43 = vld [vmem:[#allocation2 + $0x698] sm:$0xff]  ;;  %v623_v45 = vld [vmem:[#allocation2 + $0x9c8] sm:$0xff] }
  0x5a   : > { %943 = vmatpush1.msra.mxu1 %v402_v6  ;;  %823 = vmatpush2.msra.mxu0 %v610_v9  ;;  %v520_v46 = vld [vmem:[#allocation2 + $0x690] sm:$0xff]  ;;  %v622_v47 = vld [vmem:[#allocation2 + $0x9c0] sm:$0xff]  ;;  %v511_v48 = vld [vmem:[#allocation2 + $0x648] sm:$0xff] }
  0x5b   : > { %944 = vmatprep.subr.mxu1 %v393_v8  ;;  %824 = vmatprep.subr.mxu0 %v601_v11  ;;  %v613_v49 = vld [vmem:[#allocation2 + $0x978] sm:$0xff]  ;;  %v510_v50 = vld [vmem:[#allocation2 + $0x640] sm:$0xff]  ;;  %v612_v51 = vld [vmem:[#allocation2 + $0x970] sm:$0xff] }
  0x5c   : > { %945 = vmatpush1.msra.mxu1 %v392_v10  ;;  %825 = vmatpush2.msra.mxu0 %v600_v13  ;;  %v501_v52 = vld [vmem:[#allocation2 + $0x5f8] sm:$0xff]  ;;  %v603_v53 = vld [vmem:[#allocation2 + $0x928] sm:$0xff]  ;;  %v500_v54 = vld [vmem:[#allocation2 + $0x5f0] sm:$0xff] }
  0x5d   : > { %946 = vmatprep.subr.mxu1 %v383_v12  ;;  %826 = vmatprep.subr.mxu0 %v591_v15  ;;  %v602_v55 = vld [vmem:[#allocation2 + $0x920] sm:$0xff]  ;;  %v491_v56 = vld [vmem:[#allocation2 + $0x5a8] sm:$0xff]  ;;  %v593_v57 = vld [vmem:[#allocation2 + $0x8d8] sm:$0xff] }
  0x5e   : > { %947 = vmatpush1.msra.mxu1 %v382_v14  ;;  %827 = vmatpush2.msra.mxu0 %v590_v17  ;;  %v490_v58 = vld [vmem:[#allocation2 + $0x5a0] sm:$0xff]  ;;  %v592_v59 = vld [vmem:[#allocation2 + $0x8d0] sm:$0xff]  ;;  %v481_v60 = vld [vmem:[#allocation2 + $0x558] sm:$0xff] }
  0x5f   : > { %948 = vmatprep.subr.mxu1 %v373_v16  ;;  %828 = vmatprep.subr.mxu0 %v581_v19  ;;  %v583_v61 = vld [vmem:[#allocation2 + $0x888] sm:$0xff]  ;;  %v480_v62 = vld [vmem:[#allocation2 + $0x550] sm:$0xff]  ;;  %v582_v63 = vld [vmem:[#allocation2 + $0x880] sm:$0xff] }
  0x60   : > { %949 = vmatpush1.msra.mxu1 %v372_v18  ;;  %829 = vmatpush2.msra.mxu0 %v580_v21  ;;  %v471_v1 = vld [vmem:[#allocation2 + $0x508] sm:$0xff]  ;;  %v573_v2 = vld [vmem:[#allocation2 + $0x838] sm:$0xff]  ;;  %v470_v3 = vld [vmem:[#allocation2 + $0x500] sm:$0xff] }
  0x61   : > { %950 = vmatprep.subr.mxu1 %v363_v20  ;;  %830 = vmatprep.subr.mxu0 %v571_v23  ;;  %v4874_v4 = vld [vmem:[%s4866_s26 + $0x8] sm:$0xff]  ;;  %v572_v5 = vld [vmem:[#allocation2 + $0x830] sm:$0xff]  ;;  %v4877_v6 = vld [vmem:[%s4866_s26] sm:$0xff] }
  0x62   : > { %951 = vmatpush1.msra.mxu1 %v362_v22  ;;  %831 = vmatpush2.msra.mxu0 %v570_v25  ;;  %v563_v7 = vld [vmem:[#allocation2 + $0x7e8] sm:$0xff]  ;;  %v562_v9 = vld [vmem:[#allocation2 + $0x7e0] sm:$0xff]  ;;  %v553_v11 = vld [vmem:[#allocation2 + $0x798] sm:$0xff] }
  0x63   : > { %952 = vmatprep.subr.mxu1 %v353_v24  ;;  %832 = vmatprep.subr.mxu0 %v561_v27  ;;  %v723_v8 = vld [vmem:[#allocation2 + $0xce8] sm:$0xff]  ;;  %v722_v10 = vld [vmem:[#allocation2 + $0xce0] sm:$0xff]  ;;  %v713_v12 = vld [vmem:[#allocation2 + $0xc98] sm:$0xff] }
  0x64   : > { %953 = vmatpush1.msra.mxu1 %v352_v26  ;;  %833 = vmatpush2.msra.mxu0 %v560_v29  ;;  %v552_v13 = vld [vmem:[#allocation2 + $0x790] sm:$0xff]  ;;  %v543_v15 = vld [vmem:[#allocation2 + $0x748] sm:$0xff]  ;;  %v542_v17 = vld [vmem:[#allocation2 + $0x740] sm:$0xff] }
  0x65   : > { %954 = vmatprep.subr.mxu1 %v343_v28  ;;  %834 = vmatprep.subr.mxu0 %v551_v31  ;;  %v712_v14 = vld [vmem:[#allocation2 + $0xc90] sm:$0xff]  ;;  %v703_v16 = vld [vmem:[#allocation2 + $0xc48] sm:$0xff]  ;;  %v702_v18 = vld [vmem:[#allocation2 + $0xc40] sm:$0xff] }
  0x66   : > { %955 = vmatpush1.msra.mxu1 %v342_v30  ;;  %835 = vmatpush2.msra.mxu0 %v550_v33  ;;  %v533_v19 = vld [vmem:[#allocation2 + $0x6f8] sm:$0xff]  ;;  %v532_v21 = vld [vmem:[#allocation2 + $0x6f0] sm:$0xff]  ;;  %v523_v23 = vld [vmem:[#allocation2 + $0x6a8] sm:$0xff] }
  0x67   : > { %956 = vmatprep.subr.mxu1 %v333_v32  ;;  %836 = vmatprep.subr.mxu0 %v541_v35  ;;  %v693_v20 = vld [vmem:[#allocation2 + $0xbf8] sm:$0xff]  ;;  %v692_v22 = vld [vmem:[#allocation2 + $0xbf0] sm:$0xff]  ;;  %v683_v24 = vld [vmem:[#allocation2 + $0xba8] sm:$0xff] }
  0x68   : > { %957 = vmatpush1.msra.mxu1 %v332_v34  ;;  %837 = vmatpush2.msra.mxu0 %v540_v37  ;;  %v522_v25 = vld [vmem:[#allocation2 + $0x6a0] sm:$0xff]  ;;  %v513_v27 = vld [vmem:[#allocation2 + $0x658] sm:$0xff]  ;;  %v512_v29 = vld [vmem:[#allocation2 + $0x650] sm:$0xff] }
  0x69   : > { %958 = vmatprep.subr.mxu1 %v323_v36  ;;  %838 = vmatprep.subr.mxu0 %v531_v39  ;;  %v682_v26 = vld [vmem:[#allocation2 + $0xba0] sm:$0xff]  ;;  %v673_v28 = vld [vmem:[#allocation2 + $0xb58] sm:$0xff]  ;;  %v672_v30 = vld [vmem:[#allocation2 + $0xb50] sm:$0xff] }
  0x6a   : > { %959 = vmatpush1.msra.mxu1 %v322_v38  ;;  %839 = vmatpush2.msra.mxu0 %v530_v41  ;;  %v503_v31 = vld [vmem:[#allocation2 + $0x608] sm:$0xff]  ;;  %v502_v33 = vld [vmem:[#allocation2 + $0x600] sm:$0xff]  ;;  %v493_v35 = vld [vmem:[#allocation2 + $0x5b8] sm:$0xff] }
  0x6b   : > { %960 = vmatprep.subr.mxu1 %v313_v40  ;;  %840 = vmatprep.subr.mxu0 %v521_v43  ;;  %v663_v32 = vld [vmem:[#allocation2 + $0xb08] sm:$0xff]  ;;  %v662_v34 = vld [vmem:[#allocation2 + $0xb00] sm:$0xff]  ;;  %v653_v36 = vld [vmem:[#allocation2 + $0xab8] sm:$0xff] }
  0x6c   : > { %961 = vmatpush1.msra.mxu1 %v312_v42  ;;  %841 = vmatpush2.msra.mxu0 %v520_v46  ;;  %v492_v37 = vld [vmem:[#allocation2 + $0x5b0] sm:$0xff]  ;;  %v483_v39 = vld [vmem:[#allocation2 + $0x568] sm:$0xff]  ;;  %v482_v41 = vld [vmem:[#allocation2 + $0x560] sm:$0xff] }
  0x6d   : > { %962 = vmatprep.subr.mxu1 %v623_v45  ;;  %842 = vmatprep.subr.mxu0 %v511_v48  ;;  %v652_v38 = vld [vmem:[#allocation2 + $0xab0] sm:$0xff]  ;;  %v643_v40 = vld [vmem:[#allocation2 + $0xa68] sm:$0xff]  ;;  %v642_v42 = vld [vmem:[#allocation2 + $0xa60] sm:$0xff] }
  0x6e   : > { %963 = vmatpush2.msra.mxu1 %v622_v47  ;;  %843 = vmatpush2.msra.mxu0 %v510_v50  ;;  %v473_v43 = vld [vmem:[#allocation2 + $0x518] sm:$0xff]  ;;  %v472_v46 = vld [vmem:[#allocation2 + $0x510] sm:$0xff] }
  0x6f   : > { %964 = vmatprep.subr.mxu1 %v613_v49  ;;  %844 = vmatprep.subr.mxu0 %v501_v52  ;;  %v633_v45 = vld [vmem:[#allocation2 + $0xa18] sm:$0xff]  ;;  %v632_v47 = vld [vmem:[#allocation2 + $0xa10] sm:$0xff]  ;;  %v455_v52 = vld [vmem:[#allocation2 + $0x488] sm:$0xff] }
  0x70   : > { %965 = vmatpush2.msra.mxu1 %v612_v51  ;;  %845 = vmatpush2.msra.mxu0 %v500_v54  ;;  %v465_v48 = vld [vmem:[#allocation2 + $0x4d8] sm:$0xff]  ;;  %v464_v50 = vld [vmem:[#allocation2 + $0x4d0] sm:$0xff]  ;;  %v454_v54 = vld [vmem:[#allocation2 + $0x480] sm:$0xff] }
  0x71   : > { %966 = vmatprep.subr.mxu1 %v603_v53  ;;  %846 = vmatprep.subr.mxu0 %v491_v56  ;;  %v725_v49 = vld [vmem:[#allocation2 + $0xcf8] sm:$0xff]  ;;  %v724_v51 = vld [vmem:[#allocation2 + $0xcf0] sm:$0xff]  ;;  %v715_v53 = vld [vmem:[#allocation2 + $0xca8] sm:$0xff] }
  0x72   : > { %967 = vmatpush2.msra.mxu1 %v602_v55  ;;  %847 = vmatpush2.msra.mxu0 %v490_v58  ;;  %v714_v55 = vld [vmem:[#allocation2 + $0xca0] sm:$0xff]  ;;  %v445_v56 = vld [vmem:[#allocation2 + $0x438] sm:$0xff]  ;;  %v444_v58 = vld [vmem:[#allocation2 + $0x430] sm:$0xff] }
  0x73   : > { %968 = vmatprep.subr.mxu1 %v593_v57  ;;  %848 = vmatprep.subr.mxu0 %v481_v60  ;;  %v705_v57 = vld [vmem:[#allocation2 + $0xc58] sm:$0xff]  ;;  %v435_v60 = vld [vmem:[#allocation2 + $0x3e8] sm:$0xff] }
  0x74   : > { %969 = vmatpush2.msra.mxu1 %v592_v59  ;;  %849 = vmatpush2.msra.mxu0 %v480_v62  ;;  %v704_v59 = vld [vmem:[#allocation2 + $0xc50] sm:$0xff]  ;;  %v434_v62 = vld [vmem:[#allocation2 + $0x3e0] sm:$0xff] }
  0x75   : > { %970 = vmatprep.subr.mxu1 %v583_v61  ;;  %850 = vmatprep.subr.mxu0 %v471_v1  ;;  %v695_v61 = vld [vmem:[#allocation2 + $0xc08] sm:$0xff]  ;;  %v425_v1 = vld [vmem:[#allocation2 + $0x398] sm:$0xff] }
  0x76   : > { %971 = vmatpush2.msra.mxu1 %v582_v63  ;;  %851 = vmatpush2.msra.mxu0 %v470_v3  ;;  %v694_v63 = vld [vmem:[#allocation2 + $0xc00] sm:$0xff]  ;;  %v424_v3 = vld [vmem:[#allocation2 + $0x390] sm:$0xff] }
  0x77   : > { %972 = vmatprep.subr.mxu1 %v573_v2  ;;  %852 = vmatprep.mubr.f32.mxu0 %v4874_v4  ;;  %v685_v2 = vld [vmem:[#allocation2 + $0xbb8] sm:$0xff] }
  0x78   : > { %973 = vmatpush2.msra.mxu1 %v572_v5  ;;  %853 = vmatmul.mubr.f32.vlgmr.msra.gmra.mxu0 %v4877_v6  ;;  %v684_v5 = vld [vmem:[#allocation2 + $0xbb0] sm:$0xff] }
  0x79   : > { %974 = vmatprep.subr.mxu1 %v563_v7  ;;  %1013 = vmatprep.subr.mxu0 %v723_v8  ;;  %v415_v7 = vld [vmem:[#allocation2 + $0x348] sm:$0xff] }
  0x7a   : > { %975 = vmatpush2.msra.mxu1 %v562_v9  ;;  %1014 = vmatpush1.msra.mxu0 %v722_v10  ;;  %v675_v8 = vld [vmem:[#allocation2 + $0xb68] sm:$0xff]  ;;  %v414_v9 = vld [vmem:[#allocation2 + $0x340] sm:$0xff] }
  0x7b   : > { %976 = vmatprep.subr.mxu1 %v553_v11  ;;  %1015 = vmatprep.subr.mxu0 %v713_v12  ;;  %v674_v10 = vld [vmem:[#allocation2 + $0xb60] sm:$0xff]  ;;  %v405_v11 = vld [vmem:[#allocation2 + $0x2f8] sm:$0xff] }
  0x7c   : > { %977 = vmatpush2.msra.mxu1 %v552_v13  ;;  %1016 = vmatpush1.msra.mxu0 %v712_v14  ;;  %v665_v12 = vld [vmem:[#allocation2 + $0xb18] sm:$0xff]  ;;  %v404_v13 = vld [vmem:[#allocation2 + $0x2f0] sm:$0xff] }
  0x7d   : > { %978 = vmatprep.subr.mxu1 %v543_v15  ;;  %1017 = vmatprep.subr.mxu0 %v703_v16  ;;  %v664_v14 = vld [vmem:[#allocation2 + $0xb10] sm:$0xff]  ;;  %v395_v15 = vld [vmem:[#allocation2 + $0x2a8] sm:$0xff] }
  0x7e   : > { %979 = vmatpush2.msra.mxu1 %v542_v17  ;;  %1018 = vmatpush1.msra.mxu0 %v702_v18  ;;  %v655_v16 = vld [vmem:[#allocation2 + $0xac8] sm:$0xff]  ;;  %v394_v17 = vld [vmem:[#allocation2 + $0x2a0] sm:$0xff] }
  0x7f   : > { %980 = vmatprep.subr.mxu1 %v533_v19  ;;  %1019 = vmatprep.subr.mxu0 %v693_v20  ;;  %v654_v18 = vld [vmem:[#allocation2 + $0xac0] sm:$0xff]  ;;  %v385_v19 = vld [vmem:[#allocation2 + $0x258] sm:$0xff] }
  0x80   : > { %981 = vmatpush2.msra.mxu1 %v532_v21  ;;  %1020 = vmatpush1.msra.mxu0 %v692_v22  ;;  %v645_v20 = vld [vmem:[#allocation2 + $0xa78] sm:$0xff]  ;;  %v384_v21 = vld [vmem:[#allocation2 + $0x250] sm:$0xff] }
  0x81   : > { %982 = vmatprep.subr.mxu1 %v523_v23  ;;  %1021 = vmatprep.subr.mxu0 %v683_v24  ;;  %v644_v22 = vld [vmem:[#allocation2 + $0xa70] sm:$0xff]  ;;  %v375_v23 = vld [vmem:[#allocation2 + $0x208] sm:$0xff] }
  0x82   : > { %983 = vmatpush2.msra.mxu1 %v522_v25  ;;  %1022 = vmatpush1.msra.mxu0 %v682_v26  ;;  %v635_v24 = vld [vmem:[#allocation2 + $0xa28] sm:$0xff]  ;;  %v374_v25 = vld [vmem:[#allocation2 + $0x200] sm:$0xff] }
  0x83   : > { %984 = vmatprep.subr.mxu1 %v513_v27  ;;  %1023 = vmatprep.subr.mxu0 %v673_v28  ;;  %v634_v26 = vld [vmem:[#allocation2 + $0xa20] sm:$0xff]  ;;  %v365_v27 = vld [vmem:[#allocation2 + $0x1b8] sm:$0xff]  ;;  %v467_v28 = vld [vmem:[#allocation2 + $0x4e8] sm:$0xff] }
  0x84   : > { %985 = vmatpush2.msra.mxu1 %v512_v29  ;;  %1024 = vmatpush1.msra.mxu0 %v672_v30  ;;  %v364_v29 = vld [vmem:[#allocation2 + $0x1b0] sm:$0xff]  ;;  %v466_v30 = vld [vmem:[#allocation2 + $0x4e0] sm:$0xff] }
  0x85   : > { %986 = vmatprep.subr.mxu1 %v503_v31  ;;  %1025 = vmatprep.subr.mxu0 %v663_v32  ;;  %v355_v31 = vld [vmem:[#allocation2 + $0x168] sm:$0xff]  ;;  %v457_v32 = vld [vmem:[#allocation2 + $0x498] sm:$0xff] }
  0x86   : > { %987 = vmatpush2.msra.mxu1 %v502_v33  ;;  %1026 = vmatpush1.msra.mxu0 %v662_v34  ;;  %v354_v33 = vld [vmem:[#allocation2 + $0x160] sm:$0xff]  ;;  %v456_v34 = vld [vmem:[#allocation2 + $0x490] sm:$0xff] }
  0x87   : > { %988 = vmatprep.subr.mxu1 %v493_v35  ;;  %1027 = vmatprep.subr.mxu0 %v653_v36  ;;  %v345_v35 = vld [vmem:[#allocation2 + $0x118] sm:$0xff]  ;;  %v447_v36 = vld [vmem:[#allocation2 + $0x448] sm:$0xff] }
  0x88   : > { %989 = vmatpush2.msra.mxu1 %v492_v37  ;;  %1028 = vmatpush1.msra.mxu0 %v652_v38  ;;  %v344_v37 = vld [vmem:[#allocation2 + $0x110] sm:$0xff]  ;;  %v446_v38 = vld [vmem:[#allocation2 + $0x440] sm:$0xff] }
  0x89   : > { %990 = vmatprep.subr.mxu1 %v483_v39  ;;  %1029 = vmatprep.subr.mxu0 %v643_v40  ;;  %v335_v39 = vld [vmem:[#allocation2 + $0xc8] sm:$0xff]  ;;  %v437_v40 = vld [vmem:[#allocation2 + $0x3f8] sm:$0xff] }
  0x8a   : > { %991 = vmatpush2.msra.mxu1 %v482_v41  ;;  %1030 = vmatpush1.msra.mxu0 %v642_v42  ;;  %v334_v41 = vld [vmem:[#allocation2 + $0xc0] sm:$0xff]  ;;  %v436_v42 = vld [vmem:[#allocation2 + $0x3f0] sm:$0xff] }
  0x8b   : > { %992 = vmatprep.subr.mxu1 %v473_v43  ;;  %1031 = vmatprep.subr.mxu0 %v633_v45  ;;  %v325_v43 = vld [vmem:[#allocation2 + $0x78] sm:$0xff]  ;;  %v324_v45 = vld [vmem:[#allocation2 + $0x70] sm:$0xff] }
  0x8c   : > { %993 = vmatpush2.msra.mxu1 %v472_v46  ;;  %994 = vmatprep.mubr.f32.mxu1 %v4874_v4  ;;  %v426_v46 = vld [vmem:[#allocation2 + $0x3a0] sm:$0xff] }
  0x8d   : > { %1032 = vmatpush1.msra.mxu0 %v632_v47  ;;  %1065 = vmatprep.mubr.f32.mxu0 %v4748_v0  ;;  %v315_v47 = vld [vmem:[#allocation2 + $0x28] sm:$0xff] }
  0x8e   : > { %995 = vmatmul.mubr.f32.vlgmr.msra.gmra.mxu1 %v4877_v6  ;;  %4418 = vmatmul.mubr.msk.f32.vlgmr.msra.gmra.mxu0 %vm784_vm0, %v4869_v44 }
  0x8f   : > { %1072 = vmatprep.subr.mxu0 %v465_v48  ;;  %1155 = vmatprep.subr.mxu1 %v725_v49  ;;  %v417_v48 = vld [vmem:[#allocation2 + $0x358] sm:$0xff]  ;;  %v314_v49 = vld [vmem:[#allocation2 + $0x20] sm:$0xff] }
  0x90   : > { %1073 = vmatpush1.msra.mxu0 %v464_v50  ;;  %1156 = vmatpush1.msra.mxu1 %v724_v51  ;;  %v416_v50 = vld [vmem:[#allocation2 + $0x350] sm:$0xff]  ;;  %v625_v51 = vld [vmem:[#allocation2 + $0x9d8] sm:$0xff] }
  0x91   : > { %1074 = vmatprep.subr.mxu0 %v455_v52  ;;  %1157 = vmatprep.subr.mxu1 %v715_v53  ;;  %v407_v52 = vld [vmem:[#allocation2 + $0x308] sm:$0xff]  ;;  %v624_v53 = vld [vmem:[#allocation2 + $0x9d0] sm:$0xff] }
  0x92   : > { %1075 = vmatpush1.msra.mxu0 %v454_v54  ;;  %1158 = vmatpush1.msra.mxu1 %v714_v55  ;;  %v406_v54 = vld [vmem:[#allocation2 + $0x300] sm:$0xff]  ;;  %v615_v55 = vld [vmem:[#allocation2 + $0x988] sm:$0xff] }
  0x93   : > { %1076 = vmatprep.subr.mxu0 %v445_v56  ;;  %1159 = vmatprep.subr.mxu1 %v705_v57  ;;  %v397_v56 = vld [vmem:[#allocation2 + $0x2b8] sm:$0xff]  ;;  %v614_v57 = vld [vmem:[#allocation2 + $0x980] sm:$0xff] }
  0x94   : > { %1077 = vmatpush1.msra.mxu0 %v444_v58  ;;  %1160 = vmatpush1.msra.mxu1 %v704_v59  ;;  %v396_v58 = vld [vmem:[#allocation2 + $0x2b0] sm:$0xff]  ;;  %v605_v59 = vld [vmem:[#allocation2 + $0x938] sm:$0xff] }
  0x95   : > { %1078 = vmatprep.subr.mxu0 %v435_v60  ;;  %1161 = vmatprep.subr.mxu1 %v695_v61  ;;  %v387_v60 = vld [vmem:[#allocation2 + $0x268] sm:$0xff]  ;;  %v604_v61 = vld [vmem:[#allocation2 + $0x930] sm:$0xff] }
  0x96   : > { %1079 = vmatpush1.msra.mxu0 %v434_v62  ;;  %1162 = vmatpush1.msra.mxu1 %v694_v63  ;;  %v386_v62 = vld [vmem:[#allocation2 + $0x260] sm:$0xff]  ;;  %v595_v63 = vld [vmem:[#allocation2 + $0x8e8] sm:$0xff] }
  0x97   : > { %1080 = vmatprep.subr.mxu0 %v425_v1  ;;  %1163 = vmatprep.subr.mxu1 %v685_v2  ;;  %v377_v1 = vld [vmem:[#allocation2 + $0x218] sm:$0xff]  ;;  %v594_v2 = vld [vmem:[#allocation2 + $0x8e0] sm:$0xff] }
  0x98   : > { %1081 = vmatpush1.msra.mxu0 %v424_v3  ;;  %1164 = vmatpush1.msra.mxu1 %v684_v5  ;;  %v376_v3 = vld [vmem:[#allocation2 + $0x210] sm:$0xff]  ;;  %v585_v5 = vld [vmem:[#allocation2 + $0x898] sm:$0xff] }
  0x99   : > { %1082 = vmatprep.subr.mxu0 %v415_v7  ;;  %1165 = vmatprep.subr.mxu1 %v675_v8  ;;  %v367_v7 = vld [vmem:[#allocation2 + $0x1c8] sm:$0xff]  ;;  %v584_v8 = vld [vmem:[#allocation2 + $0x890] sm:$0xff] }
  0x9a   : > { %1083 = vmatpush1.msra.mxu0 %v414_v9  ;;  %1166 = vmatpush1.msra.mxu1 %v674_v10  ;;  %v366_v9 = vld [vmem:[#allocation2 + $0x1c0] sm:$0xff]  ;;  %v575_v10 = vld [vmem:[#allocation2 + $0x848] sm:$0xff] }
  0x9b   : > { %1084 = vmatprep.subr.mxu0 %v405_v11  ;;  %1167 = vmatprep.subr.mxu1 %v665_v12  ;;  %v357_v11 = vld [vmem:[#allocation2 + $0x178] sm:$0xff]  ;;  %v574_v12 = vld [vmem:[#allocation2 + $0x840] sm:$0xff] }
  0x9c   : > { %1085 = vmatpush1.msra.mxu0 %v404_v13  ;;  %1168 = vmatpush1.msra.mxu1 %v664_v14  ;;  %v356_v13 = vld [vmem:[#allocation2 + $0x170] sm:$0xff]  ;;  %v565_v14 = vld [vmem:[#allocation2 + $0x7f8] sm:$0xff] }
  0x9d   : > { %1086 = vmatprep.subr.mxu0 %v395_v15  ;;  %1169 = vmatprep.subr.mxu1 %v655_v16  ;;  %v347_v15 = vld [vmem:[#allocation2 + $0x128] sm:$0xff]  ;;  %v564_v16 = vld [vmem:[#allocation2 + $0x7f0] sm:$0xff] }
  0x9e   : > { %1087 = vmatpush1.msra.mxu0 %v394_v17  ;;  %1170 = vmatpush1.msra.mxu1 %v654_v18  ;;  %v346_v17 = vld [vmem:[#allocation2 + $0x120] sm:$0xff]  ;;  %v555_v18 = vld [vmem:[#allocation2 + $0x7a8] sm:$0xff] }
  0x9f   : > { %1088 = vmatprep.subr.mxu0 %v385_v19  ;;  %1171 = vmatprep.subr.mxu1 %v645_v20  ;;  %v337_v19 = vld [vmem:[#allocation2 + $0xd8] sm:$0xff]  ;;  %v554_v20 = vld [vmem:[#allocation2 + $0x7a0] sm:$0xff] }
  0xa0   : > { %1089 = vmatpush1.msra.mxu0 %v384_v21  ;;  %1172 = vmatpush1.msra.mxu1 %v644_v22  ;;  %v336_v21 = vld [vmem:[#allocation2 + $0xd0] sm:$0xff]  ;;  %v545_v22 = vld [vmem:[#allocation2 + $0x758] sm:$0xff] }
  0xa1   : > { %1090 = vmatprep.subr.mxu0 %v375_v23  ;;  %1173 = vmatprep.subr.mxu1 %v635_v24  ;;  %v327_v23 = vld [vmem:[#allocation2 + $0x88] sm:$0xff]  ;;  %v544_v24 = vld [vmem:[#allocation2 + $0x750] sm:$0xff] }
  0xa2   : > { %1091 = vmatpush1.msra.mxu0 %v374_v25  ;;  %1174 = vmatpush1.msra.mxu1 %v634_v26  ;;  %v326_v25 = vld [vmem:[#allocation2 + $0x80] sm:$0xff]  ;;  %v535_v26 = vld [vmem:[#allocation2 + $0x708] sm:$0xff] }
  0xa3   : > { %1092 = vmatprep.subr.mxu0 %v365_v27  ;;  %1207 = vmatprep.mubr.f32.mxu1 %v4748_v0  ;;  %v317_v27 = vld [vmem:[#allocation2 + $0x38] sm:$0xff] }
  0xa4   : > { %1214 = vmatprep.subr.mxu1 %v467_v28  ;;  %1093 = vmatpush1.msra.mxu0 %v364_v29  ;;  %v534_v28 = vld [vmem:[#allocation2 + $0x700] sm:$0xff]  ;;  %v316_v29 = vld [vmem:[#allocation2 + $0x30] sm:$0xff] }
  0xa5   : > { %4419 = vmatmul.mubr.msk.f32.vlgmr.msra.gmra.mxu1 %vm784_vm0, %v4869_v44  ;;  %1094 = vmatprep.subr.mxu0 %v355_v31  ;;  %v427_v44 = vld [vmem:[#allocation2 + $0x3a8] sm:$0xff] }
  0xa6   : > { %1215 = vmatpush1.msra.mxu1 %v466_v30  ;;  %1095 = vmatpush1.msra.mxu0 %v354_v33  ;;  %v525_v30 = vld [vmem:[#allocation2 + $0x6b8] sm:$0xff]  ;;  %v627_v31 = vld [vmem:[#allocation2 + $0x9e8] sm:$0xff]  ;;  %v626_v33 = vld [vmem:[#allocation2 + $0x9e0] sm:$0xff] }
  0xa7   : > { %1216 = vmatprep.subr.mxu1 %v457_v32  ;;  %1096 = vmatprep.subr.mxu0 %v345_v35  ;;  %v524_v32 = vld [vmem:[#allocation2 + $0x6b0] sm:$0xff]  ;;  %v617_v35 = vld [vmem:[#allocation2 + $0x998] sm:$0xff] }
  0xa8   : > { %1217 = vmatpush1.msra.mxu1 %v456_v34  ;;  %1097 = vmatpush1.msra.mxu0 %v344_v37  ;;  %v515_v34 = vld [vmem:[#allocation2 + $0x668] sm:$0xff]  ;;  %v616_v37 = vld [vmem:[#allocation2 + $0x990] sm:$0xff] }
  0xa9   : > { %1218 = vmatprep.subr.mxu1 %v447_v36  ;;  %1098 = vmatprep.subr.mxu0 %v335_v39  ;;  %v514_v36 = vld [vmem:[#allocation2 + $0x660] sm:$0xff]  ;;  %v607_v39 = vld [vmem:[#allocation2 + $0x948] sm:$0xff] }
  0xaa   : > { %1219 = vmatpush1.msra.mxu1 %v446_v38  ;;  %1099 = vmatpush1.msra.mxu0 %v334_v41  ;;  %v505_v38 = vld [vmem:[#allocation2 + $0x618] sm:$0xff]  ;;  %v606_v41 = vld [vmem:[#allocation2 + $0x940] sm:$0xff] }
  0xab   : > { %1220 = vmatprep.subr.mxu1 %v437_v40  ;;  %1100 = vmatprep.subr.mxu0 %v325_v43  ;;  %v504_v40 = vld [vmem:[#allocation2 + $0x610] sm:$0xff]  ;;  %v597_v43 = vld [vmem:[#allocation2 + $0x8f8] sm:$0xff] }
  0xac   : > { %1221 = vmatpush1.msra.mxu1 %v436_v42  ;;  %1101 = vmatpush1.msra.mxu0 %v324_v45  ;;  %v495_v42 = vld [vmem:[#allocation2 + $0x5c8] sm:$0xff]  ;;  %v596_v45 = vld [vmem:[#allocation2 + $0x8f0] sm:$0xff] }
  0xad   : > { %1222 = vmatprep.subr.mxu1 %v427_v44  ;;  %1102 = vmatprep.subr.mxu0 %v315_v47  ;;  %v494_v44 = vld [vmem:[#allocation2 + $0x5c0] sm:$0xff]  ;;  %v587_v47 = vld [vmem:[#allocation2 + $0x8a8] sm:$0xff] }
  0xae   : > { %1223 = vmatpush1.msra.mxu1 %v426_v46  ;;  %1103 = vmatpush1.msra.mxu0 %v314_v49  ;;  %v485_v46 = vld [vmem:[#allocation2 + $0x578] sm:$0xff]  ;;  %v586_v49 = vld [vmem:[#allocation2 + $0x8a0] sm:$0xff] }
  0xaf   : > { %1224 = vmatprep.subr.mxu1 %v417_v48  ;;  %1104 = vmatprep.subr.mxu0 %v625_v51  ;;  %v484_v48 = vld [vmem:[#allocation2 + $0x570] sm:$0xff]  ;;  %v577_v51 = vld [vmem:[#allocation2 + $0x858] sm:$0xff] }
  0xb0   : > { %1225 = vmatpush1.msra.mxu1 %v416_v50  ;;  %1105 = vmatpush2.msra.mxu0 %v624_v53  ;;  %v475_v50 = vld [vmem:[#allocation2 + $0x528] sm:$0xff]  ;;  %v576_v53 = vld [vmem:[#allocation2 + $0x850] sm:$0xff] }
  0xb1   : > { %1226 = vmatprep.subr.mxu1 %v407_v52  ;;  %1106 = vmatprep.subr.mxu0 %v615_v55  ;;  %v474_v52 = vld [vmem:[#allocation2 + $0x520] sm:$0xff]  ;;  %v727_v55 = vld [vmem:[#allocation2 + $0xd08] sm:$0xff] }
  0xb2   : > { %1227 = vmatpush1.msra.mxu1 %v406_v54  ;;  %1107 = vmatpush2.msra.mxu0 %v614_v57  ;;  %v567_v54 = vld [vmem:[#allocation2 + $0x808] sm:$0xff]  ;;  %v726_v57 = vld [vmem:[#allocation2 + $0xd00] sm:$0xff] }
  0xb3   : > { %1228 = vmatprep.subr.mxu1 %v397_v56  ;;  %1108 = vmatprep.subr.mxu0 %v605_v59  ;;  %v566_v56 = vld [vmem:[#allocation2 + $0x800] sm:$0xff]  ;;  %v717_v59 = vld [vmem:[#allocation2 + $0xcb8] sm:$0xff] }
  0xb4   : > { %1229 = vmatpush1.msra.mxu1 %v396_v58  ;;  %1109 = vmatpush2.msra.mxu0 %v604_v61  ;;  %v557_v58 = vld [vmem:[#allocation2 + $0x7b8] sm:$0xff]  ;;  %v716_v61 = vld [vmem:[#allocation2 + $0xcb0] sm:$0xff] }
  0xb5   : > { %1230 = vmatprep.subr.mxu1 %v387_v60  ;;  %1110 = vmatprep.subr.mxu0 %v595_v63  ;;  %v556_v60 = vld [vmem:[#allocation2 + $0x7b0] sm:$0xff]  ;;  %v707_v63 = vld [vmem:[#allocation2 + $0xc68] sm:$0xff] }
  0xb6   : > { %1231 = vmatpush1.msra.mxu1 %v386_v62  ;;  %1111 = vmatpush2.msra.mxu0 %v594_v2  ;;  %v547_v62 = vld [vmem:[#allocation2 + $0x768] sm:$0xff]  ;;  %v706_v2 = vld [vmem:[#allocation2 + $0xc60] sm:$0xff] }
  0xb7   : > { %1232 = vmatprep.subr.mxu1 %v377_v1  ;;  %1112 = vmatprep.subr.mxu0 %v585_v5  ;;  %v546_v1 = vld [vmem:[#allocation2 + $0x760] sm:$0xff]  ;;  %v697_v5 = vld [vmem:[#allocation2 + $0xc18] sm:$0xff] }
  0xb8   : > { %1233 = vmatpush1.msra.mxu1 %v376_v3  ;;  %1113 = vmatpush2.msra.mxu0 %v584_v8  ;;  %v537_v3 = vld [vmem:[#allocation2 + $0x718] sm:$0xff]  ;;  %v696_v8 = vld [vmem:[#allocation2 + $0xc10] sm:$0xff] }
  0xb9   : > { %1234 = vmatprep.subr.mxu1 %v367_v7  ;;  %1114 = vmatprep.subr.mxu0 %v575_v10  ;;  %v536_v7 = vld [vmem:[#allocation2 + $0x710] sm:$0xff]  ;;  %v687_v10 = vld [vmem:[#allocation2 + $0xbc8] sm:$0xff] }
  0xba   : > { %1235 = vmatpush1.msra.mxu1 %v366_v9  ;;  %1115 = vmatpush2.msra.mxu0 %v574_v12  ;;  %v527_v9 = vld [vmem:[#allocation2 + $0x6c8] sm:$0xff]  ;;  %v686_v12 = vld [vmem:[#allocation2 + $0xbc0] sm:$0xff] }
  0xbb   : > { %1236 = vmatprep.subr.mxu1 %v357_v11  ;;  %1116 = vmatprep.subr.mxu0 %v565_v14  ;;  %v526_v11 = vld [vmem:[#allocation2 + $0x6c0] sm:$0xff]  ;;  %v677_v14 = vld [vmem:[#allocation2 + $0xb78] sm:$0xff] }
  0xbc   : > { %1237 = vmatpush1.msra.mxu1 %v356_v13  ;;  %1117 = vmatpush2.msra.mxu0 %v564_v16  ;;  %v517_v13 = vld [vmem:[#allocation2 + $0x678] sm:$0xff]  ;;  %v676_v16 = vld [vmem:[#allocation2 + $0xb70] sm:$0xff] }
  0xbd   : > { %1238 = vmatprep.subr.mxu1 %v347_v15  ;;  %1118 = vmatprep.subr.mxu0 %v555_v18  ;;  %v516_v15 = vld [vmem:[#allocation2 + $0x670] sm:$0xff]  ;;  %v667_v18 = vld [vmem:[#allocation2 + $0xb28] sm:$0xff] }
  0xbe   : > { %1239 = vmatpush1.msra.mxu1 %v346_v17  ;;  %1119 = vmatpush2.msra.mxu0 %v554_v20  ;;  %v507_v17 = vld [vmem:[#allocation2 + $0x628] sm:$0xff]  ;;  %v666_v20 = vld [vmem:[#allocation2 + $0xb20] sm:$0xff] }
  0xbf   : > { %1240 = vmatprep.subr.mxu1 %v337_v19  ;;  %1120 = vmatprep.subr.mxu0 %v545_v22  ;;  %v506_v19 = vld [vmem:[#allocation2 + $0x620] sm:$0xff]  ;;  %v657_v22 = vld [vmem:[#allocation2 + $0xad8] sm:$0xff] }
  0xc0   : > { %1241 = vmatpush1.msra.mxu1 %v336_v21  ;;  %1121 = vmatpush2.msra.mxu0 %v544_v24  ;;  %v497_v21 = vld [vmem:[#allocation2 + $0x5d8] sm:$0xff]  ;;  %v656_v24 = vld [vmem:[#allocation2 + $0xad0] sm:$0xff] }
  0xc1   : > { %1242 = vmatprep.subr.mxu1 %v327_v23  ;;  %1122 = vmatprep.subr.mxu0 %v535_v26  ;;  %v496_v23 = vld [vmem:[#allocation2 + $0x5d0] sm:$0xff]  ;;  %v647_v26 = vld [vmem:[#allocation2 + $0xa88] sm:$0xff] }
  0xc2   : > { %1243 = vmatpush1.msra.mxu1 %v326_v25  ;;  %1123 = vmatpush2.msra.mxu0 %v534_v28  ;;  %v487_v25 = vld [vmem:[#allocation2 + $0x588] sm:$0xff]  ;;  %v646_v28 = vld [vmem:[#allocation2 + $0xa80] sm:$0xff] }
  0xc3   : > { %1244 = vmatprep.subr.mxu1 %v317_v27  ;;  %1124 = vmatprep.subr.mxu0 %v525_v30  ;;  %v486_v27 = vld [vmem:[#allocation2 + $0x580] sm:$0xff]  ;;  %v637_v30 = vld [vmem:[#allocation2 + $0xa38] sm:$0xff] }
  0xc4   : > { %1245 = vmatpush1.msra.mxu1 %v316_v29  ;;  %1125 = vmatpush2.msra.mxu0 %v524_v32  ;;  %v477_v29 = vld [vmem:[#allocation2 + $0x538] sm:$0xff]  ;;  %v636_v32 = vld [vmem:[#allocation2 + $0xa30] sm:$0xff] }
  0xc5   : > { %1246 = vmatprep.subr.mxu1 %v627_v31  ;;  %1126 = vmatprep.subr.mxu0 %v515_v34  ;;  %v476_v31 = vld [vmem:[#allocation2 + $0x530] sm:$0xff] }
  0xc6   : > { %1247 = vmatpush2.msra.mxu1 %v626_v33  ;;  %1127 = vmatpush2.msra.mxu0 %v514_v36  ;;  %v469_v33 = vld [vmem:[#allocation2 + $0x4f8] sm:$0xff]  ;;  %v468_v34 = vld [vmem:[#allocation2 + $0x4f0] sm:$0xff]  ;;  %v459_v36 = vld [vmem:[#allocation2 + $0x4a8] sm:$0xff] }
  0xc7   : > { %1248 = vmatprep.subr.mxu1 %v617_v35  ;;  %1128 = vmatprep.subr.mxu0 %v505_v38  ;;  %v729_v35 = vld [vmem:[#allocation2 + $0xd18] sm:$0xff]  ;;  %v4895_v38 = vld [vmem:[%s4866_s26 + $0x10] sm:$0xff] }
  0xc8   : > { %1249 = vmatpush2.msra.mxu1 %v616_v37  ;;  %1129 = vmatpush2.msra.mxu0 %v504_v40  ;;  %v728_v37 = vld [vmem:[#allocation2 + $0xd10] sm:$0xff]  ;;  %v719_v40 = vld [vmem:[#allocation2 + $0xcc8] sm:$0xff] }
  0xc9   : > { %1250 = vmatprep.subr.mxu1 %v607_v39  ;;  %1130 = vmatprep.subr.mxu0 %v495_v42  ;;  %v458_v39 = vld [vmem:[#allocation2 + $0x4a0] sm:$0xff]  ;;  %v448_v42 = vld [vmem:[#allocation2 + $0x450] sm:$0xff] }
  0xca   : > { %1251 = vmatpush2.msra.mxu1 %v606_v41  ;;  %1131 = vmatpush2.msra.mxu0 %v494_v44  ;;  %v449_v41 = vld [vmem:[#allocation2 + $0x458] sm:$0xff]  ;;  %v708_v44 = vld [vmem:[#allocation2 + $0xc70] sm:$0xff] }
  0xcb   : > { %1252 = vmatprep.subr.mxu1 %v597_v43  ;;  %1132 = vmatprep.subr.mxu0 %v485_v46  ;;  %v709_v43 = vld [vmem:[#allocation2 + $0xc78] sm:$0xff]  ;;  %v699_v46 = vld [vmem:[#allocation2 + $0xc28] sm:$0xff] }
  0xcc   : > { %1253 = vmatpush2.msra.mxu1 %v596_v45  ;;  %1133 = vmatpush2.msra.mxu0 %v484_v48  ;;  %v438_v45 = vld [vmem:[#allocation2 + $0x400] sm:$0xff] }
  0xcd   : > { %1254 = vmatprep.subr.mxu1 %v587_v47  ;;  %1134 = vmatprep.subr.mxu0 %v475_v50  ;;  %v429_v47 = vld [vmem:[#allocation2 + $0x3b8] sm:$0xff]  ;;  %v698_v48 = vld [vmem:[#allocation2 + $0xc20] sm:$0xff] }
  0xce   : > { %1255 = vmatpush2.msra.mxu1 %v586_v49  ;;  %1135 = vmatpush2.msra.mxu0 %v474_v52  ;;  %v428_v49 = vld [vmem:[#allocation2 + $0x3b0] sm:$0xff]  ;;  %v689_v50 = vld [vmem:[#allocation2 + $0xbd8] sm:$0xff] }
  0xcf   : > { %1256 = vmatprep.subr.mxu1 %v577_v51  ;;  %1136 = vmatprep.mubr.f32.mxu0 %v4874_v4  ;;  %v419_v51 = vld [vmem:[#allocation2 + $0x368] sm:$0xff]  ;;  %v688_v52 = vld [vmem:[#allocation2 + $0xbd0] sm:$0xff] }
  0xd0   : > { %1257 = vmatpush2.msra.mxu1 %v576_v53  ;;  %1137 = vmatmul.mubr.f32.vlgmr.msra.gmra.mxu0 %v4877_v6  ;;  %v418_v53 = vld [vmem:[#allocation2 + $0x360] sm:$0xff] }
  0xd1   : > { %1258 = vmatprep.subr.mxu1 %v567_v54  ;;  %1297 = vmatprep.subr.mxu0 %v727_v55  ;;  %v679_v54 = vld [vmem:[#allocation2 + $0xb88] sm:$0xff]  ;;  %v409_v55 = vld [vmem:[#allocation2 + $0x318] sm:$0xff] }
  0xd2   : > { %1259 = vmatpush2.msra.mxu1 %v566_v56  ;;  %1298 = vmatpush1.msra.mxu0 %v726_v57  ;;  %v678_v56 = vld [vmem:[#allocation2 + $0xb80] sm:$0xff]  ;;  %v408_v57 = vld [vmem:[#allocation2 + $0x310] sm:$0xff] }
  0xd3   : > { %1260 = vmatprep.subr.mxu1 %v557_v58  ;;  %1299 = vmatprep.subr.mxu0 %v717_v59  ;;  %v669_v58 = vld [vmem:[#allocation2 + $0xb38] sm:$0xff]  ;;  %v399_v59 = vld [vmem:[#allocation2 + $0x2c8] sm:$0xff] }
  0xd4   : > { %1261 = vmatpush2.msra.mxu1 %v556_v60  ;;  %1300 = vmatpush1.msra.mxu0 %v716_v61  ;;  %v668_v60 = vld [vmem:[#allocation2 + $0xb30] sm:$0xff]  ;;  %v398_v61 = vld [vmem:[#allocation2 + $0x2c0] sm:$0xff] }
  0xd5   : > { %1262 = vmatprep.subr.mxu1 %v547_v62  ;;  %1301 = vmatprep.subr.mxu0 %v707_v63  ;;  %v659_v62 = vld [vmem:[#allocation2 + $0xae8] sm:$0xff]  ;;  %v389_v63 = vld [vmem:[#allocation2 + $0x278] sm:$0xff] }
  0xd6   : > { %1263 = vmatpush2.msra.mxu1 %v546_v1  ;;  %1302 = vmatpush1.msra.mxu0 %v706_v2  ;;  %v658_v1 = vld [vmem:[#allocation2 + $0xae0] sm:$0xff]  ;;  %v388_v2 = vld [vmem:[#allocation2 + $0x270] sm:$0xff] }
  0xd7   : > { %1264 = vmatprep.subr.mxu1 %v537_v3  ;;  %1303 = vmatprep.subr.mxu0 %v697_v5  ;;  %v649_v3 = vld [vmem:[#allocation2 + $0xa98] sm:$0xff]  ;;  %v379_v5 = vld [vmem:[#allocation2 + $0x228] sm:$0xff] }
  0xd8   : > { %1265 = vmatpush2.msra.mxu1 %v536_v7  ;;  %1304 = vmatpush1.msra.mxu0 %v696_v8  ;;  %v648_v7 = vld [vmem:[#allocation2 + $0xa90] sm:$0xff]  ;;  %v378_v8 = vld [vmem:[#allocation2 + $0x220] sm:$0xff] }
  0xd9   : > { %1266 = vmatprep.subr.mxu1 %v527_v9  ;;  %1305 = vmatprep.subr.mxu0 %v687_v10  ;;  %v639_v9 = vld [vmem:[#allocation2 + $0xa48] sm:$0xff]  ;;  %v369_v10 = vld [vmem:[#allocation2 + $0x1d8] sm:$0xff] }
  0xda   : > { %1267 = vmatpush2.msra.mxu1 %v526_v11  ;;  %1306 = vmatpush1.msra.mxu0 %v686_v12  ;;  %v638_v11 = vld [vmem:[#allocation2 + $0xa40] sm:$0xff]  ;;  %v368_v12 = vld [vmem:[#allocation2 + $0x1d0] sm:$0xff] }
  0xdb   : > { %1268 = vmatprep.subr.mxu1 %v517_v13  ;;  %1307 = vmatprep.subr.mxu0 %v677_v14  ;;  %v359_v13 = vld [vmem:[#allocation2 + $0x188] sm:$0xff]  ;;  %v1599_v14 = vld [vmem:[#allocation4 + $0x2d8] sm:$0xff] }
  0xdc   : > { %1269 = vmatpush2.msra.mxu1 %v516_v15  ;;  %1308 = vmatpush1.msra.mxu0 %v676_v16  ;;  %v358_v15 = vld [vmem:[#allocation2 + $0x180] sm:$0xff]  ;;  %v349_v16 = vld [vmem:[#allocation2 + $0x138] sm:$0xff] }
  0xdd   : > { %1270 = vmatprep.subr.mxu1 %v507_v17  ;;  %1309 = vmatprep.subr.mxu0 %v667_v18  ;;  %v1598_v17 = vld [vmem:[#allocation4 + $0x2d0] sm:$0xff] }
  0xde   : > { %1271 = vmatpush2.msra.mxu1 %v506_v19  ;;  %1310 = vmatpush1.msra.mxu0 %v666_v20  ;;  %v348_v18 = vld [vmem:[#allocation2 + $0x130] sm:$0xff]  ;;  %v1593_v19 = vld [vmem:[#allocation4 + $0x2a8] sm:$0xff] }
  0xdf   : > { %1272 = vmatprep.subr.mxu1 %v497_v21  ;;  %1311 = vmatprep.subr.mxu0 %v657_v22  ;;  %v339_v20 = vld [vmem:[#allocation2 + $0xe8] sm:$0xff]  ;;  %v1592_v21 = vld [vmem:[#allocation4 + $0x2a0] sm:$0xff] }
  0xe0   : > { %1273 = vmatpush2.msra.mxu1 %v496_v23  ;;  %1312 = vmatpush1.msra.mxu0 %v656_v24  ;;  %v338_v22 = vld [vmem:[#allocation2 + $0xe0] sm:$0xff]  ;;  %v1587_v23 = vld [vmem:[#allocation4 + $0x278] sm:$0xff] }
  0xe1   : > { %1274 = vmatprep.subr.mxu1 %v487_v25  ;;  %1313 = vmatprep.subr.mxu0 %v647_v26  ;;  %v329_v24 = vld [vmem:[#allocation2 + $0x98] sm:$0xff]  ;;  %v1586_v25 = vld [vmem:[#allocation4 + $0x270] sm:$0xff] }
  0xe2   : > { %1275 = vmatpush2.msra.mxu1 %v486_v27  ;;  %1314 = vmatpush1.msra.mxu0 %v646_v28  ;;  %v328_v26 = vld [vmem:[#allocation2 + $0x90] sm:$0xff]  ;;  %v1581_v27 = vld [vmem:[#allocation4 + $0x248] sm:$0xff] }
  0xe3   : > { %1276 = vmatprep.subr.mxu1 %v477_v29  ;;  %1315 = vmatprep.subr.mxu0 %v637_v30  ;;  %v319_v28 = vld [vmem:[#allocation2 + $0x48] sm:$0xff]  ;;  %v1580_v29 = vld [vmem:[#allocation4 + $0x240] sm:$0xff] }
  0xe4   : > { %1277 = vmatpush2.msra.mxu1 %v476_v31  ;;  %1278 = vmatprep.mubr.f32.mxu1 %v4874_v4  ;;  %v718_v4 = vld [vmem:[#allocation2 + $0xcc0] sm:$0xff]  ;;  %v1575_v31 = vld [vmem:[#allocation4 + $0x218] sm:$0xff] }
  0xe5   : > { %1316 = vmatpush1.msra.mxu0 %v636_v32  ;;  %1349 = vmatprep.mubr.f32.mxu0 %v4748_v0  ;;  %v318_v30 = vld [vmem:[#allocation2 + $0x40] sm:$0xff]  ;;  %v629_v32 = vld [vmem:[#allocation2 + $0x9f8] sm:$0xff] }
  0xe6   : > { %1279 = vmatmul.mubr.f32.vlgmr.msra.gmra.mxu1 %v4877_v6  ;;  %4420 = vmatmul.mubr.msk.f32.vlgmr.msra.gmra.mxu0 %vm784_vm0, %v4895_v38  ;;  %v439_v6 = vld [vmem:[#allocation2 + $0x408] sm:$0xff] }
  0xe7   : > { %1356 = vmatprep.subr.mxu0 %v469_v33  ;;  %1439 = vmatprep.subr.mxu1 %v729_v35  ;;  %v1574_v33 = vld [vmem:[#allocation4 + $0x210] sm:$0xff]  ;;  %v1569_v35 = vld [vmem:[#allocation4 + $0x1e8] sm:$0xff] }
  0xe8   : > { %1357 = vmatpush1.msra.mxu0 %v468_v34  ;;  %1440 = vmatpush1.msra.mxu1 %v728_v37  ;;  %v628_v34 = vld [vmem:[#allocation2 + $0x9f0] sm:$0xff]  ;;  %v1568_v37 = vld [vmem:[#allocation4 + $0x1e0] sm:$0xff] }
  0xe9   : > { %1358 = vmatprep.subr.mxu0 %v459_v36  ;;  %1441 = vmatprep.subr.mxu1 %v719_v40  ;;  %v619_v36 = vld [vmem:[#allocation2 + $0x9a8] sm:$0xff]  ;;  %v609_v40 = vld [vmem:[#allocation2 + $0x958] sm:$0xff] }
  0xea   : > { %1359 = vmatpush1.msra.mxu0 %v458_v39  ;;  %1442 = vmatpush1.msra.mxu1 %v718_v4  ;;  %v1563_v39 = vld [vmem:[#allocation4 + $0x1b8] sm:$0xff]  ;;  %v608_v4 = vld [vmem:[#allocation2 + $0x950] sm:$0xff] }
  0xeb   : > { %1360 = vmatprep.subr.mxu0 %v449_v41  ;;  %1443 = vmatprep.subr.mxu1 %v709_v43  ;;  %v1562_v41 = vld [vmem:[#allocation4 + $0x1b0] sm:$0xff]  ;;  %v599_v43 = vld [vmem:[#allocation2 + $0x908] sm:$0xff] }
  0xec   : > { %1361 = vmatpush1.msra.mxu0 %v448_v42  ;;  %1444 = vmatpush1.msra.mxu1 %v708_v44  ;;  %v1557_v42 = vld [vmem:[#allocation4 + $0x188] sm:$0xff]  ;;  %v598_v44 = vld [vmem:[#allocation2 + $0x900] sm:$0xff] }
  0xed   : > { %1362 = vmatprep.subr.mxu0 %v439_v6  ;;  %1445 = vmatprep.subr.mxu1 %v699_v46  ;;  %v1556_v6 = vld [vmem:[#allocation4 + $0x180] sm:$0xff]  ;;  %v589_v46 = vld [vmem:[#allocation2 + $0x8b8] sm:$0xff] }
  0xee   : > { %1363 = vmatpush1.msra.mxu0 %v438_v45  ;;  %1446 = vmatpush1.msra.mxu1 %v698_v48  ;;  %v1551_v45 = vld [vmem:[#allocation4 + $0x158] sm:$0xff]  ;;  %v588_v48 = vld [vmem:[#allocation2 + $0x8b0] sm:$0xff] }
  0xef   : > { %1364 = vmatprep.subr.mxu0 %v429_v47  ;;  %1447 = vmatprep.subr.mxu1 %v689_v50  ;;  %v1550_v47 = vld [vmem:[#allocation4 + $0x150] sm:$0xff]  ;;  %v579_v50 = vld [vmem:[#allocation2 + $0x868] sm:$0xff] }
  0xf0   : > { %1365 = vmatpush1.msra.mxu0 %v428_v49  ;;  %1448 = vmatpush1.msra.mxu1 %v688_v52  ;;  %v1545_v49 = vld [vmem:[#allocation4 + $0x128] sm:$0xff]  ;;  %v578_v52 = vld [vmem:[#allocation2 + $0x860] sm:$0xff] }
  0xf1   : > { %1366 = vmatprep.subr.mxu0 %v419_v51  ;;  %1449 = vmatprep.subr.mxu1 %v679_v54  ;;  %v1544_v51 = vld [vmem:[#allocation4 + $0x120] sm:$0xff]  ;;  %v569_v54 = vld [vmem:[#allocation2 + $0x818] sm:$0xff] }
  0xf2   : > { %1367 = vmatpush1.msra.mxu0 %v418_v53  ;;  %1450 = vmatpush1.msra.mxu1 %v678_v56  ;;  %v1539_v53 = vld [vmem:[#allocation4 + $0xf8] sm:$0xff]  ;;  %v568_v56 = vld [vmem:[#allocation2 + $0x810] sm:$0xff] }
  0xf3   : > { %1368 = vmatprep.subr.mxu0 %v409_v55  ;;  %1451 = vmatprep.subr.mxu1 %v669_v58  ;;  %v1538_v55 = vld [vmem:[#allocation4 + $0xf0] sm:$0xff]  ;;  %v559_v58 = vld [vmem:[#allocation2 + $0x7c8] sm:$0xff] }
  0xf4   : > { %1369 = vmatpush1.msra.mxu0 %v408_v57  ;;  %1452 = vmatpush1.msra.mxu1 %v668_v60  ;;  %v1533_v57 = vld [vmem:[#allocation4 + $0xc8] sm:$0xff]  ;;  %v558_v60 = vld [vmem:[#allocation2 + $0x7c0] sm:$0xff] }
  0xf5   : > { %1370 = vmatprep.subr.mxu0 %v399_v59  ;;  %1453 = vmatprep.subr.mxu1 %v659_v62  ;;  %v1532_v59 = vld [vmem:[#allocation4 + $0xc0] sm:$0xff]  ;;  %v549_v62 = vld [vmem:[#allocation2 + $0x778] sm:$0xff] }
  0xf6   : > { %1371 = vmatpush1.msra.mxu0 %v398_v61  ;;  %1454 = vmatpush1.msra.mxu1 %v658_v1  ;;  %v1527_v61 = vld [vmem:[#allocation4 + $0x98] sm:$0xff]  ;;  %v548_v1 = vld [vmem:[#allocation2 + $0x770] sm:$0xff] }
  0xf7   : > { %1372 = vmatprep.subr.mxu0 %v389_v63  ;;  %1455 = vmatprep.subr.mxu1 %v649_v3  ;;  %v1526_v63 = vld [vmem:[#allocation4 + $0x90] sm:$0xff]  ;;  %v539_v3 = vld [vmem:[#allocation2 + $0x728] sm:$0xff] }
  0xf8   : > { %1373 = vmatpush1.msra.mxu0 %v388_v2  ;;  %1456 = vmatpush1.msra.mxu1 %v648_v7  ;;  %v1521_v2 = vld [vmem:[#allocation4 + $0x68] sm:$0xff]  ;;  %v538_v7 = vld [vmem:[#allocation2 + $0x720] sm:$0xff] }
  0xf9   : > { %1374 = vmatprep.subr.mxu0 %v379_v5  ;;  %1457 = vmatprep.subr.mxu1 %v639_v9  ;;  %v1520_v5 = vld [vmem:[#allocation4 + $0x60] sm:$0xff]  ;;  %v529_v9 = vld [vmem:[#allocation2 + $0x6d8] sm:$0xff] }
  0xfa   : > { %1375 = vmatpush1.msra.mxu0 %v378_v8  ;;  %1458 = vmatpush1.msra.mxu1 %v638_v11  ;;  %v1515_v8 = vld [vmem:[#allocation4 + $0x38] sm:$0xff]  ;;  %v1514_v11 = vld [vmem:[#allocation4 + $0x30] sm:$0xff] }
  0xfb   : > { %1376 = vmatprep.subr.mxu0 %v369_v10  ;;  %1491 = vmatprep.mubr.f32.mxu1 %v4748_v0  ;;  %v528_v10 = vld [vmem:[#allocation2 + $0x6d0] sm:$0xff] }
  0xfc   : > { %1377 = vmatpush1.msra.mxu0 %v368_v12  ;;  %2500 = vmatprep.subr.mxu1 %v1599_v14  ;;  %v519_v12 = vld [vmem:[#allocation2 + $0x688] sm:$0xff]  ;;  %v518_v14 = vld [vmem:[#allocation2 + $0x680] sm:$0xff] }
  0xfd   : > { %1378 = vmatprep.subr.mxu0 %v359_v13  ;;  %4421 = vmatmul.mubr.msk.f32.vlgmr.msra.gmra.mxu1 %vm784_vm0, %v4895_v38  ;;  %v618_v38 = vld [vmem:[#allocation2 + $0x9a0] sm:$0xff]  ;;  %v1509_v13 = vld [vmem:[#allocation4 + $0x8] sm:$0xff] }
  0xfe   : > { %1379 = vmatpush1.msra.mxu0 %v358_v15  ;;  %2501 = vmatpush1.msra.mxu1 %v1598_v17  ;;  %v4645_v15 = vld [vmem:[%s4866_s26 + $0x8] sm:$0xff]  ;;  %v509_v17 = vld [vmem:[#allocation2 + $0x638] sm:$0xff] }
  0xff   : > { %1380 = vmatprep.subr.mxu0 %v349_v16  ;;  %2502 = vmatprep.subr.mxu1 %v1593_v19  ;;  %v1508_v16 = vld [vmem:[#allocation4] sm:$0xff]  ;;  %v508_v19 = vld [vmem:[#allocation2 + $0x630] sm:$0xff] }
 0x100   : > { %1381 = vmatpush1.msra.mxu0 %v348_v18  ;;  %2503 = vmatpush1.msra.mxu1 %v1592_v21  ;;  %v1695_v18 = vld [vmem:[#allocation4 + $0x5d8] sm:$0xff]  ;;  %v499_v21 = vld [vmem:[#allocation2 + $0x5e8] sm:$0xff] }
 0x101   : > { %1382 = vmatprep.subr.mxu0 %v339_v20  ;;  %2504 = vmatprep.subr.mxu1 %v1587_v23  ;;  %v1694_v20 = vld [vmem:[#allocation4 + $0x5d0] sm:$0xff]  ;;  %v498_v23 = vld [vmem:[#allocation2 + $0x5e0] sm:$0xff] }
 0x102   : > { %1383 = vmatpush1.msra.mxu0 %v338_v22  ;;  %2505 = vmatpush1.msra.mxu1 %v1586_v25  ;;  %v1689_v22 = vld [vmem:[#allocation4 + $0x5a8] sm:$0xff]  ;;  %v489_v25 = vld [vmem:[#allocation2 + $0x598] sm:$0xff] }
 0x103   : > { %1384 = vmatprep.subr.mxu0 %v329_v24  ;;  %2506 = vmatprep.subr.mxu1 %v1581_v27  ;;  %v1688_v24 = vld [vmem:[#allocation4 + $0x5a0] sm:$0xff]  ;;  %v488_v27 = vld [vmem:[#allocation2 + $0x590] sm:$0xff] }
 0x104   : > { %1385 = vmatpush1.msra.mxu0 %v328_v26  ;;  %2507 = vmatpush1.msra.mxu1 %v1580_v29  ;;  %v1683_v26 = vld [vmem:[#allocation4 + $0x578] sm:$0xff]  ;;  %v479_v29 = vld [vmem:[#allocation2 + $0x548] sm:$0xff] }
 0x105   : > { %1386 = vmatprep.subr.mxu0 %v319_v28  ;;  %2508 = vmatprep.subr.mxu1 %v1575_v31  ;;  %v1682_v28 = vld [vmem:[#allocation4 + $0x570] sm:$0xff]  ;;  %v478_v31 = vld [vmem:[#allocation2 + $0x540] sm:$0xff] }
 0x106   : > { %1387 = vmatpush1.msra.mxu0 %v318_v30  ;;  %2509 = vmatpush1.msra.mxu1 %v1574_v33  ;;  %v1677_v30 = vld [vmem:[#allocation4 + $0x548] sm:$0xff]  ;;  %v1791_v33 = vld [vmem:[#allocation4 + $0x8d8] sm:$0xff] }
 0x107   : > { %1388 = vmatprep.subr.mxu0 %v629_v32  ;;  %2510 = vmatprep.subr.mxu1 %v1569_v35  ;;  %v1676_v32 = vld [vmem:[#allocation4 + $0x540] sm:$0xff]  ;;  %v1671_v35 = vld [vmem:[#allocation4 + $0x518] sm:$0xff] }
 0x108   : > { %1389 = vmatpush2.msra.mxu0 %v628_v34  ;;  %2511 = vmatpush1.msra.mxu1 %v1568_v37  ;;  %v1790_v34 = vld [vmem:[#allocation4 + $0x8d0] sm:$0xff] }
 0x109   : > { %1390 = vmatprep.subr.mxu0 %v619_v36  ;;  %2512 = vmatprep.subr.mxu1 %v1563_v39  ;;  %v1785_v36 = vld [vmem:[#allocation4 + $0x8a8] sm:$0xff]  ;;  %v1670_v37 = vld [vmem:[#allocation4 + $0x510] sm:$0xff]  ;;  %v1784_v39 = vld [vmem:[#allocation4 + $0x8a0] sm:$0xff] }
 0x10a   : > { %1391 = vmatpush2.msra.mxu0 %v618_v38  ;;  %2513 = vmatpush1.msra.mxu1 %v1562_v41  ;;  %v4646_v38 = vld [vmem:[%s4866_s26] sm:$0xff]  ;;  %v1779_v41 = vld [vmem:[#allocation4 + $0x878] sm:$0xff]  ;;  %s303_s26 = scalar_lea.vmem %s5407_s1, %s4416_s19 }
 0x10b   : > { %1392 = vmatprep.subr.mxu0 %v609_v40  ;;  %2514 = vmatprep.subr.mxu1 %v1557_v42  ;;  %v1665_v40 = vld [vmem:[#allocation4 + $0x4e8] sm:$0xff]  ;;  %v1778_v42 = vld [vmem:[#allocation4 + $0x870] sm:$0xff] }
 0x10c   : > { %1393 = vmatpush2.msra.mxu0 %v608_v4  ;;  %2515 = vmatpush1.msra.mxu1 %v1556_v6  ;;  %v1664_v4 = vld [vmem:[#allocation4 + $0x4e0] sm:$0xff]  ;;  %v1773_v6 = vld [vmem:[#allocation4 + $0x848] sm:$0xff] }
 0x10d   : > { %1394 = vmatprep.subr.mxu0 %v599_v43  ;;  %2516 = vmatprep.subr.mxu1 %v1551_v45  ;;  %v1659_v43 = vld [vmem:[#allocation4 + $0x4b8] sm:$0xff]  ;;  %v734_v45 = vlaneseq }
 0x10e   : > { %1395 = vmatpush2.msra.mxu0 %v598_v44  ;;  %2517 = vmatpush1.msra.mxu1 %v1550_v47  ;;  %v1658_v44 = vld [vmem:[#allocation4 + $0x4b0] sm:$0xff]  ;;  %v1653_v47 = vld [vmem:[#allocation4 + $0x488] sm:$0xff] }
 0x10f   : > { %1396 = vmatprep.subr.mxu0 %v589_v46  ;;  %2518 = vmatprep.subr.mxu1 %v1545_v49  ;;  %v1772_v46 = vld [vmem:[#allocation4 + $0x840] sm:$0xff] }
 0x110   : > { %1397 = vmatpush2.msra.mxu0 %v588_v48  ;;  %2519 = vmatpush1.msra.mxu1 %v1544_v51  ;;  %v1767_v48 = vld [vmem:[#allocation4 + $0x818] sm:$0xff]  ;;  %v1652_v49 = vld [vmem:[#allocation4 + $0x480] sm:$0xff] }
 0x111   : > { %1398 = vmatprep.subr.mxu0 %v579_v50  ;;  %2520 = vmatprep.subr.mxu1 %v1539_v53  ;;  %v1766_v50 = vld [vmem:[#allocation4 + $0x810] sm:$0xff]  ;;  %v1647_v51 = vld [vmem:[#allocation4 + $0x458] sm:$0xff] }
 0x112   : > { %1399 = vmatpush2.msra.mxu0 %v578_v52  ;;  %2521 = vmatpush1.msra.mxu1 %v1538_v55  ;;  %v1761_v52 = vld [vmem:[#allocation4 + $0x7e8] sm:$0xff]  ;;  %v1646_v53 = vld [vmem:[#allocation4 + $0x450] sm:$0xff]  ;;  %v1760_v55 = vld [vmem:[#allocation4 + $0x7e0] sm:$0xff] }
 0x113   : > { %1400 = vmatprep.subr.mxu0 %v569_v54  ;;  %2522 = vmatprep.subr.mxu1 %v1533_v57  ;;  %v4904_v54 = vshrl.u32 %v734_v45, 7  ;;  %v1755_v57 = vld [vmem:[#allocation4 + $0x7b8] sm:$0xff]  ;;  %v1976_v45 = vld [vmem:[#allocation4 + $0xea0] sm:$0xff] }
 0x114   : > { %1401 = vmatpush2.msra.mxu0 %v568_v56  ;;  %2523 = vmatpush1.msra.mxu1 %v1532_v59  ;;  %v1641_v56 = vld [vmem:[#allocation4 + $0x428] sm:$0xff]  ;;  %v1754_v59 = vld [vmem:[#allocation4 + $0x7b0] sm:$0xff] }
 0x115   : > { %1402 = vmatprep.subr.mxu0 %v559_v58  ;;  %2524 = vmatprep.subr.mxu1 %v1527_v61  ;;  %v1640_v58 = vld [vmem:[#allocation4 + $0x420] sm:$0xff]  ;;  %v1749_v61 = vld [vmem:[#allocation4 + $0x788] sm:$0xff] }
 0x116   : > { %1403 = vmatpush2.msra.mxu0 %v558_v60  ;;  %2525 = vmatpush1.msra.mxu1 %v1526_v63  ;;  %v1635_v60 = vld [vmem:[#allocation4 + $0x3f8] sm:$0xff]  ;;  %v4907_v63 = vsub.s32 0, %v4904_v54 }
 0x117   : > { %1404 = vmatprep.subr.mxu0 %v549_v62  ;;  %2526 = vmatprep.subr.mxu1 %v1521_v2  ;;  %v1634_v62 = vld [vmem:[#allocation4 + $0x3f0] sm:$0xff]  ;;  %v4909_v2 = vld [vmem:[#allocation6] sm:$0xff] }
 0x118   : > { %1405 = vmatpush2.msra.mxu0 %v548_v1  ;;  %2527 = vmatpush1.msra.mxu1 %v1520_v5  ;;  %v1748_v1 = vld [vmem:[#allocation4 + $0x780] sm:$0xff]  ;;  %v1743_v5 = vld [vmem:[#allocation4 + $0x758] sm:$0xff] }
 0x119   : > { %1406 = vmatprep.subr.mxu0 %v539_v3  ;;  %2528 = vmatprep.subr.mxu1 %v1515_v8  ;;  %v1629_v3 = vld [vmem:[#allocation4 + $0x3c8] sm:$0xff]  ;;  %v4912_v8 = vsub.s32 1, %v4904_v54 }
 0x11a   : > { %1407 = vmatpush2.msra.mxu0 %v538_v7  ;;  %1420 = vmatprep.mubr.f32.mxu0 %v4645_v15  ;;  %v1628_v7 = vld [vmem:[#allocation4 + $0x3c0] sm:$0xff]  ;;  %v925_v15 = vpop.f32.mrf.mxu1 }
 0x11b   : > { %1408 = vmatprep.subr.mxu0 %v529_v9  ;;  %2529 = vmatpush1.msra.mxu1 %v1514_v11  ;;  %v1742_v9 = vld [vmem:[#allocation4 + $0x750] sm:$0xff]  ;;  %v1737_v11 = vld [vmem:[#allocation4 + $0x728] sm:$0xff] }
 0x11c   : > { %1409 = vmatpush2.msra.mxu0 %v528_v10  ;;  %2530 = vmatprep.subr.mxu1 %v1509_v13  ;;  %v1623_v10 = vld [vmem:[#allocation4 + $0x398] sm:$0xff]  ;;  %v1622_v13 = vld [vmem:[#allocation4 + $0x390] sm:$0xff] }
 0x11d   : > { %1410 = vmatprep.subr.mxu0 %v519_v12  ;;  %2531 = vmatpush1.msra.mxu1 %v1508_v16  ;;  %v737_v12 = vrot.slane %v4909_v2, %v4907_v63  ;;  %v1617_v16 = vld [vmem:[#allocation4 + $0x368] sm:$0xff] }
 0x11e   : > { %1411 = vmatpush2.msra.mxu0 %v518_v14  ;;  %2532 = vmatprep.subr.mxu1 %v1695_v18  ;;  %v1736_v14 = vld [vmem:[#allocation4 + $0x720] sm:$0xff]  ;;  %v741_v18 = vrot.slane %v4909_v2, %v4912_v8 }
 0x11f   : > { %1412 = vmatprep.subr.mxu0 %v509_v17  ;;  %2533 = vmatpush2.msra.mxu1 %v1694_v20  ;;  %v1731_v17 = vld [vmem:[#allocation4 + $0x6f8] sm:$0xff]  ;;  %v1730_v20 = vld [vmem:[#allocation4 + $0x6f0] sm:$0xff] }
 0x120   : > { %1413 = vmatpush2.msra.mxu0 %v508_v19  ;;  %2534 = vmatprep.subr.mxu1 %v1689_v22  ;;  %v1616_v19 = vld [vmem:[#allocation4 + $0x360] sm:$0xff]  ;;  %v1611_v22 = vld [vmem:[#allocation4 + $0x338] sm:$0xff] }
 0x121   : > { %1414 = vmatprep.subr.mxu0 %v499_v21  ;;  %2535 = vmatpush2.msra.mxu1 %v1688_v24 }
 0x122   : > { %1415 = vmatpush2.msra.mxu0 %v498_v23  ;;  %2536 = vmatprep.subr.mxu1 %v1683_v26  ;;  %v1725_v23 = vld [vmem:[#allocation4 + $0x6c8] sm:$0xff]  ;;  %v1724_v26 = vld [vmem:[#allocation4 + $0x6c0] sm:$0xff] }
 0x123   : > { %1416 = vmatprep.subr.mxu0 %v489_v25  ;;  %2537 = vmatpush2.msra.mxu1 %v1682_v28  ;;  %v1610_v25 = vld [vmem:[#allocation4 + $0x330] sm:$0xff]  ;;  %v927_v28 = vpop.f32.mrf.mxu1 }
 0x124   : > { %1417 = vmatpush2.msra.mxu0 %v488_v27  ;;  %2538 = vmatprep.subr.mxu1 %v1677_v30  ;;  %v1719_v30 = vld [vmem:[#allocation4 + $0x698] sm:$0xff] }
 0x125   : > { %1418 = vmatprep.subr.mxu0 %v479_v29  ;;  %2539 = vmatpush2.msra.mxu1 %v1676_v32  ;;  %v1605_v29 = vld [vmem:[#allocation4 + $0x308] sm:$0xff]  ;;  %v1604_v32 = vld [vmem:[#allocation4 + $0x300] sm:$0xff] }
 0x126   : > { %1419 = vmatpush2.msra.mxu0 %v478_v31  ;;  %2540 = vmatprep.subr.mxu1 %v1671_v35  ;;  %v1983_v35 = vld [vmem:[#allocation4 + $0xed8] sm:$0xff] }
 0x127   : > { %1421 = vmatmul.mubr.f32.vlgmr.msra.gmra.mxu0 %v4646_v38  ;;  %2571 = vmatprep.subr.mxu0 %v1791_v33  ;;  %v1712_v38 = vld [vmem:[#allocation4 + $0x660] sm:$0xff] }
 0x128   : > { %2572 = vmatpush1.msra.mxu0 %v1790_v34  ;;  %2541 = vmatpush2.msra.mxu1 %v1670_v37  ;;  %v1718_v34 = vld [vmem:[#allocation4 + $0x690] sm:$0xff] }
 0x129   : > { %2573 = vmatprep.subr.mxu0 %v1785_v36  ;;  %2542 = vmatprep.subr.mxu1 %v1665_v40  ;;  %v1713_v36 = vld [vmem:[#allocation4 + $0x668] sm:$0xff]  ;;  %v1707_v40 = vld [vmem:[#allocation4 + $0x638] sm:$0xff] }
 0x12a   : > { %2574 = vmatpush1.msra.mxu0 %v1784_v39  ;;  %2543 = vmatpush2.msra.mxu1 %v1664_v4  ;;  %v1706_v4 = vld [vmem:[#allocation4 + $0x630] sm:$0xff] }
 0x12b   : > { %2575 = vmatprep.subr.mxu0 %v1779_v41  ;;  %2544 = vmatprep.subr.mxu1 %v1659_v43  ;;  %v1701_v43 = vld [vmem:[#allocation4 + $0x608] sm:$0xff] }
 0x12c   : > { %2576 = vmatpush1.msra.mxu0 %v1778_v42  ;;  %2545 = vmatpush2.msra.mxu1 %v1658_v44  ;;  %v1982_v42 = vld [vmem:[#allocation4 + $0xed0] sm:$0xff]  ;;  %v1700_v44 = vld [vmem:[#allocation4 + $0x600] sm:$0xff] }
 0x12d   : > { %2577 = vmatprep.subr.mxu0 %v1773_v6  ;;  %2546 = vmatprep.subr.mxu1 %v1653_v47  ;;  %v1977_v6 = vld [vmem:[#allocation4 + $0xea8] sm:$0xff]  ;;  %v1971_v47 = vld [vmem:[#allocation4 + $0xe78] sm:$0xff] }
 0x12e   : > { %2578 = vmatpush1.msra.mxu0 %v1772_v46  ;;  %2547 = vmatpush2.msra.mxu1 %v1652_v49  ;;  %v1887_v46 = vld [vmem:[#allocation4 + $0xbd8] sm:$0xff]  ;;  %v1970_v49 = vld [vmem:[#allocation4 + $0xe70] sm:$0xff] }
 0x12f   : > { %2579 = vmatprep.subr.mxu0 %v1767_v48  ;;  %2548 = vmatprep.subr.mxu1 %v1647_v51  ;;  %v1886_v48 = vld [vmem:[#allocation4 + $0xbd0] sm:$0xff]  ;;  %v1965_v51 = vld [vmem:[#allocation4 + $0xe48] sm:$0xff] }
 0x130   : > { %2580 = vmatpush1.msra.mxu0 %v1766_v50  ;;  %2549 = vmatpush2.msra.mxu1 %v1646_v53  ;;  %v1881_v50 = vld [vmem:[#allocation4 + $0xba8] sm:$0xff]  ;;  %v1964_v53 = vld [vmem:[#allocation4 + $0xe40] sm:$0xff] }
 0x131   : > { %2581 = vmatprep.subr.mxu0 %v1761_v52  ;;  %2550 = vmatprep.subr.mxu1 %v1641_v56  ;;  %v1880_v52 = vld [vmem:[#allocation4 + $0xba0] sm:$0xff]  ;;  %v1959_v56 = vld [vmem:[#allocation4 + $0xe18] sm:$0xff] }
 0x132   : > { %2582 = vmatpush1.msra.mxu0 %v1760_v55  ;;  %2551 = vmatpush2.msra.mxu1 %v1640_v58  ;;  %v1875_v55 = vld [vmem:[#allocation4 + $0xb78] sm:$0xff]  ;;  %v748_v58 = vsub.s32 3, %v4904_v54 }
 0x133   : > { %2583 = vmatprep.subr.mxu0 %v1755_v57  ;;  %2552 = vmatprep.subr.mxu1 %v1635_v60  ;;  %v1874_v57 = vld [vmem:[#allocation4 + $0xb70] sm:$0xff]  ;;  %v1869_v60 = vld [vmem:[#allocation4 + $0xb48] sm:$0xff] }
 0x134   : > { %2584 = vmatpush1.msra.mxu0 %v1754_v59  ;;  %2553 = vmatpush2.msra.mxu1 %v1634_v62  ;;  %v1958_v59 = vld [vmem:[#allocation4 + $0xe10] sm:$0xff]  ;;  %v1868_v62 = vld [vmem:[#allocation4 + $0xb40] sm:$0xff] }
 0x135   : > { %2585 = vmatprep.subr.mxu0 %v1749_v61  ;;  %2554 = vmatprep.subr.mxu1 %v1629_v3  ;;  %v1953_v61 = vld [vmem:[#allocation4 + $0xde8] sm:$0xff]  ;;  %v1863_v3 = vld [vmem:[#allocation4 + $0xb18] sm:$0xff] }
 0x136   : > { %2586 = vmatpush1.msra.mxu0 %v1748_v1  ;;  %2555 = vmatpush2.msra.mxu1 %v1628_v7  ;;  %v1952_v1 = vld [vmem:[#allocation4 + $0xde0] sm:$0xff]  ;;  %v1862_v7 = vld [vmem:[#allocation4 + $0xb10] sm:$0xff] }
 0x137   : > { %2587 = vmatprep.subr.mxu0 %v1743_v5  ;;  %2556 = vmatprep.subr.mxu1 %v1623_v10  ;;  %v1947_v5 = vld [vmem:[#allocation4 + $0xdb8] sm:$0xff]  ;;  %v1946_v10 = vld [vmem:[#allocation4 + $0xdb0] sm:$0xff] }
 0x138   : > { %2588 = vmatpush1.msra.mxu0 %v1742_v9  ;;  %v854_v21 = vpop.f32.mrf.mxu0  ;;  %2557 = vmatpush2.msra.mxu1 %v1622_v13  ;;  %v749_v9 = vrot.slane %v4909_v2, %v748_v58  ;;  %v1941_v13 = vld [vmem:[#allocation4 + $0xd88] sm:$0xff] }
 0x139   : > { %2589 = vmatprep.subr.mxu0 %v1737_v11  ;;  %v855_v24 = vadd.f32 %v854_v21, %v737_v12  ;;  %2558 = vmatprep.subr.mxu1 %v1617_v16  ;;  %v1857_v11 = vld [vmem:[#allocation4 + $0xae8] sm:$0xff]  ;;  %v1940_v16 = vld [vmem:[#allocation4 + $0xd80] sm:$0xff] }
 0x13a   : > { %2590 = vmatpush1.msra.mxu0 %v1736_v14  ;;  %v856_v27 = vpop.f32.mrf.mxu0  ;;  %2559 = vmatpush2.msra.mxu1 %v1616_v19  ;;  %v1856_v14 = vld [vmem:[#allocation4 + $0xae0] sm:$0xff]  ;;  %v1935_v19 = vld [vmem:[#allocation4 + $0xd58] sm:$0xff] }
 0x13b   : > { %2591 = vmatprep.subr.mxu0 %v1731_v17  ;;  %v857_v31 = vadd.f32 %v856_v27, %v741_v18  ;;  %2560 = vmatprep.subr.mxu1 %v1611_v22  ;;  %v926_v33 = vadd.f32 %v925_v15, %v855_v24  ;;  %v1851_v17 = vld [vmem:[#allocation4 + $0xab8] sm:$0xff]  ;;  %v1934_v22 = vld [vmem:[#allocation4 + $0xd50] sm:$0xff]  ;;  %v1845_v24 = vld [vmem:[#allocation4 + $0xa88] sm:$0xff] }
 0x13c   : > { %2592 = vmatpush1.msra.mxu0 %v1730_v20  ;;  %2561 = vmatpush2.msra.mxu1 %v1610_v25  ;;  %v1850_v20 = vld [vmem:[#allocation4 + $0xab0] sm:$0xff]  ;;  %v1929_v25 = vld [vmem:[#allocation4 + $0xd28] sm:$0xff]  ;;  %v1844_v27 = vld [vmem:[#allocation4 + $0xa80] sm:$0xff] }
 0x13d   : > { %2593 = vmatprep.subr.mxu0 %v1725_v23  ;;  %v928_v37 = vadd.f32 %v927_v28, %v857_v31  ;;  %2562 = vmatprep.subr.mxu1 %v1605_v29  ;;  %v4920_v41 = vmax.f32 %v926_v33, 0.0  ;;  %v1928_v28 = vld [vmem:[#allocation4 + $0xd20] sm:$0xff]  ;;  %v1839_v29 = vld [vmem:[#allocation4 + $0xa58] sm:$0xff] }
 0x13e   : > { %2594 = vmatpush1.msra.mxu0 %v1724_v26  ;;  %2563 = vmatpush2.msra.mxu1 %v1604_v32  ;;  %v1838_v32 = vld [vmem:[#allocation4 + $0xa50] sm:$0xff]  ;;  %v1923_v33 = vld [vmem:[#allocation4 + $0xcf8] sm:$0xff] }
 0x13f   : > { %2595 = vmatprep.subr.mxu0 %v1719_v30  ;;  %v4918_v39 = vmax.f32 %v928_v37, 0.0  ;;  %2642 = vmatprep.subr.mxu1 %v1983_v35  ;;  %v744_v30 = vsub.s32 2, %v4904_v54  ;;  %v1922_v35 = vld [vmem:[#allocation4 + $0xcf0] sm:$0xff]  ;;  %v1917_v37 = vld [vmem:[#allocation4 + $0xcc8] sm:$0xff] }
 0x140   : > { %2596 = vmatpush1.msra.mxu0 %v1718_v34  ;;  %v1833_v34 = vld [vmem:[#allocation4 + $0xa28] sm:$0xff] }
 0x141   : > { %2597 = vmatprep.subr.mxu0 %v1713_v36  ;;  %2564 = vmatprep.mubr.f32.mxu1 %v4918_v39  ;;  %v1832_v36 = vld [vmem:[#allocation4 + $0xa20] sm:$0xff] }
 0x142   : > { %2598 = vmatpush1.msra.mxu0 %v1712_v38  ;;  %2565 = vmatmul.mubr.f32.vlgmr.msra.gmra.mxu1 %v4920_v41  ;;  %v1827_v38 = vld [vmem:[#allocation4 + $0x9f8] sm:$0xff] }
 0x143   : > { %2599 = vmatprep.subr.mxu0 %v1707_v40  ;;  %2643 = vmatpush1.msra.mxu1 %v1982_v42  ;;  %v1916_v40 = vld [vmem:[#allocation4 + $0xcc0] sm:$0xff]  ;;  %v1826_v42 = vld [vmem:[#allocation4 + $0x9f0] sm:$0xff] }
 0x144   : > { %2600 = vmatpush1.msra.mxu0 %v1706_v4  ;;  %2644 = vmatprep.subr.mxu1 %v1977_v6  ;;  %v745_v4 = vrot.slane %v4909_v2, %v744_v30  ;;  %v1821_v6 = vld [vmem:[#allocation4 + $0x9c8] sm:$0xff] }
 0x145   : > { %2601 = vmatprep.subr.mxu0 %v1701_v43  ;;  %2645 = vmatpush1.msra.mxu1 %v1976_v45  ;;  %v1911_v43 = vld [vmem:[#allocation4 + $0xc98] sm:$0xff]  ;;  %v1820_v45 = vld [vmem:[#allocation4 + $0x9c0] sm:$0xff] }
 0x146   : > { %2602 = vmatpush1.msra.mxu0 %v1700_v44  ;;  %2646 = vmatprep.subr.mxu1 %v1971_v47  ;;  %v1910_v44 = vld [vmem:[#allocation4 + $0xc90] sm:$0xff]  ;;  %v1815_v47 = vld [vmem:[#allocation4 + $0x998] sm:$0xff] }
 0x147   : > { %2603 = vmatprep.subr.mxu0 %v1887_v46  ;;  %2647 = vmatpush1.msra.mxu1 %v1970_v49  ;;  %v1905_v46 = vld [vmem:[#allocation4 + $0xc68] sm:$0xff] }
 0x148   : > { %2604 = vmatpush2.msra.mxu0 %v1886_v48  ;;  %2648 = vmatprep.subr.mxu1 %v1965_v51  ;;  %v1904_v48 = vld [vmem:[#allocation4 + $0xc60] sm:$0xff]  ;;  %v1899_v51 = vld [vmem:[#allocation4 + $0xc38] sm:$0xff] }
 0x149   : > { %2605 = vmatprep.subr.mxu0 %v1881_v50  ;;  %2649 = vmatpush1.msra.mxu1 %v1964_v53  ;;  %v1814_v50 = vld [vmem:[#allocation4 + $0x990] sm:$0xff] }
 0x14a   : > { %2606 = vmatpush2.msra.mxu0 %v1880_v52  ;;  %2650 = vmatprep.subr.mxu1 %v1959_v56  ;;  %v1809_v52 = vld [vmem:[#allocation4 + $0x968] sm:$0xff]  ;;  %v1898_v53 = vld [vmem:[#allocation4 + $0xc30] sm:$0xff] }
 0x14b   : > { %2607 = vmatprep.subr.mxu0 %v1875_v55  ;;  %2651 = vmatpush1.msra.mxu1 %v1958_v59  ;;  %v1808_v55 = vld [vmem:[#allocation4 + $0x960] sm:$0xff]  ;;  %v1893_v56 = vld [vmem:[#allocation4 + $0xc08] sm:$0xff] }
 0x14c   : > { %2608 = vmatpush2.msra.mxu0 %v1874_v57  ;;  %2652 = vmatprep.subr.mxu1 %v1953_v61  ;;  %v1803_v57 = vld [vmem:[#allocation4 + $0x938] sm:$0xff]  ;;  %v1892_v59 = vld [vmem:[#allocation4 + $0xc00] sm:$0xff]  ;;  %v1802_v61 = vld [vmem:[#allocation4 + $0x930] sm:$0xff] }
 0x14d   : > { %2609 = vmatprep.subr.mxu0 %v1869_v60  ;;  %2653 = vmatpush1.msra.mxu1 %v1952_v1  ;;  %v1797_v1 = vld [vmem:[#allocation4 + $0x908] sm:$0xff] }
 0x14e   : > { %2610 = vmatpush2.msra.mxu0 %v1868_v62  ;;  %v4928_v12 = vpop.f32.mrf.mxu1  ;;  %v4930_v15 = vpop.f32.mrf.mxu0  ;;  %2654 = vmatprep.subr.mxu1 %v1947_v5  ;;  %v2079_v62 = vld [vmem:[#allocation4 + $0x11d8] sm:$0xff]  ;;  %v1796_v5 = vld [vmem:[#allocation4 + $0x900] sm:$0xff] }
 0x14f   : > { %2611 = vmatprep.subr.mxu0 %v1863_v3  ;;  %2655 = vmatpush1.msra.mxu1 %v1946_v10  ;;  %v997_v49 = vadd.f32 %v4928_v12, %v745_v4  ;;  %v2078_v3 = vld [vmem:[#allocation4 + $0x11d0] sm:$0xff]  ;;  %v2072_v12 = vld [vmem:[#allocation4 + $0x11a0] sm:$0xff]  ;;  %v2031_v4 = vld [vmem:[#allocation4 + $0x1058] sm:$0xff] }
 0x150   : > { %2612 = vmatpush2.msra.mxu0 %v1862_v7  ;;  %v998_v18 = vpop.f32.mrf.mxu1  ;;  %2656 = vmatprep.subr.mxu1 %v1941_v13  ;;  %v1069_v23 = vpop.f32.mrf.mxu0  ;;  %v2073_v7 = vld [vmem:[#allocation4 + $0x11a8] sm:$0xff] }
 0x151   : > { %2613 = vmatprep.subr.mxu0 %v1857_v11  ;;  %v999_v21 = vadd.f32 %v998_v18, %v749_v9  ;;  %2657 = vmatpush1.msra.mxu1 %v1940_v16  ;;  %v1068_v60 = vadd.f32 %v4930_v15, %v997_v49  ;;  %v2175_v9 = vld [vmem:[#allocation4 + $0x14d8] sm:$0xff]  ;;  %v2174_v11 = vld [vmem:[#allocation4 + $0x14d0] sm:$0xff]  ;;  %v2169_v13 = vld [vmem:[#allocation4 + $0x14a8] sm:$0xff] }
 0x152   : > { %2614 = vmatpush2.msra.mxu0 %v1856_v14  ;;  %2658 = vmatprep.subr.mxu1 %v1935_v19  ;;  %v2067_v14 = vld [vmem:[#allocation4 + $0x1178] sm:$0xff]  ;;  %v2168_v15 = vld [vmem:[#allocation4 + $0x14a0] sm:$0xff]  ;;  %v2066_v16 = vld [vmem:[#allocation4 + $0x1170] sm:$0xff] }
 0x153   : > { %2615 = vmatprep.subr.mxu0 %v1851_v17  ;;  %v1070_v26 = vadd.f32 %v1069_v23, %v999_v21  ;;  %2659 = vmatpush1.msra.mxu1 %v1934_v22  ;;  %v4941_v10 = vmax.f32 %v1068_v60, 0.0  ;;  %v2163_v17 = vld [vmem:[#allocation4 + $0x1478] sm:$0xff]  ;;  %v2061_v18 = vld [vmem:[#allocation4 + $0x1148] sm:$0xff]  ;;  %v2162_v19 = vld [vmem:[#allocation4 + $0x1470] sm:$0xff] }
 0x154   : > { %2616 = vmatpush2.msra.mxu0 %v1850_v20  ;;  %2660 = vmatprep.subr.mxu1 %v1929_v25  ;;  %v2060_v20 = vld [vmem:[#allocation4 + $0x1140] sm:$0xff]  ;;  %v2157_v21 = vld [vmem:[#allocation4 + $0x1448] sm:$0xff]  ;;  %v2055_v22 = vld [vmem:[#allocation4 + $0x1118] sm:$0xff] }
 0x155   : > { %v4933_v31 = vmax.f32 %v1070_v26, 0.0  ;;  %2617 = vmatprep.subr.mxu0 %v1845_v24  ;;  %2661 = vmatpush1.msra.mxu1 %v1928_v28  ;;  %v2156_v23 = vld [vmem:[#allocation4 + $0x1440] sm:$0xff]  ;;  %v2054_v24 = vld [vmem:[#allocation4 + $0x1110] sm:$0xff]  ;;  %v2151_v25 = vld [vmem:[#allocation4 + $0x1418] sm:$0xff] }
 0x156   : > { %2618 = vmatpush2.msra.mxu0 %v1844_v27  ;;  %2662 = vmatprep.subr.mxu1 %v1923_v33  ;;  %v2049_v26 = vld [vmem:[#allocation4 + $0x10e8] sm:$0xff]  ;;  %v2150_v27 = vld [vmem:[#allocation4 + $0x1410] sm:$0xff]  ;;  %v2048_v28 = vld [vmem:[#allocation4 + $0x10e0] sm:$0xff] }
 0x157   : > { %2619 = vmatprep.subr.mxu0 %v1839_v29  ;;  %2635 = vmatprep.mubr.f32.mxu0 %v4933_v31  ;;  %v2145_v29 = vld [vmem:[#allocation4 + $0x13e8] sm:$0xff]  ;;  %v2144_v33 = vld [vmem:[#allocation4 + $0x13e0] sm:$0xff]  ;;  %v2006_v60 = vld [vmem:[#allocation4 + $0xf90] sm:$0xff] }
 0x158   : > { %2620 = vmatpush2.msra.mxu0 %v1838_v32  ;;  %2663 = vmatpush1.msra.mxu1 %v1922_v35  ;;  %v2043_v32 = vld [vmem:[#allocation4 + $0x10b8] sm:$0xff]  ;;  %v2120_v49 = vld [vmem:[#allocation4 + $0x1320] sm:$0xff] }
 0x159   : > { %2621 = vmatprep.subr.mxu0 %v1833_v34  ;;  %2664 = vmatprep.subr.mxu1 %v1917_v37  ;;  %v2042_v34 = vld [vmem:[#allocation4 + $0x10b0] sm:$0xff]  ;;  %v2139_v35 = vld [vmem:[#allocation4 + $0x13b8] sm:$0xff] }
 0x15a   : > { %2622 = vmatpush2.msra.mxu0 %v1832_v36  ;;  %2665 = vmatpush1.msra.mxu1 %v1916_v40  ;;  %v2037_v36 = vld [vmem:[#allocation4 + $0x1088] sm:$0xff]  ;;  %v2138_v37 = vld [vmem:[#allocation4 + $0x13b0] sm:$0xff] }
 0x15b   : > { %2623 = vmatprep.subr.mxu0 %v1827_v38  ;;  %2666 = vmatprep.subr.mxu1 %v1911_v43  ;;  %v2036_v38 = vld [vmem:[#allocation4 + $0x1080] sm:$0xff]  ;;  %v2133_v40 = vld [vmem:[#allocation4 + $0x1388] sm:$0xff]  ;;  %v2030_v43 = vld [vmem:[#allocation4 + $0x1050] sm:$0xff] }
 0x15c   : > { %2624 = vmatpush2.msra.mxu0 %v1826_v42  ;;  %2667 = vmatpush1.msra.mxu1 %v1910_v44  ;;  %v2132_v42 = vld [vmem:[#allocation4 + $0x1380] sm:$0xff]  ;;  %v2025_v44 = vld [vmem:[#allocation4 + $0x1028] sm:$0xff] }
 0x15d   : > { %2625 = vmatprep.subr.mxu0 %v1821_v6  ;;  %2668 = vmatprep.subr.mxu1 %v1905_v46  ;;  %v2127_v6 = vld [vmem:[#allocation4 + $0x1358] sm:$0xff]  ;;  %v2024_v46 = vld [vmem:[#allocation4 + $0x1020] sm:$0xff] }
 0x15e   : > { %2626 = vmatpush2.msra.mxu0 %v1820_v45  ;;  %2669 = vmatpush1.msra.mxu1 %v1904_v48  ;;  %v2126_v45 = vld [vmem:[#allocation4 + $0x1350] sm:$0xff]  ;;  %v2019_v48 = vld [vmem:[#allocation4 + $0xff8] sm:$0xff] }
 0x15f   : > { %2627 = vmatprep.subr.mxu0 %v1815_v47  ;;  %2670 = vmatprep.subr.mxu1 %v1899_v51  ;;  %v2121_v47 = vld [vmem:[#allocation4 + $0x1328] sm:$0xff]  ;;  %v2115_v51 = vld [vmem:[#allocation4 + $0x12f8] sm:$0xff] }
 0x160   : > { %2628 = vmatpush2.msra.mxu0 %v1814_v50  ;;  %2671 = vmatpush1.msra.mxu1 %v1898_v53  ;;  %v2018_v50 = vld [vmem:[#allocation4 + $0xff0] sm:$0xff] }
 0x161   : > { %2629 = vmatprep.subr.mxu0 %v1809_v52  ;;  %2672 = vmatprep.subr.mxu1 %v1893_v56  ;;  %v2013_v52 = vld [vmem:[#allocation4 + $0xfc8] sm:$0xff]  ;;  %v2114_v53 = vld [vmem:[#allocation4 + $0x12f0] sm:$0xff] }
 0x162   : > { %2630 = vmatpush2.msra.mxu0 %v1808_v55  ;;  %2673 = vmatpush1.msra.mxu1 %v1892_v59  ;;  %v2012_v55 = vld [vmem:[#allocation4 + $0xfc0] sm:$0xff]  ;;  %v2109_v56 = vld [vmem:[#allocation4 + $0x12c8] sm:$0xff] }
 0x163   : > { %2631 = vmatprep.subr.mxu0 %v1803_v57  ;;  %2674 = vmatprep.subr.mxu1 %v2079_v62  ;;  %v2007_v57 = vld [vmem:[#allocation4 + $0xf98] sm:$0xff]  ;;  %v2108_v59 = vld [vmem:[#allocation4 + $0x12c0] sm:$0xff]  ;;  %v2001_v62 = vld [vmem:[#allocation4 + $0xf68] sm:$0xff] }
 0x164   : > { %2632 = vmatpush2.msra.mxu0 %v1802_v61  ;;  %2675 = vmatpush2.msra.mxu1 %v2078_v3  ;;  %v2103_v61 = vld [vmem:[#allocation4 + $0x1298] sm:$0xff]  ;;  %v2000_v3 = vld [vmem:[#allocation4 + $0xf60] sm:$0xff] }
 0x165   : > { %2633 = vmatprep.subr.mxu0 %v1797_v1  ;;  %2676 = vmatprep.subr.mxu1 %v2073_v7  ;;  %v2102_v1 = vld [vmem:[#allocation4 + $0x1290] sm:$0xff]  ;;  %v1995_v7 = vld [vmem:[#allocation4 + $0xf38] sm:$0xff] }
 0x166   : > { %2634 = vmatpush2.msra.mxu0 %v1796_v5  ;;  %2677 = vmatpush2.msra.mxu1 %v2072_v12  ;;  %v2097_v5 = vld [vmem:[#allocation4 + $0x1268] sm:$0xff]  ;;  %v2091_v12 = vld [vmem:[#allocation4 + $0x1238] sm:$0xff] }
 0x167   : > { %2636 = vmatmul.mubr.f32.vlgmr.msra.gmra.mxu0 %v4941_v10  ;;  %2713 = vmatprep.subr.mxu0 %v2175_v9  ;;  %v2096_v9 = vld [vmem:[#allocation4 + $0x1260] sm:$0xff] }
 0x168   : > { %2714 = vmatpush1.msra.mxu0 %v2174_v11  ;;  %2678 = vmatprep.subr.mxu1 %v2067_v14  ;;  %v1994_v11 = vld [vmem:[#allocation4 + $0xf30] sm:$0xff] }
 0x169   : > { %2715 = vmatprep.subr.mxu0 %v2169_v13  ;;  %2679 = vmatpush2.msra.mxu1 %v2066_v16  ;;  %v1989_v13 = vld [vmem:[#allocation4 + $0xf08] sm:$0xff]  ;;  %v2090_v14 = vld [vmem:[#allocation4 + $0x1230] sm:$0xff] }
 0x16a   : > { %2716 = vmatpush1.msra.mxu0 %v2168_v15  ;;  %2680 = vmatprep.subr.mxu1 %v2061_v18  ;;  %v1988_v15 = vld [vmem:[#allocation4 + $0xf00] sm:$0xff]  ;;  %v2085_v16 = vld [vmem:[#allocation4 + $0x1208] sm:$0xff] }
 0x16b   : > { %2717 = vmatprep.subr.mxu0 %v2163_v17  ;;  %2681 = vmatpush2.msra.mxu1 %v2060_v20  ;;  %v2367_v17 = vld [vmem:[#allocation4 + $0x1ad8] sm:$0xff]  ;;  %v2084_v18 = vld [vmem:[#allocation4 + $0x1200] sm:$0xff]  ;;  %v2270_v20 = vld [vmem:[#allocation4 + $0x17d0] sm:$0xff] }
 0x16c   : > { %2718 = vmatpush1.msra.mxu0 %v2162_v19  ;;  %2682 = vmatprep.subr.mxu1 %v2055_v22  ;;  %v2271_v19 = vld [vmem:[#allocation4 + $0x17d8] sm:$0xff]  ;;  %v2264_v22 = vld [vmem:[#allocation4 + $0x17a0] sm:$0xff] }
 0x16d   : > { %2719 = vmatprep.subr.mxu0 %v2157_v21  ;;  %2683 = vmatpush2.msra.mxu1 %v2054_v24  ;;  %v2265_v21 = vld [vmem:[#allocation4 + $0x17a8] sm:$0xff]  ;;  %v2258_v24 = vld [vmem:[#allocation4 + $0x1770] sm:$0xff] }
 0x16e   : > { %2720 = vmatpush1.msra.mxu0 %v2156_v23  ;;  %2684 = vmatprep.subr.mxu1 %v2049_v26  ;;  %v2259_v23 = vld [vmem:[#allocation4 + $0x1778] sm:$0xff]  ;;  %v2253_v26 = vld [vmem:[#allocation4 + $0x1748] sm:$0xff] }
 0x16f   : > { %2721 = vmatprep.subr.mxu0 %v2151_v25  ;;  %2685 = vmatpush2.msra.mxu1 %v2048_v28  ;;  %v752_v25 = vsub.s32 4, %v4904_v54  ;;  %v756_v28 = vsub.s32 5, %v4904_v54 }
 0x170   : > { %2722 = vmatpush1.msra.mxu0 %v2150_v27  ;;  %2686 = vmatprep.subr.mxu1 %v2043_v32  ;;  %v2252_v27 = vld [vmem:[#allocation4 + $0x1740] sm:$0xff]  ;;  %v2246_v32 = vld [vmem:[#allocation4 + $0x1710] sm:$0xff] }
 0x171   : > { %2723 = vmatprep.subr.mxu0 %v2145_v29  ;;  %2687 = vmatpush2.msra.mxu1 %v2042_v34  ;;  %v2247_v29 = vld [vmem:[#allocation4 + $0x1718] sm:$0xff]  ;;  %v2241_v34 = vld [vmem:[#allocation4 + $0x16e8] sm:$0xff] }
 0x172   : > { %2724 = vmatpush1.msra.mxu0 %v2144_v33  ;;  %2688 = vmatprep.subr.mxu1 %v2037_v36  ;;  %v753_v33 = vrot.slane %v4909_v2, %v752_v25  ;;  %v2240_v36 = vld [vmem:[#allocation4 + $0x16e0] sm:$0xff] }
 0x173   : > { %2725 = vmatprep.subr.mxu0 %v2139_v35  ;;  %2689 = vmatpush2.msra.mxu1 %v2036_v38  ;;  %v1209_v35 = vpop.f32.mrf.mxu1  ;;  %v2235_v38 = vld [vmem:[#allocation4 + $0x16b8] sm:$0xff] }
 0x174   : > { %2726 = vmatpush1.msra.mxu0 %v2138_v37  ;;  %2690 = vmatprep.subr.mxu1 %v2031_v4  ;;  %v757_v37 = vrot.slane %v4909_v2, %v756_v28  ;;  %v2234_v4 = vld [vmem:[#allocation4 + $0x16b0] sm:$0xff] }
 0x175   : > { %2727 = vmatprep.subr.mxu0 %v2133_v40  ;;  %2691 = vmatpush2.msra.mxu1 %v2030_v43  ;;  %v2229_v43 = vld [vmem:[#allocation4 + $0x1688] sm:$0xff] }
 0x176   : > { %2728 = vmatpush1.msra.mxu0 %v2132_v42  ;;  %2692 = vmatprep.subr.mxu1 %v2025_v44  ;;  %v1211_v44 = vpop.f32.mrf.mxu1 }
 0x177   : > { %2729 = vmatprep.subr.mxu0 %v2127_v6  ;;  %2693 = vmatpush2.msra.mxu1 %v2024_v46 }
 0x178   : > { %2730 = vmatpush1.msra.mxu0 %v2126_v45  ;;  %2694 = vmatprep.subr.mxu1 %v2019_v48  ;;  %v2228_v45 = vld [vmem:[#allocation4 + $0x1680] sm:$0xff] }
 0x179   : > { %2731 = vmatprep.subr.mxu0 %v2121_v47  ;;  %2695 = vmatpush2.msra.mxu1 %v2018_v50  ;;  %v2223_v47 = vld [vmem:[#allocation4 + $0x1658] sm:$0xff] }
 0x17a   : > { %2732 = vmatpush1.msra.mxu0 %v2120_v49  ;;  %2696 = vmatprep.subr.mxu1 %v2013_v52  ;;  %v2222_v49 = vld [vmem:[#allocation4 + $0x1650] sm:$0xff]  ;;  %v2216_v52 = vld [vmem:[#allocation4 + $0x1620] sm:$0xff] }
 0x17b   : > { %2733 = vmatprep.subr.mxu0 %v2115_v51  ;;  %2697 = vmatpush2.msra.mxu1 %v2012_v55  ;;  %v2217_v51 = vld [vmem:[#allocation4 + $0x1628] sm:$0xff]  ;;  %v2211_v55 = vld [vmem:[#allocation4 + $0x15f8] sm:$0xff] }
 0x17c   : > { %2734 = vmatpush1.msra.mxu0 %v2114_v53  ;;  %2698 = vmatprep.subr.mxu1 %v2007_v57  ;;  %v2210_v57 = vld [vmem:[#allocation4 + $0x15f0] sm:$0xff] }
 0x17d   : > { %2735 = vmatprep.subr.mxu0 %v2109_v56  ;;  %2699 = vmatpush2.msra.mxu1 %v2006_v60  ;;  %v2205_v60 = vld [vmem:[#allocation4 + $0x15c8] sm:$0xff] }
 0x17e   : > { %2736 = vmatpush1.msra.mxu0 %v2108_v59  ;;  %2700 = vmatprep.subr.mxu1 %v2001_v62  ;;  %v2366_v59 = vld [vmem:[#allocation4 + $0x1ad0] sm:$0xff]  ;;  %v2204_v62 = vld [vmem:[#allocation4 + $0x15c0] sm:$0xff] }
 0x17f   : > { %2737 = vmatprep.subr.mxu0 %v2103_v61  ;;  %2701 = vmatpush2.msra.mxu1 %v2000_v3  ;;  %v2361_v61 = vld [vmem:[#allocation4 + $0x1aa8] sm:$0xff]  ;;  %v2199_v3 = vld [vmem:[#allocation4 + $0x1598] sm:$0xff] }
 0x180   : > { %2738 = vmatpush1.msra.mxu0 %v2102_v1  ;;  %2702 = vmatprep.subr.mxu1 %v1995_v7  ;;  %v2360_v1 = vld [vmem:[#allocation4 + $0x1aa0] sm:$0xff]  ;;  %v2198_v7 = vld [vmem:[#allocation4 + $0x1590] sm:$0xff] }
 0x181   : > { %2739 = vmatprep.subr.mxu0 %v2097_v5  ;;  %2703 = vmatpush2.msra.mxu1 %v1994_v11  ;;  %v2355_v5 = vld [vmem:[#allocation4 + $0x1a78] sm:$0xff]  ;;  %v2193_v11 = vld [vmem:[#allocation4 + $0x1568] sm:$0xff] }
 0x182   : > { %2740 = vmatpush1.msra.mxu0 %v2096_v9  ;;  %2704 = vmatprep.subr.mxu1 %v1989_v13  ;;  %v2354_v9 = vld [vmem:[#allocation4 + $0x1a70] sm:$0xff]  ;;  %v760_v13 = vsub.s32 6, %v4904_v54 }
 0x183   : > { %2741 = vmatprep.subr.mxu0 %v2091_v12  ;;  %2705 = vmatpush2.msra.mxu1 %v1988_v15  ;;  %v2349_v12 = vld [vmem:[#allocation4 + $0x1a48] sm:$0xff]  ;;  %v2348_v15 = vld [vmem:[#allocation4 + $0x1a40] sm:$0xff] }
 0x184   : > { %2742 = vmatpush1.msra.mxu0 %v2090_v14  ;;  %2784 = vmatprep.subr.mxu1 %v2367_v17  ;;  %v2192_v14 = vld [vmem:[#allocation4 + $0x1560] sm:$0xff]  ;;  %v2343_v17 = vld [vmem:[#allocation4 + $0x1a18] sm:$0xff] }
 0x185   : > { %2743 = vmatprep.subr.mxu0 %v2085_v16  ;;  %v2187_v16 = vld [vmem:[#allocation4 + $0x1538] sm:$0xff] }
 0x186   : > { %2744 = vmatpush1.msra.mxu0 %v2084_v18  ;;  %v764_v18 = vsub.s32 7, %v4904_v54 }
 0x187   : > { %2745 = vmatprep.subr.mxu0 %v2271_v19  ;;  %v2186_v19 = vld [vmem:[#allocation4 + $0x1530] sm:$0xff] }
 0x188   : > { %2746 = vmatpush2.msra.mxu0 %v2270_v20  ;;  %v2342_v20 = vld [vmem:[#allocation4 + $0x1a10] sm:$0xff] }
 0x189   : > { %2747 = vmatprep.subr.mxu0 %v2265_v21  ;;  %v2181_v21 = vld [vmem:[#allocation4 + $0x1508] sm:$0xff] }
 0x18a   : > { %2748 = vmatpush2.msra.mxu0 %v2264_v22  ;;  %v2337_v22 = vld [vmem:[#allocation4 + $0x19e8] sm:$0xff] }
 0x18b   : > { %2749 = vmatprep.subr.mxu0 %v2259_v23  ;;  %v761_v23 = vrot.slane %v4909_v2, %v760_v13  ;;  %v1576_v13 = vld [vmem:[#allocation4 + $0x220] sm:$0xff] }
 0x18c   : > { %2750 = vmatpush2.msra.mxu0 %v2258_v24  ;;  %v2180_v24 = vld [vmem:[#allocation4 + $0x1500] sm:$0xff] }
 0x18d   : > { %2751 = vmatprep.subr.mxu0 %v2253_v26  ;;  %v2336_v26 = vld [vmem:[#allocation4 + $0x19e0] sm:$0xff] }
 0x18e   : > { %2752 = vmatpush2.msra.mxu0 %v2252_v27  ;;  %v1601_v27 = vld [vmem:[#allocation4 + $0x2e8] sm:$0xff] }
 0x18f   : > { %2753 = vmatprep.subr.mxu0 %v2247_v29  ;;  %v2331_v29 = vld [vmem:[#allocation4 + $0x19b8] sm:$0xff] }
 0x190   : > { %2754 = vmatpush2.msra.mxu0 %v2246_v32  ;;  %v1138_v40 = vpop.f32.mrf.mxu0  ;;  %v765_v32 = vrot.slane %v4909_v2, %v764_v18  ;;  %v2276_v18 = vld [vmem:[#allocation4 + $0x1800] sm:$0xff] }
 0x191   : > { %2755 = vmatprep.subr.mxu0 %v2241_v34  ;;  %v1139_v42 = vadd.f32 %v1138_v40, %v753_v33  ;;  %v2330_v33 = vld [vmem:[#allocation4 + $0x19b0] sm:$0xff] }
 0x192   : > { %2756 = vmatpush2.msra.mxu0 %v2240_v36  ;;  %v1140_v6 = vpop.f32.mrf.mxu0 }
 0x193   : > { %2757 = vmatprep.subr.mxu0 %v2235_v38  ;;  %v1141_v46 = vadd.f32 %v1140_v6, %v757_v37  ;;  %v1210_v48 = vadd.f32 %v1209_v35, %v1139_v42  ;;  %v2325_v35 = vld [vmem:[#allocation4 + $0x1988] sm:$0xff]  ;;  %v2324_v38 = vld [vmem:[#allocation4 + $0x1980] sm:$0xff] }
 0x194   : > { %2758 = vmatpush2.msra.mxu0 %v2234_v4  ;;  %v2319_v4 = vld [vmem:[#allocation4 + $0x1958] sm:$0xff] }
 0x195   : > { %2759 = vmatprep.subr.mxu0 %v2229_v43  ;;  %v1212_v50 = vadd.f32 %v1211_v44, %v1141_v46  ;;  %v4954_v56 = vmax.f32 %v1210_v48, 0.0  ;;  %v2318_v43 = vld [vmem:[#allocation4 + $0x1950] sm:$0xff]  ;;  %v2313_v44 = vld [vmem:[#allocation4 + $0x1928] sm:$0xff]  ;;  %v2312_v46 = vld [vmem:[#allocation4 + $0x1920] sm:$0xff] }
 0x196   : > { %2760 = vmatpush2.msra.mxu0 %v2228_v45 }
 0x197   : > { %2761 = vmatprep.subr.mxu0 %v2223_v47  ;;  %v4952_v53 = vmax.f32 %v1212_v50, 0.0  ;;  %v2307_v47 = vld [vmem:[#allocation4 + $0x18f8] sm:$0xff] }
 0x198   : > { %2762 = vmatpush2.msra.mxu0 %v2222_v49  ;;  %v2306_v49 = vld [vmem:[#allocation4 + $0x18f0] sm:$0xff] }
 0x199   : > { %2763 = vmatprep.subr.mxu0 %v2217_v51  ;;  %2706 = vmatprep.mubr.f32.mxu1 %v4952_v53  ;;  %v1600_v51 = vld [vmem:[#allocation4 + $0x2e0] sm:$0xff] }
 0x19a   : > { %2764 = vmatpush2.msra.mxu0 %v2216_v52  ;;  %2707 = vmatmul.mubr.f32.vlgmr.msra.gmra.mxu1 %v4954_v56  ;;  %v1595_v52 = vld [vmem:[#allocation4 + $0x2b8] sm:$0xff] }
 0x19b   : > { %2765 = vmatprep.subr.mxu0 %v2211_v55  ;;  %2785 = vmatpush1.msra.mxu1 %v2366_v59  ;;  %v2301_v55 = vld [vmem:[#allocation4 + $0x18c8] sm:$0xff]  ;;  %v2300_v59 = vld [vmem:[#allocation4 + $0x18c0] sm:$0xff] }
 0x19c   : > { %2766 = vmatpush2.msra.mxu0 %v2210_v57  ;;  %2786 = vmatprep.subr.mxu1 %v2361_v61  ;;  %v1594_v57 = vld [vmem:[#allocation4 + $0x2b0] sm:$0xff]  ;;  %v2295_v61 = vld [vmem:[#allocation4 + $0x1898] sm:$0xff] }
 0x19d   : > { %2767 = vmatprep.subr.mxu0 %v2205_v60  ;;  %2787 = vmatpush1.msra.mxu1 %v2360_v1  ;;  %v1589_v60 = vld [vmem:[#allocation4 + $0x288] sm:$0xff]  ;;  %v2294_v1 = vld [vmem:[#allocation4 + $0x1890] sm:$0xff] }
 0x19e   : > { %2768 = vmatpush2.msra.mxu0 %v2204_v62  ;;  %2788 = vmatprep.subr.mxu1 %v2355_v5  ;;  %v1588_v62 = vld [vmem:[#allocation4 + $0x280] sm:$0xff]  ;;  %v2289_v5 = vld [vmem:[#allocation4 + $0x1868] sm:$0xff] }
 0x19f   : > { %2769 = vmatprep.subr.mxu0 %v2199_v3  ;;  %2789 = vmatpush1.msra.mxu1 %v2354_v9  ;;  %v1583_v3 = vld [vmem:[#allocation4 + $0x258] sm:$0xff]  ;;  %v2288_v9 = vld [vmem:[#allocation4 + $0x1860] sm:$0xff] }
 0x1a0   : > { %2770 = vmatpush2.msra.mxu0 %v2198_v7  ;;  %2790 = vmatprep.subr.mxu1 %v2349_v12  ;;  %v1582_v7 = vld [vmem:[#allocation4 + $0x250] sm:$0xff]  ;;  %v2283_v12 = vld [vmem:[#allocation4 + $0x1838] sm:$0xff] }
 0x1a1   : > { %2771 = vmatprep.subr.mxu0 %v2193_v11  ;;  %2791 = vmatpush1.msra.mxu1 %v2348_v15  ;;  %v1577_v11 = vld [vmem:[#allocation4 + $0x228] sm:$0xff]  ;;  %v1571_v15 = vld [vmem:[#allocation4 + $0x1f8] sm:$0xff] }
 0x1a2   : > { %2772 = vmatpush2.msra.mxu0 %v2192_v14  ;;  %2792 = vmatprep.subr.mxu1 %v2343_v17  ;;  %v2282_v14 = vld [vmem:[#allocation4 + $0x1830] sm:$0xff] }
 0x1a3   : > { %2773 = vmatprep.subr.mxu0 %v2187_v16  ;;  %2793 = vmatpush1.msra.mxu1 %v2342_v20  ;;  %v2277_v16 = vld [vmem:[#allocation4 + $0x1808] sm:$0xff]  ;;  %v1570_v17 = vld [vmem:[#allocation4 + $0x1f0] sm:$0xff]  ;;  %v2463_v20 = vld [vmem:[#allocation4 + $0x1dd8] sm:$0xff] }
 0x1a4   : > { %2774 = vmatpush2.msra.mxu0 %v2186_v19  ;;  %2794 = vmatprep.subr.mxu1 %v2337_v22  ;;  %v1565_v19 = vld [vmem:[#allocation4 + $0x1c8] sm:$0xff]  ;;  %v2462_v22 = vld [vmem:[#allocation4 + $0x1dd0] sm:$0xff] }
 0x1a5   : > { %2775 = vmatprep.subr.mxu0 %v2181_v21  ;;  %2795 = vmatpush1.msra.mxu1 %v2336_v26  ;;  %v1564_v21 = vld [vmem:[#allocation4 + $0x1c0] sm:$0xff]  ;;  %v1558_v26 = vld [vmem:[#allocation4 + $0x190] sm:$0xff] }
 0x1a6   : > { %v1280_v34 = vpop.f32.mrf.mxu1  ;;  %2776 = vmatpush2.msra.mxu0 %v2180_v24  ;;  %v1351_v37 = vpop.f32.mrf.mxu0  ;;  %2796 = vmatprep.subr.mxu1 %v2331_v29  ;;  %v2457_v24 = vld [vmem:[#allocation4 + $0x1da8] sm:$0xff] }
 0x1a7   : > { %v1281_v36 = vadd.f32 %v1280_v34, %v761_v23  ;;  %2855 = vmatprep.subr.mxu0 %v1601_v27  ;;  %2797 = vmatpush1.msra.mxu1 %v2330_v33  ;;  %v1559_v23 = vld [vmem:[#allocation4 + $0x198] sm:$0xff]  ;;  %v2456_v27 = vld [vmem:[#allocation4 + $0x1da0] sm:$0xff]  ;;  %v1553_v29 = vld [vmem:[#allocation4 + $0x168] sm:$0xff] }
 0x1a8   : > { %v1282_v40 = vpop.f32.mrf.mxu1  ;;  %2798 = vmatprep.subr.mxu1 %v2325_v35  ;;  %v1353_v2 = vpop.f32.mrf.mxu0  ;;  %v1552_v33 = vld [vmem:[#allocation4 + $0x160] sm:$0xff]  ;;  %v2450_v34 = vld [vmem:[#allocation4 + $0x1d70] sm:$0xff]  ;;  %v1547_v35 = vld [vmem:[#allocation4 + $0x138] sm:$0xff] }
 0x1a9   : > { %v1283_v42 = vadd.f32 %v1282_v40, %v765_v32  ;;  %v1352_v6 = vadd.f32 %v1351_v37, %v1281_v36  ;;  %2799 = vmatpush1.msra.mxu1 %v2324_v38  ;;  %v2451_v32 = vld [vmem:[#allocation4 + $0x1d78] sm:$0xff]  ;;  %v2445_v36 = vld [vmem:[#allocation4 + $0x1d48] sm:$0xff]  ;;  %v1546_v37 = vld [vmem:[#allocation4 + $0x130] sm:$0xff] }
 0x1aa   : > { %2800 = vmatprep.subr.mxu1 %v2319_v4  ;;  %v2444_v38 = vld [vmem:[#allocation4 + $0x1d40] sm:$0xff]  ;;  %v1541_v40 = vld [vmem:[#allocation4 + $0x108] sm:$0xff]  ;;  %v2439_v4 = vld [vmem:[#allocation4 + $0x1d18] sm:$0xff] }
 0x1ab   : > { %v1354_v45 = vadd.f32 %v1353_v2, %v1283_v42  ;;  %2801 = vmatpush1.msra.mxu1 %v2318_v43  ;;  %v4964_v50 = vmax.f32 %v1352_v6, 0.0  ;;  %v1540_v42 = vld [vmem:[#allocation4 + $0x100] sm:$0xff]  ;;  %v2438_v43 = vld [vmem:[#allocation4 + $0x1d10] sm:$0xff]  ;;  %v1535_v6 = vld [vmem:[#allocation4 + $0xd8] sm:$0xff] }
 0x1ac   : > { %2802 = vmatprep.subr.mxu1 %v2313_v44  ;;  %v2433_v2 = vld [vmem:[#allocation4 + $0x1ce8] sm:$0xff]  ;;  %v1534_v44 = vld [vmem:[#allocation4 + $0xd0] sm:$0xff] }
 0x1ad   : > { %v4962_v48 = vmax.f32 %v1354_v45, 0.0  ;;  %2803 = vmatpush1.msra.mxu1 %v2312_v46  ;;  %v2432_v45 = vld [vmem:[#allocation4 + $0x1ce0] sm:$0xff]  ;;  %v1529_v46 = vld [vmem:[#allocation4 + $0xa8] sm:$0xff] }
 0x1ae   : > { %2804 = vmatprep.subr.mxu1 %v2307_v47  ;;  %v2427_v47 = vld [vmem:[#allocation4 + $0x1cb8] sm:$0xff] }
 0x1af   : > { %2777 = vmatprep.mubr.f32.mxu0 %v4962_v48  ;;  %2805 = vmatpush1.msra.mxu1 %v2306_v49  ;;  %v1528_v49 = vld [vmem:[#allocation4 + $0xa0] sm:$0xff] }
 0x1b0   : > { %2778 = vmatmul.mubr.f32.vlgmr.msra.gmra.mxu0 %v4964_v50  ;;  %2806 = vmatprep.subr.mxu1 %v2301_v55  ;;  %v2421_v55 = vld [vmem:[#allocation4 + $0x1c88] sm:$0xff] }
 0x1b1   : > { %2856 = vmatpush1.msra.mxu0 %v1600_v51  ;;  %2919 = vmatprep.mubr.f32.mxu0 %v4918_v39  ;;  %v2426_v51 = vld [vmem:[#allocation4 + $0x1cb0] sm:$0xff] }
 0x1b2   : > { %2857 = vmatprep.subr.mxu0 %v1595_v52  ;;  %2807 = vmatpush1.msra.mxu1 %v2300_v59  ;;  %v1523_v52 = vld [vmem:[#allocation4 + $0x78] sm:$0xff]  ;;  %v2420_v59 = vld [vmem:[#allocation4 + $0x1c80] sm:$0xff] }
 0x1b3   : > { %2858 = vmatpush1.msra.mxu0 %v1594_v57  ;;  %2808 = vmatprep.subr.mxu1 %v2295_v61  ;;  %v1522_v57 = vld [vmem:[#allocation4 + $0x70] sm:$0xff]  ;;  %v2415_v61 = vld [vmem:[#allocation4 + $0x1c58] sm:$0xff] }
 0x1b4   : > { %2859 = vmatprep.subr.mxu0 %v1589_v60  ;;  %2809 = vmatpush1.msra.mxu1 %v2294_v1  ;;  %v1517_v60 = vld [vmem:[#allocation4 + $0x48] sm:$0xff]  ;;  %v2414_v1 = vld [vmem:[#allocation4 + $0x1c50] sm:$0xff] }
 0x1b5   : > { %2860 = vmatpush1.msra.mxu0 %v1588_v62  ;;  %2810 = vmatprep.subr.mxu1 %v2289_v5  ;;  %v1516_v62 = vld [vmem:[#allocation4 + $0x40] sm:$0xff]  ;;  %v2409_v5 = vld [vmem:[#allocation4 + $0x1c28] sm:$0xff] }
 0x1b6   : > { %2861 = vmatprep.subr.mxu0 %v1583_v3  ;;  %2811 = vmatpush1.msra.mxu1 %v2288_v9  ;;  %v1511_v3 = vld [vmem:[#allocation4 + $0x18] sm:$0xff]  ;;  %v2408_v9 = vld [vmem:[#allocation4 + $0x1c20] sm:$0xff] }
 0x1b7   : > { %2862 = vmatpush1.msra.mxu0 %v1582_v7  ;;  %2812 = vmatprep.subr.mxu1 %v2283_v12  ;;  %v1510_v7 = vld [vmem:[#allocation4 + $0x10] sm:$0xff]  ;;  %v2403_v12 = vld [vmem:[#allocation4 + $0x1bf8] sm:$0xff] }
 0x1b8   : > { %2863 = vmatprep.subr.mxu0 %v1577_v11  ;;  %2813 = vmatpush1.msra.mxu1 %v2282_v14  ;;  %v1697_v11 = vld [vmem:[#allocation4 + $0x5e8] sm:$0xff]  ;;  %v2402_v14 = vld [vmem:[#allocation4 + $0x1bf0] sm:$0xff] }
 0x1b9   : > { %2864 = vmatpush1.msra.mxu0 %v1576_v13  ;;  %2814 = vmatprep.subr.mxu1 %v2277_v16  ;;  %v1696_v13 = vld [vmem:[#allocation4 + $0x5e0] sm:$0xff]  ;;  %v2397_v16 = vld [vmem:[#allocation4 + $0x1bc8] sm:$0xff] }
 0x1ba   : > { %2865 = vmatprep.subr.mxu0 %v1571_v15  ;;  %2815 = vmatpush1.msra.mxu1 %v2276_v18  ;;  %v1691_v15 = vld [vmem:[#allocation4 + $0x5b8] sm:$0xff]  ;;  %v2396_v18 = vld [vmem:[#allocation4 + $0x1bc0] sm:$0xff] }
 0x1bb   : > { %2866 = vmatpush1.msra.mxu0 %v1570_v17  ;;  %2816 = vmatprep.subr.mxu1 %v2463_v20  ;;  %v1690_v17 = vld [vmem:[#allocation4 + $0x5b0] sm:$0xff]  ;;  %v2391_v20 = vld [vmem:[#allocation4 + $0x1b98] sm:$0xff] }
 0x1bc   : > { %2867 = vmatprep.subr.mxu0 %v1565_v19  ;;  %2817 = vmatpush2.msra.mxu1 %v2462_v22  ;;  %v1685_v19 = vld [vmem:[#allocation4 + $0x588] sm:$0xff]  ;;  %v2390_v22 = vld [vmem:[#allocation4 + $0x1b90] sm:$0xff] }
 0x1bd   : > { %2868 = vmatpush1.msra.mxu0 %v1564_v21  ;;  %2818 = vmatprep.subr.mxu1 %v2457_v24  ;;  %v1684_v21 = vld [vmem:[#allocation4 + $0x580] sm:$0xff]  ;;  %v2385_v24 = vld [vmem:[#allocation4 + $0x1b68] sm:$0xff] }
 0x1be   : > { %2869 = vmatprep.subr.mxu0 %v1559_v23  ;;  %2819 = vmatpush2.msra.mxu1 %v2456_v27  ;;  %v1679_v23 = vld [vmem:[#allocation4 + $0x558] sm:$0xff]  ;;  %v2384_v27 = vld [vmem:[#allocation4 + $0x1b60] sm:$0xff] }
 0x1bf   : > { %2870 = vmatpush1.msra.mxu0 %v1558_v26  ;;  %2820 = vmatprep.subr.mxu1 %v2451_v32  ;;  %v1678_v26 = vld [vmem:[#allocation4 + $0x550] sm:$0xff]  ;;  %v2379_v32 = vld [vmem:[#allocation4 + $0x1b38] sm:$0xff] }
 0x1c0   : > { %2871 = vmatprep.subr.mxu0 %v1553_v29  ;;  %2821 = vmatpush2.msra.mxu1 %v2450_v34  ;;  %v1673_v29 = vld [vmem:[#allocation4 + $0x528] sm:$0xff]  ;;  %v2378_v34 = vld [vmem:[#allocation4 + $0x1b30] sm:$0xff] }
 0x1c1   : > { %2872 = vmatpush1.msra.mxu0 %v1552_v33  ;;  %2822 = vmatprep.subr.mxu1 %v2445_v36  ;;  %v1672_v33 = vld [vmem:[#allocation4 + $0x520] sm:$0xff]  ;;  %v2373_v36 = vld [vmem:[#allocation4 + $0x1b08] sm:$0xff] }
 0x1c2   : > { %2873 = vmatprep.subr.mxu0 %v1547_v35  ;;  %2823 = vmatpush2.msra.mxu1 %v2444_v38  ;;  %v1667_v35 = vld [vmem:[#allocation4 + $0x4f8] sm:$0xff]  ;;  %v2372_v38 = vld [vmem:[#allocation4 + $0x1b00] sm:$0xff] }
 0x1c3   : > { %2874 = vmatpush1.msra.mxu0 %v1546_v37  ;;  %2824 = vmatprep.subr.mxu1 %v2439_v4  ;;  %v1666_v37 = vld [vmem:[#allocation4 + $0x4f0] sm:$0xff]  ;;  %v1793_v4 = vld [vmem:[#allocation4 + $0x8e8] sm:$0xff] }
 0x1c4   : > { %2875 = vmatprep.subr.mxu0 %v1541_v40  ;;  %2825 = vmatpush2.msra.mxu1 %v2438_v43  ;;  %v1661_v40 = vld [vmem:[#allocation4 + $0x4c8] sm:$0xff]  ;;  %v1655_v43 = vld [vmem:[#allocation4 + $0x498] sm:$0xff] }
 0x1c5   : > { %2876 = vmatpush1.msra.mxu0 %v1540_v42  ;;  %2826 = vmatprep.subr.mxu1 %v2433_v2  ;;  %v1660_v42 = vld [vmem:[#allocation4 + $0x4c0] sm:$0xff]  ;;  %v1649_v2 = vld [vmem:[#allocation4 + $0x468] sm:$0xff] }
 0x1c6   : > { %2877 = vmatprep.subr.mxu0 %v1535_v6  ;;  %2827 = vmatpush2.msra.mxu1 %v2432_v45  ;;  %v1654_v6 = vld [vmem:[#allocation4 + $0x490] sm:$0xff]  ;;  %v1643_v45 = vld [vmem:[#allocation4 + $0x438] sm:$0xff] }
 0x1c7   : > { %2878 = vmatpush1.msra.mxu0 %v1534_v44  ;;  %2828 = vmatprep.subr.mxu1 %v2427_v47  ;;  %v1648_v44 = vld [vmem:[#allocation4 + $0x460] sm:$0xff]  ;;  %v1637_v47 = vld [vmem:[#allocation4 + $0x408] sm:$0xff] }
 0x1c8   : > { %2879 = vmatprep.subr.mxu0 %v1529_v46  ;;  %2829 = vmatpush2.msra.mxu1 %v2426_v51  ;;  %v1642_v46 = vld [vmem:[#allocation4 + $0x430] sm:$0xff]  ;;  %v1636_v51 = vld [vmem:[#allocation4 + $0x400] sm:$0xff] }
 0x1c9   : > { %2880 = vmatpush1.msra.mxu0 %v1528_v49  ;;  %2830 = vmatprep.subr.mxu1 %v2421_v55  ;;  %v731_v49 = vld [vmem:[#allocation6 + $0x8] sm:$0x3] }
 0x1ca   : > { %2881 = vmatprep.subr.mxu0 %v1523_v52  ;;  %2831 = vmatpush2.msra.mxu1 %v2420_v59  ;;  %v1631_v52 = vld [vmem:[#allocation4 + $0x3d8] sm:$0xff]  ;;  %v769_v55 = vrot.slane %v731_v49, %v4907_v63  ;;  %v1625_v59 = vld [vmem:[#allocation4 + $0x3a8] sm:$0xff] }
 0x1cb   : > { %2882 = vmatpush1.msra.mxu0 %v1522_v57  ;;  %2832 = vmatprep.subr.mxu1 %v2415_v61  ;;  %v1630_v57 = vld [vmem:[#allocation4 + $0x3d0] sm:$0xff]  ;;  %v1624_v61 = vld [vmem:[#allocation4 + $0x3a0] sm:$0xff] }
 0x1cc   : > { %2883 = vmatprep.subr.mxu0 %v1517_v60  ;;  %2833 = vmatpush2.msra.mxu1 %v2414_v1  ;;  %v773_v60 = vrot.slane %v731_v49, %v4912_v8  ;;  %v1493_v1 = vpop.f32.mrf.mxu1  ;;  %v1949_v49 = vld [vmem:[#allocation4 + $0xdc8] sm:$0xff] }
 0x1cd   : > { %2884 = vmatpush1.msra.mxu0 %v1516_v62  ;;  %2834 = vmatprep.subr.mxu1 %v2409_v5 }
 0x1ce   : > { %2885 = vmatprep.subr.mxu0 %v1511_v3  ;;  %2835 = vmatpush2.msra.mxu1 %v2408_v9  ;;  %v1619_v3 = vld [vmem:[#allocation4 + $0x378] sm:$0xff] }
 0x1cf   : > { %2886 = vmatpush1.msra.mxu0 %v1510_v7  ;;  %2836 = vmatprep.subr.mxu1 %v2403_v12  ;;  %v1618_v7 = vld [vmem:[#allocation4 + $0x370] sm:$0xff] }
 0x1d0   : > { %2887 = vmatprep.subr.mxu0 %v1697_v11  ;;  %2837 = vmatpush2.msra.mxu1 %v2402_v14  ;;  %v1613_v11 = vld [vmem:[#allocation4 + $0x348] sm:$0xff] }
 0x1d1   : > { %2888 = vmatpush2.msra.mxu0 %v1696_v13  ;;  %2838 = vmatprep.subr.mxu1 %v2397_v16  ;;  %v1612_v13 = vld [vmem:[#allocation4 + $0x340] sm:$0xff]  ;;  %v1607_v16 = vld [vmem:[#allocation4 + $0x318] sm:$0xff] }
 0x1d2   : > { %2889 = vmatprep.subr.mxu0 %v1691_v15  ;;  %2839 = vmatpush2.msra.mxu1 %v2396_v18  ;;  %v1495_v15 = vpop.f32.mrf.mxu1  ;;  %v1606_v18 = vld [vmem:[#allocation4 + $0x310] sm:$0xff] }
 0x1d3   : > { %2890 = vmatpush2.msra.mxu0 %v1690_v17  ;;  %2840 = vmatprep.subr.mxu1 %v2391_v20  ;;  %v1985_v20 = vld [vmem:[#allocation4 + $0xee8] sm:$0xff] }
 0x1d4   : > { %2891 = vmatprep.subr.mxu0 %v1685_v19  ;;  %2841 = vmatpush2.msra.mxu1 %v2390_v22  ;;  %v1792_v22 = vld [vmem:[#allocation4 + $0x8e0] sm:$0xff] }
 0x1d5   : > { %2892 = vmatpush2.msra.mxu0 %v1684_v21  ;;  %2842 = vmatprep.subr.mxu1 %v2385_v24  ;;  %v1787_v24 = vld [vmem:[#allocation4 + $0x8b8] sm:$0xff] }
 0x1d6   : > { %2893 = vmatprep.subr.mxu0 %v1679_v23  ;;  %2843 = vmatpush2.msra.mxu1 %v2384_v27  ;;  %v1984_v23 = vld [vmem:[#allocation4 + $0xee0] sm:$0xff]  ;;  %v1786_v27 = vld [vmem:[#allocation4 + $0x8b0] sm:$0xff] }
 0x1d7   : > { %2894 = vmatpush2.msra.mxu0 %v1678_v26  ;;  %2844 = vmatprep.subr.mxu1 %v2379_v32  ;;  %v1979_v26 = vld [vmem:[#allocation4 + $0xeb8] sm:$0xff]  ;;  %v1781_v32 = vld [vmem:[#allocation4 + $0x888] sm:$0xff] }
 0x1d8   : > { %2895 = vmatprep.subr.mxu0 %v1673_v29  ;;  %2845 = vmatpush2.msra.mxu1 %v2378_v34  ;;  %v1978_v29 = vld [vmem:[#allocation4 + $0xeb0] sm:$0xff]  ;;  %v1780_v34 = vld [vmem:[#allocation4 + $0x880] sm:$0xff] }
 0x1d9   : > { %2896 = vmatpush2.msra.mxu0 %v1672_v33  ;;  %2846 = vmatprep.subr.mxu1 %v2373_v36  ;;  %v1973_v33 = vld [vmem:[#allocation4 + $0xe88] sm:$0xff]  ;;  %v1775_v36 = vld [vmem:[#allocation4 + $0x858] sm:$0xff] }
 0x1da   : > { %2897 = vmatprep.subr.mxu0 %v1667_v35  ;;  %2847 = vmatpush2.msra.mxu1 %v2372_v38  ;;  %v1972_v35 = vld [vmem:[#allocation4 + $0xe80] sm:$0xff]  ;;  %v1774_v38 = vld [vmem:[#allocation4 + $0x850] sm:$0xff] }
 0x1db   : > { %2898 = vmatpush2.msra.mxu0 %v1666_v37  ;;  %2926 = vmatprep.subr.mxu1 %v1793_v4  ;;  %v1967_v37 = vld [vmem:[#allocation4 + $0xe58] sm:$0xff]  ;;  %v1769_v4 = vld [vmem:[#allocation4 + $0x828] sm:$0xff] }
 0x1dc   : > { %2899 = vmatprep.subr.mxu0 %v1661_v40  ;;  %v1966_v40 = vld [vmem:[#allocation4 + $0xe50] sm:$0xff] }
 0x1dd   : > { %2900 = vmatpush2.msra.mxu0 %v1660_v42  ;;  %v1961_v42 = vld [vmem:[#allocation4 + $0xe28] sm:$0xff] }
 0x1de   : > { %2901 = vmatprep.subr.mxu0 %v1655_v43  ;;  %v1768_v43 = vld [vmem:[#allocation4 + $0x820] sm:$0xff] }
 0x1df   : > { %2902 = vmatpush2.msra.mxu0 %v1654_v6  ;;  %v1960_v6 = vld [vmem:[#allocation4 + $0xe20] sm:$0xff] }
 0x1e0   : > { %2903 = vmatprep.subr.mxu0 %v1649_v2  ;;  %v1763_v2 = vld [vmem:[#allocation4 + $0x7f8] sm:$0xff] }
 0x1e1   : > { %2904 = vmatpush2.msra.mxu0 %v1648_v44  ;;  %v1955_v44 = vld [vmem:[#allocation4 + $0xdf8] sm:$0xff] }
 0x1e2   : > { %2905 = vmatprep.subr.mxu0 %v1643_v45  ;;  %v1762_v45 = vld [vmem:[#allocation4 + $0x7f0] sm:$0xff] }
 0x1e3   : > { %2906 = vmatpush2.msra.mxu0 %v1642_v46  ;;  %v1954_v46 = vld [vmem:[#allocation4 + $0xdf0] sm:$0xff] }
 0x1e4   : > { %2907 = vmatprep.subr.mxu0 %v1637_v47  ;;  %v1757_v47 = vld [vmem:[#allocation4 + $0x7c8] sm:$0xff] }
 0x1e5   : > { %2908 = vmatpush2.msra.mxu0 %v1636_v51  ;;  %v1756_v51 = vld [vmem:[#allocation4 + $0x7c0] sm:$0xff] }
 0x1e6   : > { %2909 = vmatprep.subr.mxu0 %v1631_v52  ;;  %v1948_v52 = vld [vmem:[#allocation4 + $0xdc0] sm:$0xff] }
 0x1e7   : > { %v1422_v62 = vpop.f32.mrf.mxu0  ;;  %2910 = vmatpush2.msra.mxu0 %v1630_v57  ;;  %v1943_v57 = vld [vmem:[#allocation4 + $0xd98] sm:$0xff] }
 0x1e8   : > { %v1423_v5 = vadd.f32 %v1422_v62, %v769_v55  ;;  %2911 = vmatprep.subr.mxu0 %v1625_v59  ;;  %v1751_v55 = vld [vmem:[#allocation4 + $0x798] sm:$0xff]  ;;  %v1750_v59 = vld [vmem:[#allocation4 + $0x790] sm:$0xff]  ;;  %v1937_v62 = vld [vmem:[#allocation4 + $0xd68] sm:$0xff] }
 0x1e9   : > { %v1424_v9 = vpop.f32.mrf.mxu0  ;;  %2912 = vmatpush2.msra.mxu0 %v1624_v61  ;;  %v1745_v61 = vld [vmem:[#allocation4 + $0x768] sm:$0xff] }
 0x1ea   : > { %v1425_v12 = vadd.f32 %v1424_v9, %v773_v60  ;;  %2913 = vmatprep.subr.mxu0 %v1619_v3  ;;  %v1494_v14 = vadd.f32 %v1493_v1, %v1423_v5  ;;  %v1942_v60 = vld [vmem:[#allocation4 + $0xd90] sm:$0xff]  ;;  %v1744_v1 = vld [vmem:[#allocation4 + $0x760] sm:$0xff]  ;;  %v1739_v5 = vld [vmem:[#allocation4 + $0x738] sm:$0xff] }
 0x1eb   : > { %2914 = vmatpush2.msra.mxu0 %v1618_v7  ;;  %v1936_v3 = vld [vmem:[#allocation4 + $0xd60] sm:$0xff]  ;;  %v1931_v7 = vld [vmem:[#allocation4 + $0xd38] sm:$0xff]  ;;  %v1738_v9 = vld [vmem:[#allocation4 + $0x730] sm:$0xff] }
 0x1ec   : > { %v1496_v17 = vadd.f32 %v1495_v15, %v1425_v12  ;;  %2915 = vmatprep.subr.mxu0 %v1613_v11  ;;  %v4973_v21 = vmax.f32 %v1494_v14, 0.0  ;;  %v1930_v11 = vld [vmem:[#allocation4 + $0xd30] sm:$0xff]  ;;  %v1733_v12 = vld [vmem:[#allocation4 + $0x708] sm:$0xff]  ;;  %v1732_v14 = vld [vmem:[#allocation4 + $0x700] sm:$0xff] }
 0x1ed   : > { %2916 = vmatpush2.msra.mxu0 %v1612_v13  ;;  %v1925_v13 = vld [vmem:[#allocation4 + $0xd08] sm:$0xff]  ;;  %v1924_v15 = vld [vmem:[#allocation4 + $0xd00] sm:$0xff] }
 0x1ee   : > { %v4971_v19 = vmax.f32 %v1496_v17, 0.0  ;;  %2917 = vmatprep.subr.mxu0 %v1607_v16  ;;  %v1727_v16 = vld [vmem:[#allocation4 + $0x6d8] sm:$0xff] }
 0x1ef   : > { %2918 = vmatpush2.msra.mxu0 %v1606_v18  ;;  %v1919_v17 = vld [vmem:[#allocation4 + $0xcd8] sm:$0xff]  ;;  %v1726_v18 = vld [vmem:[#allocation4 + $0x6d0] sm:$0xff] }
 0x1f0   : > { %2848 = vmatprep.mubr.f32.mxu1 %v4971_v19  ;;  %2920 = vmatmul.mubr.f32.vlgmr.msra.gmra.mxu0 %v4920_v41 }
 0x1f1   : > { %2997 = vmatprep.subr.mxu0 %v1985_v20  ;;  %2849 = vmatmul.mubr.f32.vlgmr.msra.gmra.mxu1 %v4973_v21  ;;  %v1918_v20 = vld [vmem:[#allocation4 + $0xcd0] sm:$0xff] }
 0x1f2   : > { %2927 = vmatpush1.msra.mxu1 %v1792_v22  ;;  %2998 = vmatpush1.msra.mxu0 %v1984_v23  ;;  %v1721_v22 = vld [vmem:[#allocation4 + $0x6a8] sm:$0xff] }
 0x1f3   : > { %3061 = vmatprep.mubr.f32.mxu0 %v4952_v53  ;;  %2928 = vmatprep.subr.mxu1 %v1787_v24  ;;  %v1913_v23 = vld [vmem:[#allocation4 + $0xca8] sm:$0xff]  ;;  %v1720_v24 = vld [vmem:[#allocation4 + $0x6a0] sm:$0xff] }
 0x1f4   : > { %2990 = vmatprep.mubr.f32.mxu1 %v4933_v31  ;;  %2999 = vmatprep.subr.mxu0 %v1979_v26  ;;  %v1912_v26 = vld [vmem:[#allocation4 + $0xca0] sm:$0xff] }
 0x1f5   : > { %2929 = vmatpush1.msra.mxu1 %v1786_v27  ;;  %3000 = vmatpush1.msra.mxu0 %v1978_v29  ;;  %v1715_v27 = vld [vmem:[#allocation4 + $0x678] sm:$0xff] }
 0x1f6   : > { %2930 = vmatprep.subr.mxu1 %v1781_v32  ;;  %3001 = vmatprep.subr.mxu0 %v1973_v33  ;;  %v1907_v29 = vld [vmem:[#allocation4 + $0xc78] sm:$0xff]  ;;  %v1714_v32 = vld [vmem:[#allocation4 + $0x670] sm:$0xff] }
 0x1f7   : > { %2931 = vmatpush1.msra.mxu1 %v1780_v34  ;;  %3002 = vmatpush1.msra.mxu0 %v1972_v35  ;;  %v1906_v33 = vld [vmem:[#allocation4 + $0xc70] sm:$0xff]  ;;  %v1709_v34 = vld [vmem:[#allocation4 + $0x648] sm:$0xff] }
 0x1f8   : > { %2932 = vmatprep.subr.mxu1 %v1775_v36  ;;  %3003 = vmatprep.subr.mxu0 %v1967_v37  ;;  %v1901_v35 = vld [vmem:[#allocation4 + $0xc48] sm:$0xff]  ;;  %v1708_v36 = vld [vmem:[#allocation4 + $0x640] sm:$0xff] }
 0x1f9   : > { %2933 = vmatpush1.msra.mxu1 %v1774_v38  ;;  %3004 = vmatpush1.msra.mxu0 %v1966_v40  ;;  %v1900_v37 = vld [vmem:[#allocation4 + $0xc40] sm:$0xff]  ;;  %v1703_v38 = vld [vmem:[#allocation4 + $0x618] sm:$0xff] }
 0x1fa   : > { %2934 = vmatprep.subr.mxu1 %v1769_v4  ;;  %3005 = vmatprep.subr.mxu0 %v1961_v42  ;;  %v1895_v40 = vld [vmem:[#allocation4 + $0xc18] sm:$0xff]  ;;  %v1702_v4 = vld [vmem:[#allocation4 + $0x610] sm:$0xff] }
 0x1fb   : > { %2935 = vmatpush1.msra.mxu1 %v1768_v43  ;;  %3006 = vmatpush1.msra.mxu0 %v1960_v6  ;;  %v1894_v42 = vld [vmem:[#allocation4 + $0xc10] sm:$0xff]  ;;  %v1889_v43 = vld [vmem:[#allocation4 + $0xbe8] sm:$0xff] }
 0x1fc   : > { %2936 = vmatprep.subr.mxu1 %v1763_v2  ;;  %3007 = vmatprep.subr.mxu0 %v1955_v44  ;;  %v2081_v6 = vld [vmem:[#allocation4 + $0x11e8] sm:$0xff]  ;;  %v1888_v2 = vld [vmem:[#allocation4 + $0xbe0] sm:$0xff] }
 0x1fd   : > { %2937 = vmatpush1.msra.mxu1 %v1762_v45  ;;  %3008 = vmatpush1.msra.mxu0 %v1954_v46  ;;  %v2080_v44 = vld [vmem:[#allocation4 + $0x11e0] sm:$0xff]  ;;  %v1883_v45 = vld [vmem:[#allocation4 + $0xbb8] sm:$0xff] }
 0x1fe   : > { %2938 = vmatprep.subr.mxu1 %v1757_v47  ;;  %3009 = vmatprep.subr.mxu0 %v1949_v49  ;;  %v2075_v46 = vld [vmem:[#allocation4 + $0x11b8] sm:$0xff]  ;;  %v1882_v47 = vld [vmem:[#allocation4 + $0xbb0] sm:$0xff] }
 0x1ff   : > { %2939 = vmatpush1.msra.mxu1 %v1756_v51  ;;  %3010 = vmatpush1.msra.mxu0 %v1948_v52  ;;  %v2074_v49 = vld [vmem:[#allocation4 + $0x11b0] sm:$0xff]  ;;  %v1877_v51 = vld [vmem:[#allocation4 + $0xb88] sm:$0xff] }
 0x200   : > { %2940 = vmatprep.subr.mxu1 %v1751_v55  ;;  %3011 = vmatprep.subr.mxu0 %v1943_v57  ;;  %v2069_v52 = vld [vmem:[#allocation4 + $0x1188] sm:$0xff]  ;;  %v1876_v55 = vld [vmem:[#allocation4 + $0xb80] sm:$0xff] }
 0x201   : > { %2941 = vmatpush1.msra.mxu1 %v1750_v59  ;;  %3012 = vmatpush1.msra.mxu0 %v1942_v60  ;;  %v2068_v57 = vld [vmem:[#allocation4 + $0x1180] sm:$0xff]  ;;  %v1871_v59 = vld [vmem:[#allocation4 + $0xb58] sm:$0xff] }
 0x202   : > { %2942 = vmatprep.subr.mxu1 %v1745_v61  ;;  %3013 = vmatprep.subr.mxu0 %v1937_v62  ;;  %v2063_v60 = vld [vmem:[#allocation4 + $0x1158] sm:$0xff]  ;;  %v1870_v61 = vld [vmem:[#allocation4 + $0xb50] sm:$0xff] }
 0x203   : > { %2943 = vmatpush1.msra.mxu1 %v1744_v1  ;;  %3014 = vmatpush1.msra.mxu0 %v1936_v3  ;;  %v2062_v62 = vld [vmem:[#allocation4 + $0x1150] sm:$0xff]  ;;  %v1865_v1 = vld [vmem:[#allocation4 + $0xb28] sm:$0xff] }
 0x204   : > { %2944 = vmatprep.subr.mxu1 %v1739_v5  ;;  %3015 = vmatprep.subr.mxu0 %v1931_v7  ;;  %v2057_v3 = vld [vmem:[#allocation4 + $0x1128] sm:$0xff]  ;;  %v1864_v5 = vld [vmem:[#allocation4 + $0xb20] sm:$0xff] }
 0x205   : > { %2945 = vmatpush1.msra.mxu1 %v1738_v9  ;;  %3016 = vmatpush1.msra.mxu0 %v1930_v11  ;;  %v2056_v7 = vld [vmem:[#allocation4 + $0x1120] sm:$0xff]  ;;  %v1859_v9 = vld [vmem:[#allocation4 + $0xaf8] sm:$0xff] }
 0x206   : > { %2946 = vmatprep.subr.mxu1 %v1733_v12  ;;  %3017 = vmatprep.subr.mxu0 %v1925_v13  ;;  %v2051_v11 = vld [vmem:[#allocation4 + $0x10f8] sm:$0xff]  ;;  %v1858_v12 = vld [vmem:[#allocation4 + $0xaf0] sm:$0xff] }
 0x207   : > { %2947 = vmatpush1.msra.mxu1 %v1732_v14  ;;  %3018 = vmatpush1.msra.mxu0 %v1924_v15  ;;  %v2050_v13 = vld [vmem:[#allocation4 + $0x10f0] sm:$0xff]  ;;  %v1853_v14 = vld [vmem:[#allocation4 + $0xac8] sm:$0xff] }
 0x208   : > { %2948 = vmatprep.subr.mxu1 %v1727_v16  ;;  %3019 = vmatprep.subr.mxu0 %v1919_v17  ;;  %v2045_v15 = vld [vmem:[#allocation4 + $0x10c8] sm:$0xff]  ;;  %v1852_v16 = vld [vmem:[#allocation4 + $0xac0] sm:$0xff] }
 0x209   : > { %2949 = vmatpush1.msra.mxu1 %v1726_v18  ;;  %3020 = vmatpush1.msra.mxu0 %v1918_v20  ;;  %v2044_v17 = vld [vmem:[#allocation4 + $0x10c0] sm:$0xff]  ;;  %v1847_v18 = vld [vmem:[#allocation4 + $0xa98] sm:$0xff] }
 0x20a   : > { %2950 = vmatprep.subr.mxu1 %v1721_v22  ;;  %3021 = vmatprep.subr.mxu0 %v1913_v23  ;;  %v2039_v20 = vld [vmem:[#allocation4 + $0x1098] sm:$0xff]  ;;  %v1846_v22 = vld [vmem:[#allocation4 + $0xa90] sm:$0xff] }
 0x20b   : > { %2951 = vmatpush1.msra.mxu1 %v1720_v24  ;;  %3022 = vmatpush1.msra.mxu0 %v1912_v26  ;;  %v2038_v23 = vld [vmem:[#allocation4 + $0x1090] sm:$0xff]  ;;  %v1841_v24 = vld [vmem:[#allocation4 + $0xa68] sm:$0xff] }
 0x20c   : > { %2952 = vmatprep.subr.mxu1 %v1715_v27  ;;  %3023 = vmatprep.subr.mxu0 %v1907_v29  ;;  %v2033_v26 = vld [vmem:[#allocation4 + $0x1068] sm:$0xff]  ;;  %v1840_v27 = vld [vmem:[#allocation4 + $0xa60] sm:$0xff] }
 0x20d   : > { %2953 = vmatpush1.msra.mxu1 %v1714_v32  ;;  %3024 = vmatpush1.msra.mxu0 %v1906_v33  ;;  %v2032_v29 = vld [vmem:[#allocation4 + $0x1060] sm:$0xff]  ;;  %v1835_v32 = vld [vmem:[#allocation4 + $0xa38] sm:$0xff] }
 0x20e   : > { %2954 = vmatprep.subr.mxu1 %v1709_v34  ;;  %3025 = vmatprep.subr.mxu0 %v1901_v35  ;;  %v2027_v33 = vld [vmem:[#allocation4 + $0x1038] sm:$0xff]  ;;  %v1834_v34 = vld [vmem:[#allocation4 + $0xa30] sm:$0xff] }
 0x20f   : > { %2955 = vmatpush1.msra.mxu1 %v1708_v36  ;;  %3026 = vmatpush1.msra.mxu0 %v1900_v37  ;;  %v2026_v35 = vld [vmem:[#allocation4 + $0x1030] sm:$0xff]  ;;  %v1829_v36 = vld [vmem:[#allocation4 + $0xa08] sm:$0xff] }
 0x210   : > { %2956 = vmatprep.subr.mxu1 %v1703_v38  ;;  %3027 = vmatprep.subr.mxu0 %v1895_v40  ;;  %v2021_v37 = vld [vmem:[#allocation4 + $0x1008] sm:$0xff]  ;;  %v1828_v38 = vld [vmem:[#allocation4 + $0xa00] sm:$0xff] }
 0x211   : > { %2957 = vmatpush1.msra.mxu1 %v1702_v4  ;;  %3028 = vmatpush1.msra.mxu0 %v1894_v42  ;;  %v2020_v40 = vld [vmem:[#allocation4 + $0x1000] sm:$0xff]  ;;  %v1823_v4 = vld [vmem:[#allocation4 + $0x9d8] sm:$0xff] }
 0x212   : > { %2958 = vmatprep.subr.mxu1 %v1889_v43  ;;  %3029 = vmatprep.subr.mxu0 %v2081_v6  ;;  %v2015_v42 = vld [vmem:[#allocation4 + $0xfd8] sm:$0xff]  ;;  %v1822_v43 = vld [vmem:[#allocation4 + $0x9d0] sm:$0xff] }
 0x213   : > { %2959 = vmatpush2.msra.mxu1 %v1888_v2  ;;  %3030 = vmatpush2.msra.mxu0 %v2080_v44  ;;  %v2014_v6 = vld [vmem:[#allocation4 + $0xfd0] sm:$0xff]  ;;  %v1817_v2 = vld [vmem:[#allocation4 + $0x9a8] sm:$0xff] }
 0x214   : > { %2960 = vmatprep.subr.mxu1 %v1883_v45  ;;  %3031 = vmatprep.subr.mxu0 %v2075_v46  ;;  %v2009_v44 = vld [vmem:[#allocation4 + $0xfa8] sm:$0xff]  ;;  %v1816_v45 = vld [vmem:[#allocation4 + $0x9a0] sm:$0xff] }
 0x215   : > { %2961 = vmatpush2.msra.mxu1 %v1882_v47  ;;  %3032 = vmatpush2.msra.mxu0 %v2074_v49  ;;  %v2008_v46 = vld [vmem:[#allocation4 + $0xfa0] sm:$0xff]  ;;  %v1811_v47 = vld [vmem:[#allocation4 + $0x978] sm:$0xff] }
 0x216   : > { %2962 = vmatprep.subr.mxu1 %v1877_v51  ;;  %3033 = vmatprep.subr.mxu0 %v2069_v52  ;;  %v2003_v49 = vld [vmem:[#allocation4 + $0xf78] sm:$0xff]  ;;  %v1810_v51 = vld [vmem:[#allocation4 + $0x970] sm:$0xff] }
 0x217   : > { %2963 = vmatpush2.msra.mxu1 %v1876_v55  ;;  %3034 = vmatpush2.msra.mxu0 %v2068_v57  ;;  %v2002_v52 = vld [vmem:[#allocation4 + $0xf70] sm:$0xff]  ;;  %v1805_v55 = vld [vmem:[#allocation4 + $0x948] sm:$0xff] }
 0x218   : > { %2964 = vmatprep.subr.mxu1 %v1871_v59  ;;  %3035 = vmatprep.subr.mxu0 %v2063_v60  ;;  %v1997_v57 = vld [vmem:[#allocation4 + $0xf48] sm:$0xff]  ;;  %v1804_v59 = vld [vmem:[#allocation4 + $0x940] sm:$0xff] }
 0x219   : > { %2965 = vmatpush2.msra.mxu1 %v1870_v61  ;;  %3036 = vmatpush2.msra.mxu0 %v2062_v62  ;;  %v1996_v60 = vld [vmem:[#allocation4 + $0xf40] sm:$0xff]  ;;  %v1799_v61 = vld [vmem:[#allocation4 + $0x918] sm:$0xff] }
 0x21a   : > { %2966 = vmatprep.subr.mxu1 %v1865_v1  ;;  %3037 = vmatprep.subr.mxu0 %v2057_v3  ;;  %v1991_v62 = vld [vmem:[#allocation4 + $0xf18] sm:$0xff]  ;;  %v1798_v1 = vld [vmem:[#allocation4 + $0x910] sm:$0xff] }
 0x21b   : > { %2967 = vmatpush2.msra.mxu1 %v1864_v5  ;;  %3038 = vmatpush2.msra.mxu0 %v2056_v7  ;;  %v1990_v3 = vld [vmem:[#allocation4 + $0xf10] sm:$0xff]  ;;  %v2177_v5 = vld [vmem:[#allocation4 + $0x14e8] sm:$0xff] }
 0x21c   : > { %2968 = vmatprep.subr.mxu1 %v1859_v9  ;;  %3039 = vmatprep.subr.mxu0 %v2051_v11  ;;  %v2369_v7 = vld [vmem:[#allocation4 + $0x1ae8] sm:$0xff]  ;;  %v2176_v9 = vld [vmem:[#allocation4 + $0x14e0] sm:$0xff] }
 0x21d   : > { %2969 = vmatpush2.msra.mxu1 %v1858_v12  ;;  %3040 = vmatpush2.msra.mxu0 %v2050_v13  ;;  %v2368_v11 = vld [vmem:[#allocation4 + $0x1ae0] sm:$0xff]  ;;  %v2171_v12 = vld [vmem:[#allocation4 + $0x14b8] sm:$0xff] }
 0x21e   : > { %2970 = vmatprep.subr.mxu1 %v1853_v14  ;;  %3041 = vmatprep.subr.mxu0 %v2045_v15  ;;  %v2363_v13 = vld [vmem:[#allocation4 + $0x1ab8] sm:$0xff]  ;;  %v2170_v14 = vld [vmem:[#allocation4 + $0x14b0] sm:$0xff] }
 0x21f   : > { %2971 = vmatpush2.msra.mxu1 %v1852_v16  ;;  %3042 = vmatpush2.msra.mxu0 %v2044_v17  ;;  %v2362_v15 = vld [vmem:[#allocation4 + $0x1ab0] sm:$0xff]  ;;  %v2165_v16 = vld [vmem:[#allocation4 + $0x1488] sm:$0xff] }
 0x220   : > { %2972 = vmatprep.subr.mxu1 %v1847_v18  ;;  %3043 = vmatprep.subr.mxu0 %v2039_v20  ;;  %v2357_v17 = vld [vmem:[#allocation4 + $0x1a88] sm:$0xff]  ;;  %v2164_v18 = vld [vmem:[#allocation4 + $0x1480] sm:$0xff] }
 0x221   : > { %2973 = vmatpush2.msra.mxu1 %v1846_v22  ;;  %3044 = vmatpush2.msra.mxu0 %v2038_v23  ;;  %v2356_v20 = vld [vmem:[#allocation4 + $0x1a80] sm:$0xff]  ;;  %v2159_v22 = vld [vmem:[#allocation4 + $0x1458] sm:$0xff] }
 0x222   : > { %2974 = vmatprep.subr.mxu1 %v1841_v24  ;;  %3045 = vmatprep.subr.mxu0 %v2033_v26  ;;  %v2351_v23 = vld [vmem:[#allocation4 + $0x1a58] sm:$0xff]  ;;  %v2158_v24 = vld [vmem:[#allocation4 + $0x1450] sm:$0xff] }
 0x223   : > { %2975 = vmatpush2.msra.mxu1 %v1840_v27  ;;  %3046 = vmatpush2.msra.mxu0 %v2032_v29  ;;  %v2350_v26 = vld [vmem:[#allocation4 + $0x1a50] sm:$0xff]  ;;  %v2153_v27 = vld [vmem:[#allocation4 + $0x1428] sm:$0xff] }
 0x224   : > { %2976 = vmatprep.subr.mxu1 %v1835_v32  ;;  %3047 = vmatprep.subr.mxu0 %v2027_v33  ;;  %v2345_v29 = vld [vmem:[#allocation4 + $0x1a28] sm:$0xff]  ;;  %v2152_v32 = vld [vmem:[#allocation4 + $0x1420] sm:$0xff] }
 0x225   : > { %2977 = vmatpush2.msra.mxu1 %v1834_v34  ;;  %3048 = vmatpush2.msra.mxu0 %v2026_v35  ;;  %v2344_v33 = vld [vmem:[#allocation4 + $0x1a20] sm:$0xff]  ;;  %v2147_v34 = vld [vmem:[#allocation4 + $0x13f8] sm:$0xff] }
 0x226   : > { %2978 = vmatprep.subr.mxu1 %v1829_v36  ;;  %3049 = vmatprep.subr.mxu0 %v2021_v37  ;;  %v2339_v35 = vld [vmem:[#allocation4 + $0x19f8] sm:$0xff]  ;;  %v2146_v36 = vld [vmem:[#allocation4 + $0x13f0] sm:$0xff] }
 0x227   : > { %2979 = vmatpush2.msra.mxu1 %v1828_v38  ;;  %3050 = vmatpush2.msra.mxu0 %v2020_v40  ;;  %v2338_v37 = vld [vmem:[#allocation4 + $0x19f0] sm:$0xff]  ;;  %v2141_v38 = vld [vmem:[#allocation4 + $0x13c8] sm:$0xff] }
 0x228   : > { %2980 = vmatprep.subr.mxu1 %v1823_v4  ;;  %3051 = vmatprep.subr.mxu0 %v2015_v42  ;;  %v2333_v40 = vld [vmem:[#allocation4 + $0x19c8] sm:$0xff]  ;;  %v2140_v4 = vld [vmem:[#allocation4 + $0x13c0] sm:$0xff] }
 0x229   : > { %2981 = vmatpush2.msra.mxu1 %v1822_v43  ;;  %3052 = vmatpush2.msra.mxu0 %v2014_v6  ;;  %v2332_v42 = vld [vmem:[#allocation4 + $0x19c0] sm:$0xff]  ;;  %v2135_v43 = vld [vmem:[#allocation4 + $0x1398] sm:$0xff] }
 0x22a   : > { %2982 = vmatprep.subr.mxu1 %v1817_v2  ;;  %3053 = vmatprep.subr.mxu0 %v2009_v44  ;;  %v2327_v6 = vld [vmem:[#allocation4 + $0x1998] sm:$0xff]  ;;  %v2134_v2 = vld [vmem:[#allocation4 + $0x1390] sm:$0xff] }
 0x22b   : > { %2983 = vmatpush2.msra.mxu1 %v1816_v45  ;;  %3054 = vmatpush2.msra.mxu0 %v2008_v46  ;;  %v2326_v44 = vld [vmem:[#allocation4 + $0x1990] sm:$0xff]  ;;  %v2129_v45 = vld [vmem:[#allocation4 + $0x1368] sm:$0xff] }
 0x22c   : > { %2984 = vmatprep.subr.mxu1 %v1811_v47  ;;  %3055 = vmatprep.subr.mxu0 %v2003_v49  ;;  %v2321_v46 = vld [vmem:[#allocation4 + $0x1968] sm:$0xff]  ;;  %v2128_v47 = vld [vmem:[#allocation4 + $0x1360] sm:$0xff] }
 0x22d   : > { %2985 = vmatpush2.msra.mxu1 %v1810_v51  ;;  %3056 = vmatpush2.msra.mxu0 %v2002_v52  ;;  %v2320_v49 = vld [vmem:[#allocation4 + $0x1960] sm:$0xff]  ;;  %v2123_v51 = vld [vmem:[#allocation4 + $0x1338] sm:$0xff] }
 0x22e   : > { %2986 = vmatprep.subr.mxu1 %v1805_v55  ;;  %3057 = vmatprep.subr.mxu0 %v1997_v57  ;;  %v2315_v52 = vld [vmem:[#allocation4 + $0x1938] sm:$0xff]  ;;  %v2122_v55 = vld [vmem:[#allocation4 + $0x1330] sm:$0xff] }
 0x22f   : > { %2987 = vmatpush2.msra.mxu1 %v1804_v59  ;;  %3058 = vmatpush2.msra.mxu0 %v1996_v60  ;;  %v2314_v57 = vld [vmem:[#allocation4 + $0x1930] sm:$0xff]  ;;  %v2117_v59 = vld [vmem:[#allocation4 + $0x1308] sm:$0xff] }
 0x230   : > { %2988 = vmatprep.subr.mxu1 %v1799_v61  ;;  %3059 = vmatprep.subr.mxu0 %v1991_v62  ;;  %v2309_v60 = vld [vmem:[#allocation4 + $0x1908] sm:$0xff]  ;;  %v2116_v61 = vld [vmem:[#allocation4 + $0x1300] sm:$0xff] }
 0x231   : > { %2989 = vmatpush2.msra.mxu1 %v1798_v1  ;;  %3060 = vmatpush2.msra.mxu0 %v1990_v3  ;;  %v2308_v62 = vld [vmem:[#allocation4 + $0x1900] sm:$0xff]  ;;  %v2111_v1 = vld [vmem:[#allocation4 + $0x12d8] sm:$0xff] }
 0x232   : > { %2991 = vmatmul.mubr.f32.vlgmr.msra.gmra.mxu1 %v4941_v10  ;;  %3062 = vmatmul.mubr.f32.vlgmr.msra.gmra.mxu0 %v4954_v56  ;;  %v2303_v3 = vld [vmem:[#allocation4 + $0x18d8] sm:$0xff] }
 0x233   : > { %3068 = vmatprep.subr.mxu1 %v2177_v5  ;;  %3139 = vmatprep.subr.mxu0 %v2369_v7  ;;  %v2110_v5 = vld [vmem:[#allocation4 + $0x12d0] sm:$0xff] }
 0x234   : > { %3069 = vmatpush1.msra.mxu1 %v2176_v9  ;;  %3132 = vmatprep.mubr.f32.mxu1 %v4962_v48  ;;  %v2302_v7 = vld [vmem:[#allocation4 + $0x18d0] sm:$0xff]  ;;  %v2105_v9 = vld [vmem:[#allocation4 + $0x12a8] sm:$0xff] }
 0x235   : > { %3140 = vmatpush1.msra.mxu0 %v2368_v11  ;;  %3203 = vmatprep.mubr.f32.mxu0 %v4971_v19  ;;  %v2297_v11 = vld [vmem:[#allocation4 + $0x18a8] sm:$0xff] }
 0x236   : > { %3070 = vmatprep.subr.mxu1 %v2171_v12  ;;  %3141 = vmatprep.subr.mxu0 %v2363_v13  ;;  %v2104_v12 = vld [vmem:[#allocation4 + $0x12a0] sm:$0xff] }
 0x237   : > { %3071 = vmatpush1.msra.mxu1 %v2170_v14  ;;  %3142 = vmatpush1.msra.mxu0 %v2362_v15  ;;  %v2296_v13 = vld [vmem:[#allocation4 + $0x18a0] sm:$0xff]  ;;  %v2099_v14 = vld [vmem:[#allocation4 + $0x1278] sm:$0xff] }
 0x238   : > { %3072 = vmatprep.subr.mxu1 %v2165_v16  ;;  %3143 = vmatprep.subr.mxu0 %v2357_v17  ;;  %v2291_v15 = vld [vmem:[#allocation4 + $0x1878] sm:$0xff]  ;;  %v2098_v16 = vld [vmem:[#allocation4 + $0x1270] sm:$0xff] }
 0x239   : > { %3073 = vmatpush1.msra.mxu1 %v2164_v18  ;;  %3144 = vmatpush1.msra.mxu0 %v2356_v20  ;;  %v2290_v17 = vld [vmem:[#allocation4 + $0x1870] sm:$0xff]  ;;  %v2093_v18 = vld [vmem:[#allocation4 + $0x1248] sm:$0xff] }
 0x23a   : > { %3074 = vmatprep.subr.mxu1 %v2159_v22  ;;  %3145 = vmatprep.subr.mxu0 %v2351_v23  ;;  %v2285_v20 = vld [vmem:[#allocation4 + $0x1848] sm:$0xff]  ;;  %v2092_v22 = vld [vmem:[#allocation4 + $0x1240] sm:$0xff] }
 0x23b   : > { %3075 = vmatpush1.msra.mxu1 %v2158_v24  ;;  %3146 = vmatpush1.msra.mxu0 %v2350_v26  ;;  %v2284_v23 = vld [vmem:[#allocation4 + $0x1840] sm:$0xff]  ;;  %v2087_v24 = vld [vmem:[#allocation4 + $0x1218] sm:$0xff] }
 0x23c   : > { %3076 = vmatprep.subr.mxu1 %v2153_v27  ;;  %3147 = vmatprep.subr.mxu0 %v2345_v29  ;;  %v2279_v26 = vld [vmem:[#allocation4 + $0x1818] sm:$0xff]  ;;  %v2086_v27 = vld [vmem:[#allocation4 + $0x1210] sm:$0xff] }
 0x23d   : > { %3077 = vmatpush1.msra.mxu1 %v2152_v32  ;;  %3148 = vmatpush1.msra.mxu0 %v2344_v33  ;;  %v2278_v29 = vld [vmem:[#allocation4 + $0x1810] sm:$0xff]  ;;  %v2273_v32 = vld [vmem:[#allocation4 + $0x17e8] sm:$0xff] }
 0x23e   : > { %3078 = vmatprep.subr.mxu1 %v2147_v34  ;;  %3149 = vmatprep.subr.mxu0 %v2339_v35  ;;  %v2465_v33 = vld [vmem:[#allocation4 + $0x1de8] sm:$0xff]  ;;  %v2272_v34 = vld [vmem:[#allocation4 + $0x17e0] sm:$0xff] }
 0x23f   : > { %3079 = vmatpush1.msra.mxu1 %v2146_v36  ;;  %3150 = vmatpush1.msra.mxu0 %v2338_v37  ;;  %v2464_v35 = vld [vmem:[#allocation4 + $0x1de0] sm:$0xff]  ;;  %v2267_v36 = vld [vmem:[#allocation4 + $0x17b8] sm:$0xff] }
 0x240   : > { %3080 = vmatprep.subr.mxu1 %v2141_v38  ;;  %3151 = vmatprep.subr.mxu0 %v2333_v40  ;;  %v2459_v37 = vld [vmem:[#allocation4 + $0x1db8] sm:$0xff]  ;;  %v2266_v38 = vld [vmem:[#allocation4 + $0x17b0] sm:$0xff] }
 0x241   : > { %3081 = vmatpush1.msra.mxu1 %v2140_v4  ;;  %3152 = vmatpush1.msra.mxu0 %v2332_v42  ;;  %v2458_v40 = vld [vmem:[#allocation4 + $0x1db0] sm:$0xff]  ;;  %v2261_v4 = vld [vmem:[#allocation4 + $0x1788] sm:$0xff] }
 0x242   : > { %3082 = vmatprep.subr.mxu1 %v2135_v43  ;;  %3153 = vmatprep.subr.mxu0 %v2327_v6  ;;  %v2453_v42 = vld [vmem:[#allocation4 + $0x1d88] sm:$0xff]  ;;  %v2260_v43 = vld [vmem:[#allocation4 + $0x1780] sm:$0xff] }
 0x243   : > { %3083 = vmatpush1.msra.mxu1 %v2134_v2  ;;  %3154 = vmatpush1.msra.mxu0 %v2326_v44  ;;  %v2452_v6 = vld [vmem:[#allocation4 + $0x1d80] sm:$0xff]  ;;  %v2255_v2 = vld [vmem:[#allocation4 + $0x1758] sm:$0xff] }
 0x244   : > { %3084 = vmatprep.subr.mxu1 %v2129_v45  ;;  %3155 = vmatprep.subr.mxu0 %v2321_v46  ;;  %v2447_v44 = vld [vmem:[#allocation4 + $0x1d58] sm:$0xff]  ;;  %v2254_v45 = vld [vmem:[#allocation4 + $0x1750] sm:$0xff] }
 0x245   : > { %3085 = vmatpush1.msra.mxu1 %v2128_v47  ;;  %3156 = vmatpush1.msra.mxu0 %v2320_v49  ;;  %v2446_v46 = vld [vmem:[#allocation4 + $0x1d50] sm:$0xff]  ;;  %v2249_v47 = vld [vmem:[#allocation4 + $0x1728] sm:$0xff] }
 0x246   : > { %3086 = vmatprep.subr.mxu1 %v2123_v51  ;;  %3157 = vmatprep.subr.mxu0 %v2315_v52  ;;  %v2441_v49 = vld [vmem:[#allocation4 + $0x1d28] sm:$0xff]  ;;  %v2248_v51 = vld [vmem:[#allocation4 + $0x1720] sm:$0xff] }
 0x247   : > { %3087 = vmatpush1.msra.mxu1 %v2122_v55  ;;  %3158 = vmatpush1.msra.mxu0 %v2314_v57  ;;  %v2440_v52 = vld [vmem:[#allocation4 + $0x1d20] sm:$0xff]  ;;  %v2243_v55 = vld [vmem:[#allocation4 + $0x16f8] sm:$0xff] }
 0x248   : > { %3088 = vmatprep.subr.mxu1 %v2117_v59  ;;  %3159 = vmatprep.subr.mxu0 %v2309_v60  ;;  %v2435_v57 = vld [vmem:[#allocation4 + $0x1cf8] sm:$0xff]  ;;  %v2242_v59 = vld [vmem:[#allocation4 + $0x16f0] sm:$0xff] }
 0x249   : > { %3089 = vmatpush1.msra.mxu1 %v2116_v61  ;;  %3160 = vmatpush1.msra.mxu0 %v2308_v62  ;;  %v2434_v60 = vld [vmem:[#allocation4 + $0x1cf0] sm:$0xff]  ;;  %v2237_v61 = vld [vmem:[#allocation4 + $0x16c8] sm:$0xff] }
 0x24a   : > { %3090 = vmatprep.subr.mxu1 %v2111_v1  ;;  %3161 = vmatprep.subr.mxu0 %v2303_v3  ;;  %v2429_v62 = vld [vmem:[#allocation4 + $0x1cc8] sm:$0xff]  ;;  %v2236_v1 = vld [vmem:[#allocation4 + $0x16c0] sm:$0xff] }
 0x24b   : > { %3091 = vmatpush1.msra.mxu1 %v2110_v5  ;;  %3162 = vmatpush1.msra.mxu0 %v2302_v7  ;;  %v2428_v3 = vld [vmem:[#allocation4 + $0x1cc0] sm:$0xff]  ;;  %v2231_v5 = vld [vmem:[#allocation4 + $0x1698] sm:$0xff] }
 0x24c   : > { %3092 = vmatprep.subr.mxu1 %v2105_v9  ;;  %3163 = vmatprep.subr.mxu0 %v2297_v11  ;;  %v2423_v7 = vld [vmem:[#allocation4 + $0x1c98] sm:$0xff]  ;;  %v2230_v9 = vld [vmem:[#allocation4 + $0x1690] sm:$0xff] }
 0x24d   : > { %3093 = vmatpush1.msra.mxu1 %v2104_v12  ;;  %3164 = vmatpush1.msra.mxu0 %v2296_v13  ;;  %v2422_v11 = vld [vmem:[#allocation4 + $0x1c90] sm:$0xff]  ;;  %v2225_v12 = vld [vmem:[#allocation4 + $0x1668] sm:$0xff] }
 0x24e   : > { %3094 = vmatprep.subr.mxu1 %v2099_v14  ;;  %3165 = vmatprep.subr.mxu0 %v2291_v15  ;;  %v2417_v13 = vld [vmem:[#allocation4 + $0x1c68] sm:$0xff]  ;;  %v2224_v14 = vld [vmem:[#allocation4 + $0x1660] sm:$0xff] }
 0x24f   : > { %3095 = vmatpush1.msra.mxu1 %v2098_v16  ;;  %3166 = vmatpush1.msra.mxu0 %v2290_v17  ;;  %v2416_v15 = vld [vmem:[#allocation4 + $0x1c60] sm:$0xff]  ;;  %v2219_v16 = vld [vmem:[#allocation4 + $0x1638] sm:$0xff] }
 0x250   : > { %3096 = vmatprep.subr.mxu1 %v2093_v18  ;;  %3167 = vmatprep.subr.mxu0 %v2285_v20  ;;  %v2411_v17 = vld [vmem:[#allocation4 + $0x1c38] sm:$0xff]  ;;  %v2218_v18 = vld [vmem:[#allocation4 + $0x1630] sm:$0xff] }
 0x251   : > { %3097 = vmatpush1.msra.mxu1 %v2092_v22  ;;  %3168 = vmatpush1.msra.mxu0 %v2284_v23  ;;  %v2410_v20 = vld [vmem:[#allocation4 + $0x1c30] sm:$0xff]  ;;  %v2213_v22 = vld [vmem:[#allocation4 + $0x1608] sm:$0xff] }
 0x252   : > { %3098 = vmatprep.subr.mxu1 %v2087_v24  ;;  %3169 = vmatprep.subr.mxu0 %v2279_v26  ;;  %v2405_v23 = vld [vmem:[#allocation4 + $0x1c08] sm:$0xff]  ;;  %v2212_v24 = vld [vmem:[#allocation4 + $0x1600] sm:$0xff] }
 0x253   : > { %3099 = vmatpush1.msra.mxu1 %v2086_v27  ;;  %3170 = vmatpush1.msra.mxu0 %v2278_v29  ;;  %v2404_v26 = vld [vmem:[#allocation4 + $0x1c00] sm:$0xff]  ;;  %v2207_v27 = vld [vmem:[#allocation4 + $0x15d8] sm:$0xff] }
 0x254   : > { %3100 = vmatprep.subr.mxu1 %v2273_v32  ;;  %3171 = vmatprep.subr.mxu0 %v2465_v33  ;;  %v2399_v29 = vld [vmem:[#allocation4 + $0x1bd8] sm:$0xff]  ;;  %v2206_v32 = vld [vmem:[#allocation4 + $0x15d0] sm:$0xff] }
 0x255   : > { %3101 = vmatpush2.msra.mxu1 %v2272_v34  ;;  %3172 = vmatpush2.msra.mxu0 %v2464_v35  ;;  %v2398_v33 = vld [vmem:[#allocation4 + $0x1bd0] sm:$0xff]  ;;  %v2201_v34 = vld [vmem:[#allocation4 + $0x15a8] sm:$0xff] }
 0x256   : > { %3102 = vmatprep.subr.mxu1 %v2267_v36  ;;  %3173 = vmatprep.subr.mxu0 %v2459_v37  ;;  %v2393_v35 = vld [vmem:[#allocation4 + $0x1ba8] sm:$0xff]  ;;  %v2200_v36 = vld [vmem:[#allocation4 + $0x15a0] sm:$0xff] }
 0x257   : > { %3103 = vmatpush2.msra.mxu1 %v2266_v38  ;;  %3174 = vmatpush2.msra.mxu0 %v2458_v40  ;;  %v2392_v37 = vld [vmem:[#allocation4 + $0x1ba0] sm:$0xff]  ;;  %v2195_v38 = vld [vmem:[#allocation4 + $0x1578] sm:$0xff] }
 0x258   : > { %3104 = vmatprep.subr.mxu1 %v2261_v4  ;;  %3175 = vmatprep.subr.mxu0 %v2453_v42  ;;  %v2387_v40 = vld [vmem:[#allocation4 + $0x1b78] sm:$0xff]  ;;  %v2194_v4 = vld [vmem:[#allocation4 + $0x1570] sm:$0xff] }
 0x259   : > { %3105 = vmatpush2.msra.mxu1 %v2260_v43  ;;  %3176 = vmatpush2.msra.mxu0 %v2452_v6  ;;  %v2386_v42 = vld [vmem:[#allocation4 + $0x1b70] sm:$0xff]  ;;  %v2189_v43 = vld [vmem:[#allocation4 + $0x1548] sm:$0xff] }
 0x25a   : > { %3106 = vmatprep.subr.mxu1 %v2255_v2  ;;  %3177 = vmatprep.subr.mxu0 %v2447_v44  ;;  %v2381_v6 = vld [vmem:[#allocation4 + $0x1b48] sm:$0xff]  ;;  %v2188_v2 = vld [vmem:[#allocation4 + $0x1540] sm:$0xff] }
 0x25b   : > { %3107 = vmatpush2.msra.mxu1 %v2254_v45  ;;  %3178 = vmatpush2.msra.mxu0 %v2446_v46  ;;  %v2380_v44 = vld [vmem:[#allocation4 + $0x1b40] sm:$0xff]  ;;  %v2183_v45 = vld [vmem:[#allocation4 + $0x1518] sm:$0xff] }
 0x25c   : > { %3108 = vmatprep.subr.mxu1 %v2249_v47  ;;  %3179 = vmatprep.subr.mxu0 %v2441_v49  ;;  %v2375_v46 = vld [vmem:[#allocation4 + $0x1b18] sm:$0xff]  ;;  %v2182_v47 = vld [vmem:[#allocation4 + $0x1510] sm:$0xff] }
 0x25d   : > { %3109 = vmatpush2.msra.mxu1 %v2248_v51  ;;  %3180 = vmatpush2.msra.mxu0 %v2440_v52  ;;  %v2374_v49 = vld [vmem:[#allocation4 + $0x1b10] sm:$0xff]  ;;  %v1603_v51 = vld [vmem:[#allocation4 + $0x2f8] sm:$0xff] }
 0x25e   : > { %3110 = vmatprep.subr.mxu1 %v2243_v55  ;;  %3181 = vmatprep.subr.mxu0 %v2435_v57  ;;  %v1795_v52 = vld [vmem:[#allocation4 + $0x8f8] sm:$0xff]  ;;  %v1602_v55 = vld [vmem:[#allocation4 + $0x2f0] sm:$0xff] }
 0x25f   : > { %3111 = vmatpush2.msra.mxu1 %v2242_v59  ;;  %3182 = vmatpush2.msra.mxu0 %v2434_v60  ;;  %v1794_v57 = vld [vmem:[#allocation4 + $0x8f0] sm:$0xff]  ;;  %v1597_v59 = vld [vmem:[#allocation4 + $0x2c8] sm:$0xff] }
 0x260   : > { %3112 = vmatprep.subr.mxu1 %v2237_v61  ;;  %3183 = vmatprep.subr.mxu0 %v2429_v62  ;;  %v1789_v60 = vld [vmem:[#allocation4 + $0x8c8] sm:$0xff]  ;;  %v1596_v61 = vld [vmem:[#allocation4 + $0x2c0] sm:$0xff] }
 0x261   : > { %3113 = vmatpush2.msra.mxu1 %v2236_v1  ;;  %3184 = vmatpush2.msra.mxu0 %v2428_v3  ;;  %v1788_v62 = vld [vmem:[#allocation4 + $0x8c0] sm:$0xff]  ;;  %v1591_v1 = vld [vmem:[#allocation4 + $0x298] sm:$0xff] }
 0x262   : > { %3114 = vmatprep.subr.mxu1 %v2231_v5  ;;  %3185 = vmatprep.subr.mxu0 %v2423_v7  ;;  %v1783_v3 = vld [vmem:[#allocation4 + $0x898] sm:$0xff]  ;;  %v1590_v5 = vld [vmem:[#allocation4 + $0x290] sm:$0xff] }
 0x263   : > { %3115 = vmatpush2.msra.mxu1 %v2230_v9  ;;  %3186 = vmatpush2.msra.mxu0 %v2422_v11  ;;  %v1782_v7 = vld [vmem:[#allocation4 + $0x890] sm:$0xff]  ;;  %v1585_v9 = vld [vmem:[#allocation4 + $0x268] sm:$0xff] }
 0x264   : > { %3116 = vmatprep.subr.mxu1 %v2225_v12  ;;  %3187 = vmatprep.subr.mxu0 %v2417_v13  ;;  %v1777_v11 = vld [vmem:[#allocation4 + $0x868] sm:$0xff]  ;;  %v1584_v12 = vld [vmem:[#allocation4 + $0x260] sm:$0xff] }
 0x265   : > { %3117 = vmatpush2.msra.mxu1 %v2224_v14  ;;  %3188 = vmatpush2.msra.mxu0 %v2416_v15  ;;  %v1776_v13 = vld [vmem:[#allocation4 + $0x860] sm:$0xff]  ;;  %v1771_v14 = vld [vmem:[#allocation4 + $0x838] sm:$0xff]  ;;  %v1770_v15 = vld [vmem:[#allocation4 + $0x830] sm:$0xff] }
 0x266   : > { %3118 = vmatprep.subr.mxu1 %v2219_v16  ;;  %3189 = vmatprep.subr.mxu0 %v2411_v17  ;;  %v1573_v16 = vld [vmem:[#allocation4 + $0x208] sm:$0xff] }
 0x267   : > { %3119 = vmatpush2.msra.mxu1 %v2218_v18  ;;  %3190 = vmatpush2.msra.mxu0 %v2410_v20  ;;  %v1765_v17 = vld [vmem:[#allocation4 + $0x808] sm:$0xff]  ;;  %v1572_v18 = vld [vmem:[#allocation4 + $0x200] sm:$0xff] }
 0x268   : > { %3120 = vmatprep.subr.mxu1 %v2213_v22  ;;  %3191 = vmatprep.subr.mxu0 %v2405_v23  ;;  %v1764_v20 = vld [vmem:[#allocation4 + $0x800] sm:$0xff]  ;;  %v1567_v22 = vld [vmem:[#allocation4 + $0x1d8] sm:$0xff] }
 0x269   : > { %3121 = vmatpush2.msra.mxu1 %v2212_v24  ;;  %3192 = vmatpush2.msra.mxu0 %v2404_v26  ;;  %v1759_v23 = vld [vmem:[#allocation4 + $0x7d8] sm:$0xff]  ;;  %v1566_v24 = vld [vmem:[#allocation4 + $0x1d0] sm:$0xff] }
 0x26a   : > { %3122 = vmatprep.subr.mxu1 %v2207_v27  ;;  %3193 = vmatprep.subr.mxu0 %v2399_v29  ;;  %v1758_v26 = vld [vmem:[#allocation4 + $0x7d0] sm:$0xff]  ;;  %v1561_v27 = vld [vmem:[#allocation4 + $0x1a8] sm:$0xff] }
 0x26b   : > { %3123 = vmatpush2.msra.mxu1 %v2206_v32  ;;  %3194 = vmatpush2.msra.mxu0 %v2398_v33  ;;  %v1753_v29 = vld [vmem:[#allocation4 + $0x7a8] sm:$0xff]  ;;  %v1560_v32 = vld [vmem:[#allocation4 + $0x1a0] sm:$0xff] }
 0x26c   : > { %3124 = vmatprep.subr.mxu1 %v2201_v34  ;;  %3195 = vmatprep.subr.mxu0 %v2393_v35  ;;  %v1752_v33 = vld [vmem:[#allocation4 + $0x7a0] sm:$0xff]  ;;  %v1555_v34 = vld [vmem:[#allocation4 + $0x178] sm:$0xff] }
 0x26d   : > { %3125 = vmatpush2.msra.mxu1 %v2200_v36  ;;  %3196 = vmatpush2.msra.mxu0 %v2392_v37  ;;  %v1747_v35 = vld [vmem:[#allocation4 + $0x778] sm:$0xff]  ;;  %v1554_v36 = vld [vmem:[#allocation4 + $0x170] sm:$0xff] }
 0x26e   : > { %3126 = vmatprep.subr.mxu1 %v2195_v38  ;;  %3197 = vmatprep.subr.mxu0 %v2387_v40  ;;  %v1746_v37 = vld [vmem:[#allocation4 + $0x770] sm:$0xff]  ;;  %v1549_v38 = vld [vmem:[#allocation4 + $0x148] sm:$0xff] }
 0x26f   : > { %3127 = vmatpush2.msra.mxu1 %v2194_v4  ;;  %3198 = vmatpush2.msra.mxu0 %v2386_v42  ;;  %v1741_v40 = vld [vmem:[#allocation4 + $0x748] sm:$0xff]  ;;  %v1548_v4 = vld [vmem:[#allocation4 + $0x140] sm:$0xff] }
 0x270   : > { %3128 = vmatprep.subr.mxu1 %v2189_v43  ;;  %3199 = vmatprep.subr.mxu0 %v2381_v6  ;;  %v1740_v42 = vld [vmem:[#allocation4 + $0x740] sm:$0xff]  ;;  %v1543_v43 = vld [vmem:[#allocation4 + $0x118] sm:$0xff] }
 0x271   : > { %3129 = vmatpush2.msra.mxu1 %v2188_v2  ;;  %3200 = vmatpush2.msra.mxu0 %v2380_v44  ;;  %v1735_v6 = vld [vmem:[#allocation4 + $0x718] sm:$0xff]  ;;  %v1542_v2 = vld [vmem:[#allocation4 + $0x110] sm:$0xff] }
 0x272   : > { %3130 = vmatprep.subr.mxu1 %v2183_v45  ;;  %3201 = vmatprep.subr.mxu0 %v2375_v46  ;;  %v1734_v44 = vld [vmem:[#allocation4 + $0x710] sm:$0xff]  ;;  %v1537_v45 = vld [vmem:[#allocation4 + $0xe8] sm:$0xff] }
 0x273   : > { %3131 = vmatpush2.msra.mxu1 %v2182_v47  ;;  %3202 = vmatpush2.msra.mxu0 %v2374_v49  ;;  %v1729_v46 = vld [vmem:[#allocation4 + $0x6e8] sm:$0xff]  ;;  %v1536_v47 = vld [vmem:[#allocation4 + $0xe0] sm:$0xff] }
 0x274   : > { %3133 = vmatmul.mubr.f32.vlgmr.msra.gmra.mxu1 %v4964_v50  ;;  %3204 = vmatmul.mubr.f32.vlgmr.msra.gmra.mxu0 %v4973_v21  ;;  %v1728_v49 = vld [vmem:[#allocation4 + $0x6e0] sm:$0xff] }
 0x275   : > { %3210 = vmatprep.subr.mxu1 %v1603_v51  ;;  %3281 = vmatprep.subr.mxu0 %v1795_v52  ;;  %v1531_v51 = vld [vmem:[#allocation4 + $0xb8] sm:$0xff] }
 0x276   : > { %3211 = vmatpush1.msra.mxu1 %v1602_v55  ;;  %3274 = vmatprep.mubr.f32.mxu1 %v4918_v39  ;;  %v1579_v39 = vld [vmem:[#allocation4 + $0x238] sm:$0xff]  ;;  %v1530_v55 = vld [vmem:[#allocation4 + $0xb0] sm:$0xff] }
 0x277   : > { %3282 = vmatpush1.msra.mxu0 %v1794_v57  ;;  %3345 = vmatprep.mubr.f32.mxu0 %v4933_v31  ;;  %v1578_v31 = vld [vmem:[#allocation4 + $0x230] sm:$0xff]  ;;  %v1723_v52 = vld [vmem:[#allocation4 + $0x6b8] sm:$0xff] }
 0x278   : > { %3212 = vmatprep.subr.mxu1 %v1597_v59  ;;  %3283 = vmatprep.subr.mxu0 %v1789_v60  ;;  %v1722_v57 = vld [vmem:[#allocation4 + $0x6b0] sm:$0xff]  ;;  %v1525_v59 = vld [vmem:[#allocation4 + $0x88] sm:$0xff] }
 0x279   : > { %3213 = vmatpush1.msra.mxu1 %v1596_v61  ;;  %3284 = vmatpush1.msra.mxu0 %v1788_v62  ;;  %v1717_v60 = vld [vmem:[#allocation4 + $0x688] sm:$0xff]  ;;  %v1524_v61 = vld [vmem:[#allocation4 + $0x80] sm:$0xff] }
 0x27a   : > { %3214 = vmatprep.subr.mxu1 %v1591_v1  ;;  %3285 = vmatprep.subr.mxu0 %v1783_v3  ;;  %v1716_v62 = vld [vmem:[#allocation4 + $0x680] sm:$0xff]  ;;  %v1519_v1 = vld [vmem:[#allocation4 + $0x58] sm:$0xff] }
 0x27b   : > { %3215 = vmatpush1.msra.mxu1 %v1590_v5  ;;  %3286 = vmatpush1.msra.mxu0 %v1782_v7  ;;  %v1711_v3 = vld [vmem:[#allocation4 + $0x658] sm:$0xff]  ;;  %v1518_v5 = vld [vmem:[#allocation4 + $0x50] sm:$0xff] }
 0x27c   : > { %3216 = vmatprep.subr.mxu1 %v1585_v9  ;;  %3287 = vmatprep.subr.mxu0 %v1777_v11  ;;  %v1710_v7 = vld [vmem:[#allocation4 + $0x650] sm:$0xff]  ;;  %v1513_v9 = vld [vmem:[#allocation4 + $0x28] sm:$0xff] }
 0x27d   : > { %3217 = vmatpush1.msra.mxu1 %v1584_v12  ;;  %3288 = vmatpush1.msra.mxu0 %v1776_v13  ;;  %v1705_v11 = vld [vmem:[#allocation4 + $0x628] sm:$0xff]  ;;  %v1512_v12 = vld [vmem:[#allocation4 + $0x20] sm:$0xff] }
 0x27e   : > { %3218 = vmatprep.subr.mxu1 %v1579_v39  ;;  %3289 = vmatprep.subr.mxu0 %v1771_v14  ;;  %v1704_v13 = vld [vmem:[#allocation4 + $0x620] sm:$0xff]  ;;  %v1699_v39 = vld [vmem:[#allocation4 + $0x5f8] sm:$0xff] }
 0x27f   : > { %3219 = vmatpush1.msra.mxu1 %v1578_v31  ;;  %3290 = vmatpush1.msra.mxu0 %v1770_v15  ;;  %v1891_v14 = vld [vmem:[#allocation4 + $0xbf8] sm:$0xff]  ;;  %v1698_v31 = vld [vmem:[#allocation4 + $0x5f0] sm:$0xff] }
 0x280   : > { %3220 = vmatprep.subr.mxu1 %v1573_v16  ;;  %3291 = vmatprep.subr.mxu0 %v1765_v17  ;;  %v1890_v15 = vld [vmem:[#allocation4 + $0xbf0] sm:$0xff]  ;;  %v1693_v16 = vld [vmem:[#allocation4 + $0x5c8] sm:$0xff] }
 0x281   : > { %3221 = vmatpush1.msra.mxu1 %v1572_v18  ;;  %3292 = vmatpush1.msra.mxu0 %v1764_v20  ;;  %v1885_v17 = vld [vmem:[#allocation4 + $0xbc8] sm:$0xff]  ;;  %v1692_v18 = vld [vmem:[#allocation4 + $0x5c0] sm:$0xff] }
 0x282   : > { %3222 = vmatprep.subr.mxu1 %v1567_v22  ;;  %3293 = vmatprep.subr.mxu0 %v1759_v23  ;;  %v1884_v20 = vld [vmem:[#allocation4 + $0xbc0] sm:$0xff]  ;;  %v1687_v22 = vld [vmem:[#allocation4 + $0x598] sm:$0xff] }
 0x283   : > { %3223 = vmatpush1.msra.mxu1 %v1566_v24  ;;  %3294 = vmatpush1.msra.mxu0 %v1758_v26  ;;  %v1879_v23 = vld [vmem:[#allocation4 + $0xb98] sm:$0xff]  ;;  %v1686_v24 = vld [vmem:[#allocation4 + $0x590] sm:$0xff] }
 0x284   : > { %3224 = vmatprep.subr.mxu1 %v1561_v27  ;;  %3295 = vmatprep.subr.mxu0 %v1753_v29  ;;  %v1878_v26 = vld [vmem:[#allocation4 + $0xb90] sm:$0xff]  ;;  %v1681_v27 = vld [vmem:[#allocation4 + $0x568] sm:$0xff] }
 0x285   : > { %3225 = vmatpush1.msra.mxu1 %v1560_v32  ;;  %3296 = vmatpush1.msra.mxu0 %v1752_v33  ;;  %v1873_v29 = vld [vmem:[#allocation4 + $0xb68] sm:$0xff]  ;;  %v1680_v32 = vld [vmem:[#allocation4 + $0x560] sm:$0xff] }
 0x286   : > { %3226 = vmatprep.subr.mxu1 %v1555_v34  ;;  %3297 = vmatprep.subr.mxu0 %v1747_v35  ;;  %v1872_v33 = vld [vmem:[#allocation4 + $0xb60] sm:$0xff]  ;;  %v1675_v34 = vld [vmem:[#allocation4 + $0x538] sm:$0xff] }
 0x287   : > { %3227 = vmatpush1.msra.mxu1 %v1554_v36  ;;  %3298 = vmatpush1.msra.mxu0 %v1746_v37  ;;  %v1867_v35 = vld [vmem:[#allocation4 + $0xb38] sm:$0xff]  ;;  %v1674_v36 = vld [vmem:[#allocation4 + $0x530] sm:$0xff] }
 0x288   : > { %3228 = vmatprep.subr.mxu1 %v1549_v38  ;;  %3299 = vmatprep.subr.mxu0 %v1741_v40  ;;  %v1866_v37 = vld [vmem:[#allocation4 + $0xb30] sm:$0xff]  ;;  %v1669_v38 = vld [vmem:[#allocation4 + $0x508] sm:$0xff] }
 0x289   : > { %3229 = vmatpush1.msra.mxu1 %v1548_v4  ;;  %3300 = vmatpush1.msra.mxu0 %v1740_v42  ;;  %v1861_v40 = vld [vmem:[#allocation4 + $0xb08] sm:$0xff]  ;;  %v1668_v4 = vld [vmem:[#allocation4 + $0x500] sm:$0xff] }
 0x28a   : > { %3230 = vmatprep.subr.mxu1 %v1543_v43  ;;  %3301 = vmatprep.subr.mxu0 %v1735_v6  ;;  %v1860_v42 = vld [vmem:[#allocation4 + $0xb00] sm:$0xff]  ;;  %v1663_v43 = vld [vmem:[#allocation4 + $0x4d8] sm:$0xff] }
 0x28b   : > { %3231 = vmatpush1.msra.mxu1 %v1542_v2  ;;  %3302 = vmatpush1.msra.mxu0 %v1734_v44  ;;  %v1855_v6 = vld [vmem:[#allocation4 + $0xad8] sm:$0xff]  ;;  %v1662_v2 = vld [vmem:[#allocation4 + $0x4d0] sm:$0xff] }
 0x28c   : > { %3232 = vmatprep.subr.mxu1 %v1537_v45  ;;  %3303 = vmatprep.subr.mxu0 %v1729_v46  ;;  %v1854_v44 = vld [vmem:[#allocation4 + $0xad0] sm:$0xff]  ;;  %v1657_v45 = vld [vmem:[#allocation4 + $0x4a8] sm:$0xff] }
 0x28d   : > { %3233 = vmatpush1.msra.mxu1 %v1536_v47  ;;  %3304 = vmatpush1.msra.mxu0 %v1728_v49  ;;  %v1849_v46 = vld [vmem:[#allocation4 + $0xaa8] sm:$0xff]  ;;  %v1656_v47 = vld [vmem:[#allocation4 + $0x4a0] sm:$0xff] }
 0x28e   : > { %3234 = vmatprep.subr.mxu1 %v1531_v51  ;;  %3305 = vmatprep.subr.mxu0 %v1723_v52  ;;  %v1848_v49 = vld [vmem:[#allocation4 + $0xaa0] sm:$0xff]  ;;  %v1651_v51 = vld [vmem:[#allocation4 + $0x478] sm:$0xff] }
 0x28f   : > { %3235 = vmatpush1.msra.mxu1 %v1530_v55  ;;  %3306 = vmatpush1.msra.mxu0 %v1722_v57  ;;  %v1843_v52 = vld [vmem:[#allocation4 + $0xa78] sm:$0xff]  ;;  %v1650_v55 = vld [vmem:[#allocation4 + $0x470] sm:$0xff] }
 0x290   : > { %3236 = vmatprep.subr.mxu1 %v1525_v59  ;;  %3307 = vmatprep.subr.mxu0 %v1717_v60  ;;  %v1842_v57 = vld [vmem:[#allocation4 + $0xa70] sm:$0xff]  ;;  %v1645_v59 = vld [vmem:[#allocation4 + $0x448] sm:$0xff] }
 0x291   : > { %3237 = vmatpush1.msra.mxu1 %v1524_v61  ;;  %3308 = vmatpush1.msra.mxu0 %v1716_v62  ;;  %v1837_v60 = vld [vmem:[#allocation4 + $0xa48] sm:$0xff]  ;;  %v1644_v61 = vld [vmem:[#allocation4 + $0x440] sm:$0xff] }
 0x292   : > { %3238 = vmatprep.subr.mxu1 %v1519_v1  ;;  %3309 = vmatprep.subr.mxu0 %v1711_v3  ;;  %v1836_v62 = vld [vmem:[#allocation4 + $0xa40] sm:$0xff]  ;;  %v1639_v1 = vld [vmem:[#allocation4 + $0x418] sm:$0xff] }
 0x293   : > { %3239 = vmatpush1.msra.mxu1 %v1518_v5  ;;  %3310 = vmatpush1.msra.mxu0 %v1710_v7  ;;  %v1831_v3 = vld [vmem:[#allocation4 + $0xa18] sm:$0xff]  ;;  %v1638_v5 = vld [vmem:[#allocation4 + $0x410] sm:$0xff] }
 0x294   : > { %3240 = vmatprep.subr.mxu1 %v1513_v9  ;;  %3311 = vmatprep.subr.mxu0 %v1705_v11  ;;  %v1830_v7 = vld [vmem:[#allocation4 + $0xa10] sm:$0xff]  ;;  %v1633_v9 = vld [vmem:[#allocation4 + $0x3e8] sm:$0xff] }
 0x295   : > { %3241 = vmatpush1.msra.mxu1 %v1512_v12  ;;  %3312 = vmatpush1.msra.mxu0 %v1704_v13  ;;  %v1825_v11 = vld [vmem:[#allocation4 + $0x9e8] sm:$0xff]  ;;  %v1632_v12 = vld [vmem:[#allocation4 + $0x3e0] sm:$0xff] }
 0x296   : > { %3242 = vmatprep.subr.mxu1 %v1699_v39  ;;  %3313 = vmatprep.subr.mxu0 %v1891_v14  ;;  %v1824_v13 = vld [vmem:[#allocation4 + $0x9e0] sm:$0xff]  ;;  %v1627_v39 = vld [vmem:[#allocation4 + $0x3b8] sm:$0xff] }
 0x297   : > { %3243 = vmatpush2.msra.mxu1 %v1698_v31  ;;  %3314 = vmatpush2.msra.mxu0 %v1890_v15  ;;  %v1819_v14 = vld [vmem:[#allocation4 + $0x9b8] sm:$0xff]  ;;  %v1626_v31 = vld [vmem:[#allocation4 + $0x3b0] sm:$0xff] }
 0x298   : > { %3244 = vmatprep.subr.mxu1 %v1693_v16  ;;  %3315 = vmatprep.subr.mxu0 %v1885_v17  ;;  %v1818_v15 = vld [vmem:[#allocation4 + $0x9b0] sm:$0xff]  ;;  %v1621_v16 = vld [vmem:[#allocation4 + $0x388] sm:$0xff] }
 0x299   : > { %3245 = vmatpush2.msra.mxu1 %v1692_v18  ;;  %3316 = vmatpush2.msra.mxu0 %v1884_v20  ;;  %v1813_v17 = vld [vmem:[#allocation4 + $0x988] sm:$0xff]  ;;  %v1620_v18 = vld [vmem:[#allocation4 + $0x380] sm:$0xff] }
 0x29a   : > { %3246 = vmatprep.subr.mxu1 %v1687_v22  ;;  %3317 = vmatprep.subr.mxu0 %v1879_v23  ;;  %v1812_v20 = vld [vmem:[#allocation4 + $0x980] sm:$0xff]  ;;  %v1615_v22 = vld [vmem:[#allocation4 + $0x358] sm:$0xff] }
 0x29b   : > { %3247 = vmatpush2.msra.mxu1 %v1686_v24  ;;  %3318 = vmatpush2.msra.mxu0 %v1878_v26  ;;  %v1807_v23 = vld [vmem:[#allocation4 + $0x958] sm:$0xff]  ;;  %v1614_v24 = vld [vmem:[#allocation4 + $0x350] sm:$0xff] }
 0x29c   : > { %3248 = vmatprep.subr.mxu1 %v1681_v27  ;;  %3319 = vmatprep.subr.mxu0 %v1873_v29  ;;  %v1806_v26 = vld [vmem:[#allocation4 + $0x950] sm:$0xff]  ;;  %v1609_v27 = vld [vmem:[#allocation4 + $0x328] sm:$0xff] }
 0x29d   : > { %3249 = vmatpush2.msra.mxu1 %v1680_v32  ;;  %3320 = vmatpush2.msra.mxu0 %v1872_v33  ;;  %v1801_v29 = vld [vmem:[#allocation4 + $0x928] sm:$0xff]  ;;  %v1608_v32 = vld [vmem:[#allocation4 + $0x320] sm:$0xff] }
 0x29e   : > { %3250 = vmatprep.subr.mxu1 %v1675_v34  ;;  %3321 = vmatprep.subr.mxu0 %v1867_v35  ;;  %v1800_v33 = vld [vmem:[#allocation4 + $0x920] sm:$0xff]  ;;  %v1987_v34 = vld [vmem:[#allocation4 + $0xef8] sm:$0xff] }
 0x29f   : > { %3251 = vmatpush2.msra.mxu1 %v1674_v36  ;;  %3322 = vmatpush2.msra.mxu0 %v1866_v37  ;;  %v2179_v35 = vld [vmem:[#allocation4 + $0x14f8] sm:$0xff]  ;;  %v1986_v36 = vld [vmem:[#allocation4 + $0xef0] sm:$0xff] }
 0x2a0   : > { %3252 = vmatprep.subr.mxu1 %v1669_v38  ;;  %3323 = vmatprep.subr.mxu0 %v1861_v40  ;;  %v2178_v37 = vld [vmem:[#allocation4 + $0x14f0] sm:$0xff]  ;;  %v1981_v38 = vld [vmem:[#allocation4 + $0xec8] sm:$0xff] }
 0x2a1   : > { %3253 = vmatpush2.msra.mxu1 %v1668_v4  ;;  %3324 = vmatpush2.msra.mxu0 %v1860_v42  ;;  %v2173_v40 = vld [vmem:[#allocation4 + $0x14c8] sm:$0xff]  ;;  %v1980_v4 = vld [vmem:[#allocation4 + $0xec0] sm:$0xff] }
 0x2a2   : > { %3254 = vmatprep.subr.mxu1 %v1663_v43  ;;  %3325 = vmatprep.subr.mxu0 %v1855_v6  ;;  %v2172_v42 = vld [vmem:[#allocation4 + $0x14c0] sm:$0xff]  ;;  %v1975_v43 = vld [vmem:[#allocation4 + $0xe98] sm:$0xff] }
 0x2a3   : > { %3255 = vmatpush2.msra.mxu1 %v1662_v2  ;;  %3326 = vmatpush2.msra.mxu0 %v1854_v44  ;;  %v2167_v6 = vld [vmem:[#allocation4 + $0x1498] sm:$0xff]  ;;  %v2166_v2 = vld [vmem:[#allocation4 + $0x1490] sm:$0xff]  ;;  %v2161_v44 = vld [vmem:[#allocation4 + $0x1468] sm:$0xff] }
 0x2a4   : > { %3256 = vmatprep.subr.mxu1 %v1657_v45  ;;  %3327 = vmatprep.subr.mxu0 %v1849_v46  ;;  %v1968_v45 = vld [vmem:[#allocation4 + $0xe60] sm:$0xff] }
 0x2a5   : > { %3257 = vmatpush2.msra.mxu1 %v1656_v47  ;;  %3328 = vmatpush2.msra.mxu0 %v1848_v49  ;;  %v2160_v46 = vld [vmem:[#allocation4 + $0x1460] sm:$0xff]  ;;  %v2155_v47 = vld [vmem:[#allocation4 + $0x1438] sm:$0xff]  ;;  %v2154_v49 = vld [vmem:[#allocation4 + $0x1430] sm:$0xff] }
 0x2a6   : > { %3258 = vmatprep.subr.mxu1 %v1651_v51  ;;  %3329 = vmatprep.subr.mxu0 %v1843_v52  ;;  %v1957_v51 = vld [vmem:[#allocation4 + $0xe08] sm:$0xff] }
 0x2a7   : > { %3259 = vmatpush2.msra.mxu1 %v1650_v55  ;;  %3330 = vmatpush2.msra.mxu0 %v1842_v57  ;;  %v2149_v52 = vld [vmem:[#allocation4 + $0x1408] sm:$0xff]  ;;  %v1956_v55 = vld [vmem:[#allocation4 + $0xe00] sm:$0xff] }
 0x2a8   : > { %3260 = vmatprep.subr.mxu1 %v1645_v59  ;;  %3331 = vmatprep.subr.mxu0 %v1837_v60  ;;  %v2148_v57 = vld [vmem:[#allocation4 + $0x1400] sm:$0xff]  ;;  %v1951_v59 = vld [vmem:[#allocation4 + $0xdd8] sm:$0xff] }
 0x2a9   : > { %3261 = vmatpush2.msra.mxu1 %v1644_v61  ;;  %3332 = vmatpush2.msra.mxu0 %v1836_v62  ;;  %v2143_v60 = vld [vmem:[#allocation4 + $0x13d8] sm:$0xff]  ;;  %v1950_v61 = vld [vmem:[#allocation4 + $0xdd0] sm:$0xff] }
 0x2aa   : > { %3262 = vmatprep.subr.mxu1 %v1639_v1  ;;  %3333 = vmatprep.subr.mxu0 %v1831_v3  ;;  %v2142_v62 = vld [vmem:[#allocation4 + $0x13d0] sm:$0xff]  ;;  %v1945_v1 = vld [vmem:[#allocation4 + $0xda8] sm:$0xff] }
 0x2ab   : > { %3263 = vmatpush2.msra.mxu1 %v1638_v5  ;;  %3334 = vmatpush2.msra.mxu0 %v1830_v7  ;;  %v2137_v3 = vld [vmem:[#allocation4 + $0x13a8] sm:$0xff]  ;;  %v1944_v5 = vld [vmem:[#allocation4 + $0xda0] sm:$0xff] }
 0x2ac   : > { %3264 = vmatprep.subr.mxu1 %v1633_v9  ;;  %3335 = vmatprep.subr.mxu0 %v1825_v11  ;;  %v2136_v7 = vld [vmem:[#allocation4 + $0x13a0] sm:$0xff]  ;;  %v1939_v9 = vld [vmem:[#allocation4 + $0xd78] sm:$0xff] }
 0x2ad   : > { %3265 = vmatpush2.msra.mxu1 %v1632_v12  ;;  %3336 = vmatpush2.msra.mxu0 %v1824_v13  ;;  %v2131_v11 = vld [vmem:[#allocation4 + $0x1378] sm:$0xff]  ;;  %v1938_v12 = vld [vmem:[#allocation4 + $0xd70] sm:$0xff] }
 0x2ae   : > { %3266 = vmatprep.subr.mxu1 %v1627_v39  ;;  %3337 = vmatprep.subr.mxu0 %v1819_v14  ;;  %v2130_v13 = vld [vmem:[#allocation4 + $0x1370] sm:$0xff]  ;;  %v1933_v39 = vld [vmem:[#allocation4 + $0xd48] sm:$0xff] }
 0x2af   : > { %3267 = vmatpush2.msra.mxu1 %v1626_v31  ;;  %3338 = vmatpush2.msra.mxu0 %v1818_v15  ;;  %v2125_v14 = vld [vmem:[#allocation4 + $0x1348] sm:$0xff]  ;;  %v1932_v31 = vld [vmem:[#allocation4 + $0xd40] sm:$0xff] }
 0x2b0   : > { %3268 = vmatprep.subr.mxu1 %v1621_v16  ;;  %3339 = vmatprep.subr.mxu0 %v1813_v17  ;;  %v2124_v15 = vld [vmem:[#allocation4 + $0x1340] sm:$0xff]  ;;  %v1927_v16 = vld [vmem:[#allocation4 + $0xd18] sm:$0xff] }
 0x2b1   : > { %3269 = vmatpush2.msra.mxu1 %v1620_v18  ;;  %3340 = vmatpush2.msra.mxu0 %v1812_v20  ;;  %v2119_v17 = vld [vmem:[#allocation4 + $0x1318] sm:$0xff]  ;;  %v1926_v18 = vld [vmem:[#allocation4 + $0xd10] sm:$0xff] }
 0x2b2   : > { %3270 = vmatprep.subr.mxu1 %v1615_v22  ;;  %3341 = vmatprep.subr.mxu0 %v1807_v23  ;;  %v2118_v20 = vld [vmem:[#allocation4 + $0x1310] sm:$0xff]  ;;  %v1921_v22 = vld [vmem:[#allocation4 + $0xce8] sm:$0xff] }
 0x2b3   : > { %3271 = vmatpush2.msra.mxu1 %v1614_v24  ;;  %3342 = vmatpush2.msra.mxu0 %v1806_v26  ;;  %v2113_v23 = vld [vmem:[#allocation4 + $0x12e8] sm:$0xff]  ;;  %v1920_v24 = vld [vmem:[#allocation4 + $0xce0] sm:$0xff] }
 0x2b4   : > { %3272 = vmatprep.subr.mxu1 %v1609_v27  ;;  %3343 = vmatprep.subr.mxu0 %v1801_v29  ;;  %v2112_v26 = vld [vmem:[#allocation4 + $0x12e0] sm:$0xff]  ;;  %v1915_v27 = vld [vmem:[#allocation4 + $0xcb8] sm:$0xff] }
 0x2b5   : > { %3273 = vmatpush2.msra.mxu1 %v1608_v32  ;;  %3344 = vmatpush2.msra.mxu0 %v1800_v33  ;;  %v2107_v29 = vld [vmem:[#allocation4 + $0x12b8] sm:$0xff]  ;;  %v1914_v32 = vld [vmem:[#allocation4 + $0xcb0] sm:$0xff] }
 0x2b6   : > { %3275 = vmatmul.mubr.f32.vlgmr.msra.gmra.mxu1 %v4920_v41  ;;  %3346 = vmatmul.mubr.f32.vlgmr.msra.gmra.mxu0 %v4941_v10  ;;  %v1974_v41 = vld [vmem:[#allocation4 + $0xe90] sm:$0xff]  ;;  %v1969_v10 = vld [vmem:[#allocation4 + $0xe68] sm:$0xff] }
 0x2b7   : > { %3352 = vmatprep.subr.mxu1 %v1987_v34  ;;  %3423 = vmatprep.subr.mxu0 %v2179_v35  ;;  %v2106_v33 = vld [vmem:[#allocation4 + $0x12b0] sm:$0xff]  ;;  %v1909_v34 = vld [vmem:[#allocation4 + $0xc88] sm:$0xff] }
 0x2b8   : > { %3353 = vmatpush1.msra.mxu1 %v1986_v36  ;;  %3416 = vmatprep.mubr.f32.mxu1 %v4952_v53  ;;  %v1963_v53 = vld [vmem:[#allocation4 + $0xe38] sm:$0xff]  ;;  %v2101_v35 = vld [vmem:[#allocation4 + $0x1288] sm:$0xff]  ;;  %v1908_v36 = vld [vmem:[#allocation4 + $0xc80] sm:$0xff] }
 0x2b9   : > { %3424 = vmatpush1.msra.mxu0 %v2178_v37  ;;  %3487 = vmatprep.mubr.f32.mxu0 %v4962_v48  ;;  %v1962_v48 = vld [vmem:[#allocation4 + $0xe30] sm:$0xff]  ;;  %v2100_v37 = vld [vmem:[#allocation4 + $0x1280] sm:$0xff] }
 0x2ba   : > { %3354 = vmatprep.subr.mxu1 %v1981_v38  ;;  %3425 = vmatprep.subr.mxu0 %v2173_v40  ;;  %v1903_v38 = vld [vmem:[#allocation4 + $0xc58] sm:$0xff] }
 0x2bb   : > { %3355 = vmatpush1.msra.mxu1 %v1980_v4  ;;  %3426 = vmatpush1.msra.mxu0 %v2172_v42  ;;  %v2095_v40 = vld [vmem:[#allocation4 + $0x1258] sm:$0xff]  ;;  %v1902_v4 = vld [vmem:[#allocation4 + $0xc50] sm:$0xff] }
 0x2bc   : > { %3356 = vmatprep.subr.mxu1 %v1975_v43  ;;  %3427 = vmatprep.subr.mxu0 %v2167_v6  ;;  %v2094_v42 = vld [vmem:[#allocation4 + $0x1250] sm:$0xff]  ;;  %v1897_v43 = vld [vmem:[#allocation4 + $0xc28] sm:$0xff] }
 0x2bd   : > { %3357 = vmatpush1.msra.mxu1 %v1974_v41  ;;  %3428 = vmatpush1.msra.mxu0 %v2166_v2  ;;  %v2089_v6 = vld [vmem:[#allocation4 + $0x1228] sm:$0xff]  ;;  %v1896_v41 = vld [vmem:[#allocation4 + $0xc20] sm:$0xff] }
 0x2be   : > { %3358 = vmatprep.subr.mxu1 %v1969_v10  ;;  %3429 = vmatprep.subr.mxu0 %v2161_v44  ;;  %v2088_v2 = vld [vmem:[#allocation4 + $0x1220] sm:$0xff]  ;;  %v2083_v10 = vld [vmem:[#allocation4 + $0x11f8] sm:$0xff] }
 0x2bf   : > { %3359 = vmatpush1.msra.mxu1 %v1968_v45  ;;  %3430 = vmatpush1.msra.mxu0 %v2160_v46  ;;  %v2275_v44 = vld [vmem:[#allocation4 + $0x17f8] sm:$0xff]  ;;  %v2082_v45 = vld [vmem:[#allocation4 + $0x11f0] sm:$0xff] }
 0x2c0   : > { %3360 = vmatprep.subr.mxu1 %v1963_v53  ;;  %3431 = vmatprep.subr.mxu0 %v2155_v47  ;;  %v2274_v46 = vld [vmem:[#allocation4 + $0x17f0] sm:$0xff]  ;;  %v2077_v53 = vld [vmem:[#allocation4 + $0x11c8] sm:$0xff] }
 0x2c1   : > { %3361 = vmatpush1.msra.mxu1 %v1962_v48  ;;  %3432 = vmatpush1.msra.mxu0 %v2154_v49  ;;  %v2269_v47 = vld [vmem:[#allocation4 + $0x17c8] sm:$0xff]  ;;  %v2076_v48 = vld [vmem:[#allocation4 + $0x11c0] sm:$0xff] }
 0x2c2   : > { %3362 = vmatprep.subr.mxu1 %v1957_v51  ;;  %3433 = vmatprep.subr.mxu0 %v2149_v52  ;;  %v2268_v49 = vld [vmem:[#allocation4 + $0x17c0] sm:$0xff]  ;;  %v2071_v51 = vld [vmem:[#allocation4 + $0x1198] sm:$0xff] }
 0x2c3   : > { %3363 = vmatpush1.msra.mxu1 %v1956_v55  ;;  %3434 = vmatpush1.msra.mxu0 %v2148_v57  ;;  %v2263_v52 = vld [vmem:[#allocation4 + $0x1798] sm:$0xff]  ;;  %v2070_v55 = vld [vmem:[#allocation4 + $0x1190] sm:$0xff] }
 0x2c4   : > { %3364 = vmatprep.subr.mxu1 %v1951_v59  ;;  %3435 = vmatprep.subr.mxu0 %v2143_v60  ;;  %v2262_v57 = vld [vmem:[#allocation4 + $0x1790] sm:$0xff]  ;;  %v2065_v59 = vld [vmem:[#allocation4 + $0x1168] sm:$0xff] }
 0x2c5   : > { %3365 = vmatpush1.msra.mxu1 %v1950_v61  ;;  %3436 = vmatpush1.msra.mxu0 %v2142_v62  ;;  %v2257_v60 = vld [vmem:[#allocation4 + $0x1768] sm:$0xff]  ;;  %v2064_v61 = vld [vmem:[#allocation4 + $0x1160] sm:$0xff] }
 0x2c6   : > { %3366 = vmatprep.subr.mxu1 %v1945_v1  ;;  %3437 = vmatprep.subr.mxu0 %v2137_v3  ;;  %v2256_v62 = vld [vmem:[#allocation4 + $0x1760] sm:$0xff]  ;;  %v2059_v1 = vld [vmem:[#allocation4 + $0x1138] sm:$0xff] }
 0x2c7   : > { %3367 = vmatpush1.msra.mxu1 %v1944_v5  ;;  %3438 = vmatpush1.msra.mxu0 %v2136_v7  ;;  %v2251_v3 = vld [vmem:[#allocation4 + $0x1738] sm:$0xff]  ;;  %v2058_v5 = vld [vmem:[#allocation4 + $0x1130] sm:$0xff] }
 0x2c8   : > { %3368 = vmatprep.subr.mxu1 %v1939_v9  ;;  %3439 = vmatprep.subr.mxu0 %v2131_v11  ;;  %v2250_v7 = vld [vmem:[#allocation4 + $0x1730] sm:$0xff]  ;;  %v2053_v9 = vld [vmem:[#allocation4 + $0x1108] sm:$0xff] }
 0x2c9   : > { %3369 = vmatpush1.msra.mxu1 %v1938_v12  ;;  %3440 = vmatpush1.msra.mxu0 %v2130_v13  ;;  %v2245_v11 = vld [vmem:[#allocation4 + $0x1708] sm:$0xff]  ;;  %v2052_v12 = vld [vmem:[#allocation4 + $0x1100] sm:$0xff] }
 0x2ca   : > { %3370 = vmatprep.subr.mxu1 %v1933_v39  ;;  %3441 = vmatprep.subr.mxu0 %v2125_v14  ;;  %v2244_v13 = vld [vmem:[#allocation4 + $0x1700] sm:$0xff]  ;;  %v2047_v39 = vld [vmem:[#allocation4 + $0x10d8] sm:$0xff] }
 0x2cb   : > { %3371 = vmatpush1.msra.mxu1 %v1932_v31  ;;  %3442 = vmatpush1.msra.mxu0 %v2124_v15  ;;  %v2239_v14 = vld [vmem:[#allocation4 + $0x16d8] sm:$0xff]  ;;  %v4992_v31 = vpop.f32.mrf.mxu1  ;;  %v2046_v15 = vld [vmem:[#allocation4 + $0x10d0] sm:$0xff] }
 0x2cc   : > { %3372 = vmatprep.subr.mxu1 %v1927_v16  ;;  %3443 = vmatprep.subr.mxu0 %v2119_v17  ;;  %v2238_v16 = vld [vmem:[#allocation4 + $0x16d0] sm:$0xff]  ;;  %v2041_v17 = vld [vmem:[#allocation4 + $0x10a8] sm:$0xff] }
 0x2cd   : > { %3373 = vmatpush1.msra.mxu1 %v1926_v18  ;;  %3444 = vmatpush1.msra.mxu0 %v2118_v20  ;;  %v2233_v18 = vld [vmem:[#allocation4 + $0x16a8] sm:$0xff]  ;;  %v2040_v20 = vld [vmem:[#allocation4 + $0x10a0] sm:$0xff] }
 0x2ce   : > { %3374 = vmatprep.subr.mxu1 %v1921_v22  ;;  %3445 = vmatprep.subr.mxu0 %v2113_v23  ;;  %v2232_v22 = vld [vmem:[#allocation4 + $0x16a0] sm:$0xff]  ;;  %v2035_v23 = vld [vmem:[#allocation4 + $0x1078] sm:$0xff] }
 0x2cf   : > { %3375 = vmatpush1.msra.mxu1 %v1920_v24  ;;  %3446 = vmatpush1.msra.mxu0 %v2112_v26  ;;  %v2227_v24 = vld [vmem:[#allocation4 + $0x1678] sm:$0xff]  ;;  %v2568_v26 = vpop.f32.mrf.mxu1 }
 0x2d0   : > { %3376 = vmatprep.subr.mxu1 %v1915_v27  ;;  %3447 = vmatprep.subr.mxu0 %v2107_v29  ;;  %v4994_v27 = vpop.f32.mrf.mxu0  ;;  %v2034_v29 = vld [vmem:[#allocation4 + $0x1070] sm:$0xff] }
 0x2d1   : > { %3377 = vmatpush1.msra.mxu1 %v1914_v32  ;;  %3448 = vmatpush1.msra.mxu0 %v2106_v33  ;;  %v2226_v32 = vld [vmem:[#allocation4 + $0x1670] sm:$0xff]  ;;  %v2029_v33 = vld [vmem:[#allocation4 + $0x1048] sm:$0xff] }
 0x2d2   : > { %3378 = vmatprep.subr.mxu1 %v1909_v34  ;;  %3449 = vmatprep.subr.mxu0 %v2101_v35  ;;  %v2221_v34 = vld [vmem:[#allocation4 + $0x1648] sm:$0xff] }
 0x2d3   : > { %3379 = vmatpush1.msra.mxu1 %v1908_v36  ;;  %3450 = vmatpush1.msra.mxu0 %v2100_v37  ;;  %v4996_v35 = vld [vmem:[#allocation6 + $0xa] sm:$0x3f]  ;;  %v4998_v36 = vpop.f32.mrf.mxu1  ;;  %v2028_v37 = vld [vmem:[#allocation4 + $0x1040] sm:$0xff] }
 0x2d4   : > { %3380 = vmatprep.subr.mxu1 %v1903_v38  ;;  %3451 = vmatprep.subr.mxu0 %v2095_v40  ;;  %v2220_v38 = vld [vmem:[#allocation4 + $0x1640] sm:$0xff]  ;;  %v2477_v40 = vrot.slane %v4996_v35, %v4912_v8 }
 0x2d5   : > { %3381 = vmatpush1.msra.mxu1 %v1902_v4  ;;  %3452 = vmatpush1.msra.mxu0 %v2094_v42  ;;  %v2023_v4 = vld [vmem:[#allocation4 + $0x1018] sm:$0xff]  ;;  %v2208_v8 = vld [vmem:[#allocation4 + $0x15e0] sm:$0xff] }
 0x2d6   : > { %3382 = vmatprep.subr.mxu1 %v1897_v43  ;;  %3453 = vmatprep.subr.mxu0 %v2089_v6  ;;  %v2215_v42 = vld [vmem:[#allocation4 + $0x1618] sm:$0xff]  ;;  %v2639_v43 = vpop.f32.mrf.mxu0  ;;  %v2022_v6 = vld [vmem:[#allocation4 + $0x1010] sm:$0xff] }
 0x2d7   : > { %3383 = vmatpush1.msra.mxu1 %v1896_v41  ;;  %3454 = vmatpush1.msra.mxu0 %v2088_v2  ;;  %v2214_v41 = vld [vmem:[#allocation4 + $0x1610] sm:$0xff]  ;;  %v2017_v2 = vld [vmem:[#allocation4 + $0xfe8] sm:$0xff] }
 0x2d8   : > { %3384 = vmatprep.subr.mxu1 %v2083_v10  ;;  %3455 = vmatprep.subr.mxu0 %v2275_v44  ;;  %v2209_v10 = vld [vmem:[#allocation4 + $0x15e8] sm:$0xff]  ;;  %v2710_v44 = vpop.f32.mrf.mxu1 }
 0x2d9   : > { %3385 = vmatpush2.msra.mxu1 %v2082_v45  ;;  %3456 = vmatpush2.msra.mxu0 %v2274_v46  ;;  %v5002_v45 = vpop.f32.mrf.mxu0  ;;  %v2016_v46 = vld [vmem:[#allocation4 + $0xfe0] sm:$0xff] }
 0x2da   : > { %3386 = vmatprep.subr.mxu1 %v2077_v53  ;;  %3457 = vmatprep.subr.mxu0 %v2269_v47  ;;  %v2569_v53 = vadd.f32 %v2568_v26, %v2477_v40  ;;  %v2011_v47 = vld [vmem:[#allocation4 + $0xfb8] sm:$0xff]  ;;  %v3601_v26 = vld [vmem:[%s5410_s4 + $0xf0] sm:$0xff]  ;;  %v3583_v40 = vld [vmem:[%s5410_s4 + $0x60] sm:$0xff] }
 0x2db   : > { %3387 = vmatpush2.msra.mxu1 %v2076_v48  ;;  %3458 = vmatpush2.msra.mxu0 %v2268_v49  ;;  %v2203_v48 = vld [vmem:[#allocation4 + $0x15b8] sm:$0xff]  ;;  %v5004_v49 = vpop.f32.mrf.mxu1 }
 0x2dc   : > { %3388 = vmatprep.subr.mxu1 %v2071_v51  ;;  %3459 = vmatprep.subr.mxu0 %v2263_v52  ;;  %v2010_v51 = vld [vmem:[#allocation4 + $0xfb0] sm:$0xff] }
 0x2dd   : > { %3389 = vmatpush2.msra.mxu1 %v2070_v55  ;;  %3460 = vmatpush2.msra.mxu0 %v2262_v57  ;;  %v2202_v52 = vld [vmem:[#allocation4 + $0x15b0] sm:$0xff]  ;;  %v2640_v55 = vadd.f32 %v2639_v43, %v2569_v53  ;;  %v2005_v57 = vld [vmem:[#allocation4 + $0xf88] sm:$0xff] }
 0x2de   : > { %3390 = vmatprep.subr.mxu1 %v2065_v59  ;;  %3461 = vmatprep.subr.mxu0 %v2257_v60  ;;  %v2197_v59 = vld [vmem:[#allocation4 + $0x1588] sm:$0xff]  ;;  %v2781_v60 = vpop.f32.mrf.mxu0  ;;  %v2346_v43 = vld [vmem:[#allocation4 + $0x1a30] sm:$0xff] }
 0x2df   : > { %3391 = vmatpush2.msra.mxu1 %v2064_v61  ;;  %3462 = vmatpush2.msra.mxu0 %v2256_v62  ;;  %v2004_v61 = vld [vmem:[#allocation4 + $0xf80] sm:$0xff]  ;;  %v2334_v53 = vld [vmem:[#allocation4 + $0x19d0] sm:$0xff] }
 0x2e0   : > { %3392 = vmatprep.subr.mxu1 %v2059_v1  ;;  %3463 = vmatprep.subr.mxu0 %v2251_v3  ;;  %v2196_v62 = vld [vmem:[#allocation4 + $0x1580] sm:$0xff]  ;;  %v2711_v1 = vadd.f32 %v2710_v44, %v2640_v55  ;;  %v1999_v3 = vld [vmem:[#allocation4 + $0xf58] sm:$0xff]  ;;  %v3581_v44 = vld [vmem:[%s5410_s4 + $0x50] sm:$0xff] }
 0x2e1   : > { %3393 = vmatpush2.msra.mxu1 %v2058_v5  ;;  %3464 = vmatpush2.msra.mxu0 %v2250_v7  ;;  %v2191_v5 = vld [vmem:[#allocation4 + $0x1558] sm:$0xff]  ;;  %v2852_v7 = vpop.f32.mrf.mxu1  ;;  %v3579_v55 = vld [vmem:[%s5410_s4 + $0x40] sm:$0xff] }
 0x2e2   : > { %3394 = vmatprep.subr.mxu1 %v2053_v9  ;;  %3465 = vmatprep.subr.mxu0 %v2245_v11  ;;  %v1998_v9 = vld [vmem:[#allocation4 + $0xf50] sm:$0xff] }
 0x2e3   : > { %3395 = vmatpush2.msra.mxu1 %v2052_v12  ;;  %3466 = vmatpush2.msra.mxu0 %v2244_v13  ;;  %v2190_v11 = vld [vmem:[#allocation4 + $0x1550] sm:$0xff]  ;;  %v2782_v12 = vadd.f32 %v2781_v60, %v2711_v1  ;;  %v1993_v13 = vld [vmem:[#allocation4 + $0xf28] sm:$0xff]  ;;  %v2473_v60 = vrot.slane %v4996_v35, %v4907_v63 }
 0x2e4   : > { %3396 = vmatprep.subr.mxu1 %v2047_v39  ;;  %3467 = vmatprep.subr.mxu0 %v2239_v14  ;;  %v2185_v39 = vld [vmem:[#allocation4 + $0x1528] sm:$0xff]  ;;  %v1992_v14 = vld [vmem:[#allocation4 + $0xf20] sm:$0xff] }
 0x2e5   : > { %3397 = vmatpush2.msra.mxu1 %v2046_v15  ;;  %3468 = vmatpush2.msra.mxu0 %v2238_v16  ;;  %v2184_v15 = vld [vmem:[#allocation4 + $0x1520] sm:$0xff]  ;;  %v2853_v16 = vadd.f32 %v2852_v7, %v2782_v12  ;;  %v2317_v1 = vld [vmem:[#allocation4 + $0x1948] sm:$0xff]  ;;  %v3577_v7 = vld [vmem:[%s5410_s4 + $0x30] sm:$0xff]  ;;  %v2567_v12 = vadd.f32 %v4992_v31, %v2473_v60 }
 0x2e6   : > { %3398 = vmatprep.subr.mxu1 %v2041_v17  ;;  %3469 = vmatprep.subr.mxu0 %v2233_v18  ;;  %v2371_v17 = vld [vmem:[#allocation4 + $0x1af8] sm:$0xff]  ;;  %v3575_v31 = vld [vmem:[%s5410_s4 + $0x20] sm:$0xff]  ;;  %v2418_v60 = vld [vmem:[#allocation4 + $0x1c70] sm:$0xff] }
 0x2e7   : > { %3399 = vmatpush2.msra.mxu1 %v2040_v20  ;;  %3470 = vmatpush2.msra.mxu0 %v2232_v22  ;;  %v3602_v18 = vld [vmem:[%s5410_s4 + $0xf8] sm:$0xff]  ;;  %v2370_v20 = vld [vmem:[#allocation4 + $0x1af0] sm:$0xff] }
 0x2e8   : > { %3400 = vmatprep.subr.mxu1 %v2035_v23  ;;  %3471 = vmatprep.subr.mxu0 %v2227_v24  ;;  %v3586_v22 = vld [vmem:[%s5410_s4 + $0x78] sm:$0xff]  ;;  %v3566_v23 = vmax.f32 %v2853_v16, 0.0  ;;  %v2365_v24 = vld [vmem:[#allocation4 + $0x1ac8] sm:$0xff]  ;;  %v2638_v16 = vadd.f32 %v4994_v27, %v2567_v12 }
 0x2e9   : > { %3401 = vmatpush2.msra.mxu1 %v2034_v29  ;;  %3472 = vmatpush2.msra.mxu0 %v2226_v32  ;;  %v2364_v29 = vld [vmem:[#allocation4 + $0x1ac0] sm:$0xff]  ;;  %v3600_v32 = vld [vmem:[%s5410_s4 + $0xe8] sm:$0xff]  ;;  %v3574_v27 = vld [vmem:[%s5410_s4 + $0x18] sm:$0xff] }
 0x2ea   : > { %3402 = vmatprep.subr.mxu1 %v2029_v33  ;;  %3473 = vmatprep.subr.mxu0 %v2221_v34  ;;  %v2358_v33 = vld [vmem:[#allocation4 + $0x1a90] sm:$0xff]  ;;  %v3584_v34 = vld [vmem:[%s5410_s4 + $0x68] sm:$0xff] }
 0x2eb   : > { %3403 = vmatpush2.msra.mxu1 %v2028_v37  ;;  %3474 = vmatpush2.msra.mxu0 %v2220_v38  ;;  %v3599_v37 = vld [vmem:[%s5410_s4 + $0xe0] sm:$0xff] }
 0x2ec   : > { %3404 = vmatprep.subr.mxu1 %v2023_v4  ;;  %3475 = vmatprep.subr.mxu0 %v2215_v42  ;;  %v2352_v38 = vld [vmem:[#allocation4 + $0x1a60] sm:$0xff]  ;;  %v2347_v4 = vld [vmem:[#allocation4 + $0x1a38] sm:$0xff] }
 0x2ed   : > { %3405 = vmatpush2.msra.mxu1 %v2022_v6  ;;  %3476 = vmatpush2.msra.mxu0 %v2214_v41  ;;  %v3598_v42 = vld [vmem:[%s5410_s4 + $0xd8] sm:$0xff]  ;;  %v2341_v41 = vld [vmem:[#allocation4 + $0x1a08] sm:$0xff] }
 0x2ee   : > { %3406 = vmatprep.subr.mxu1 %v2017_v2  ;;  %3477 = vmatprep.subr.mxu0 %v2209_v10  ;;  %v3582_v6 = vld [vmem:[%s5410_s4 + $0x58] sm:$0xff]  ;;  %v3597_v2 = vld [vmem:[%s5410_s4 + $0xd0] sm:$0xff]  ;;  %v2340_v10 = vld [vmem:[#allocation4 + $0x1a00] sm:$0xff] }
 0x2ef   : > { %3407 = vmatpush2.msra.mxu1 %v2016_v46  ;;  %3478 = vmatpush2.msra.mxu0 %v2208_v8  ;;  %v2335_v46 = vld [vmem:[#allocation4 + $0x19d8] sm:$0xff]  ;;  %v3596_v8 = vld [vmem:[%s5410_s4 + $0xc8] sm:$0xff] }
 0x2f0   : > { %3408 = vmatprep.subr.mxu1 %v2011_v47  ;;  %3479 = vmatprep.subr.mxu0 %v2203_v48  ;;  %v3580_v47 = vld [vmem:[%s5410_s4 + $0x48] sm:$0xff] }
 0x2f1   : > { %3409 = vmatpush2.msra.mxu1 %v2010_v51  ;;  %3480 = vmatpush2.msra.mxu0 %v2202_v52  ;;  %v2329_v48 = vld [vmem:[#allocation4 + $0x19a8] sm:$0xff]  ;;  %v3595_v51 = vld [vmem:[%s5410_s4 + $0xc0] sm:$0xff] }
 0x2f2   : > { %3410 = vmatprep.subr.mxu1 %v2005_v57  ;;  %3481 = vmatprep.subr.mxu0 %v2197_v59  ;;  %v2328_v52 = vld [vmem:[#allocation4 + $0x19a0] sm:$0xff]  ;;  %v2323_v57 = vld [vmem:[#allocation4 + $0x1978] sm:$0xff] }
 0x2f3   : > { %3411 = vmatpush2.msra.mxu1 %v2004_v61  ;;  %3482 = vmatpush2.msra.mxu0 %v2196_v62  ;;  %v3594_v59 = vld [vmem:[%s5410_s4 + $0xb8] sm:$0xff]  ;;  %v2322_v61 = vld [vmem:[#allocation4 + $0x1970] sm:$0xff] }
 0x2f4   : > { %3412 = vmatprep.subr.mxu1 %v1999_v3  ;;  %3483 = vmatprep.subr.mxu0 %v2191_v5  ;;  %v3578_v62 = vld [vmem:[%s5410_s4 + $0x38] sm:$0xff]  ;;  %v3593_v3 = vld [vmem:[%s5410_s4 + $0xb0] sm:$0xff]  ;;  %v2316_v5 = vld [vmem:[#allocation4 + $0x1940] sm:$0xff] }
 0x2f5   : > { %3413 = vmatpush2.msra.mxu1 %v1998_v9  ;;  %3484 = vmatpush2.msra.mxu0 %v2190_v11  ;;  %v2311_v9 = vld [vmem:[#allocation4 + $0x1918] sm:$0xff]  ;;  %v3592_v11 = vld [vmem:[%s5410_s4 + $0xa8] sm:$0xff] }
 0x2f6   : > { %3414 = vmatprep.subr.mxu1 %v1993_v13  ;;  %3485 = vmatprep.subr.mxu0 %v2185_v39  ;;  %v2310_v13 = vld [vmem:[#allocation4 + $0x1910] sm:$0xff]  ;;  %v3576_v39 = vld [vmem:[%s5410_s4 + $0x28] sm:$0xff] }
 0x2f7   : > { %3415 = vmatpush2.msra.mxu1 %v1992_v14  ;;  %3486 = vmatpush2.msra.mxu0 %v2184_v15  ;;  %v2305_v14 = vld [vmem:[#allocation4 + $0x18e8] sm:$0xff]  ;;  %v3591_v15 = vld [vmem:[%s5410_s4 + $0xa0] sm:$0xff] }
 0x2f8   : > { %3417 = vmatmul.mubr.f32.vlgmr.msra.gmra.mxu1 %v4954_v56  ;;  %3488 = vmatmul.mubr.f32.vlgmr.msra.gmra.mxu0 %v4964_v50  ;;  %v3585_v56 = vld [vmem:[%s5410_s4 + $0x70] sm:$0xff]  ;;  %v2359_v50 = vld [vmem:[#allocation4 + $0x1a98] sm:$0xff] }
 0x2f9   : > { %3494 = vmatprep.subr.mxu1 %v2371_v17  ;;  %4435 = vmatprep.subr.mxu0 %v3602_v18  ;;  %v2304_v17 = vld [vmem:[#allocation4 + $0x18e0] sm:$0xff]  ;;  %v2299_v18 = vld [vmem:[#allocation4 + $0x18b8] sm:$0xff] }
 0x2fa   : > { %3495 = vmatpush1.msra.mxu1 %v2370_v20  ;;  %3558 = vmatprep.mubr.f32.mxu1 %v4971_v19  ;;  %v2353_v19 = vld [vmem:[#allocation4 + $0x1a68] sm:$0xff]  ;;  %v3590_v20 = vld [vmem:[%s5410_s4 + $0x98] sm:$0xff] }
 0x2fb   : > { %4436 = vmatpush3.msra.mxu0 %v3586_v22  ;;  %3738 = vmatprep.mubr.f32.mxu0 %v3566_v23  ;;  %v2709_v22 = vadd.f32 %v4998_v36, %v2638_v16  ;;  %v2298_v23 = vld [vmem:[#allocation4 + $0x18b0] sm:$0xff] }
 0x2fc   : > { %3496 = vmatprep.subr.mxu1 %v2365_v24  ;;  %4437 = vmatprep.subr.mxu0 %v3601_v26  ;;  %v2293_v24 = vld [vmem:[#allocation4 + $0x1888] sm:$0xff]  ;;  %v3589_v26 = vld [vmem:[%s5410_s4 + $0x90] sm:$0xff] }
 0x2fd   : > { %3497 = vmatpush1.msra.mxu1 %v2364_v29  ;;  %4438 = vmatpush3.msra.mxu0 %v3585_v56  ;;  %v2780_v29 = vadd.f32 %v5002_v45, %v2709_v22  ;;  %v2292_v56 = vld [vmem:[#allocation4 + $0x1880] sm:$0xff]  ;;  %v3573_v36 = vld [vmem:[%s5410_s4 + $0x10] sm:$0xff]  ;;  %v3572_v45 = vld [vmem:[%s5410_s4 + $0x8] sm:$0xff] }
 0x2fe   : > { %3498 = vmatprep.subr.mxu1 %v2359_v50  ;;  %4439 = vmatprep.subr.mxu0 %v3600_v32  ;;  %v2287_v50 = vld [vmem:[#allocation4 + $0x1858] sm:$0xff]  ;;  %v3588_v32 = vld [vmem:[%s5410_s4 + $0x88] sm:$0xff]  ;;  %v2394_v16 = vld [vmem:[#allocation4 + $0x1bb0] sm:$0xff] }
 0x2ff   : > { %3499 = vmatpush1.msra.mxu1 %v2358_v33  ;;  %4440 = vmatpush3.msra.mxu0 %v3584_v34  ;;  %v2851_v33 = vadd.f32 %v5004_v49, %v2780_v29  ;;  %v2286_v34 = vld [vmem:[#allocation4 + $0x1850] sm:$0xff]  ;;  %v3571_v49 = vld [vmem:[%s5410_s4] sm:$0xff] }
 0x300   : > { %3500 = vmatprep.subr.mxu1 %v2353_v19  ;;  %4441 = vmatprep.subr.mxu0 %v3599_v37  ;;  %v2281_v19 = vld [vmem:[#allocation4 + $0x1828] sm:$0xff]  ;;  %v3587_v37 = vld [vmem:[%s5410_s4 + $0x80] sm:$0xff]  ;;  %v2382_v22 = vld [vmem:[#allocation4 + $0x1b50] sm:$0xff] }
 0x301   : > { %3501 = vmatpush1.msra.mxu1 %v2352_v38  ;;  %4442 = vmatpush3.msra.mxu0 %v3583_v40  ;;  %v2280_v38 = vld [vmem:[#allocation4 + $0x1820] sm:$0xff]  ;;  %v2467_v40 = vld [vmem:[#allocation4 + $0x1df8] sm:$0xff] }
 0x302   : > { %3502 = vmatprep.subr.mxu1 %v2347_v4  ;;  %4443 = vmatprep.subr.mxu0 %v3598_v42  ;;  %v3565_v4 = vmax.f32 %v2851_v33, 0.0  ;;  %v2466_v42 = vld [vmem:[#allocation4 + $0x1df0] sm:$0xff]  ;;  %v2376_v29 = vld [vmem:[#allocation4 + $0x1b20] sm:$0xff] }
 0x303   : > { %3503 = vmatpush1.msra.mxu1 %v2346_v43  ;;  %4444 = vmatpush3.msra.mxu0 %v3582_v6  ;;  %v2461_v43 = vld [vmem:[#allocation4 + $0x1dc8] sm:$0xff]  ;;  %v2460_v6 = vld [vmem:[#allocation4 + $0x1dc0] sm:$0xff] }
 0x304   : > { %3504 = vmatprep.subr.mxu1 %v2341_v41  ;;  %4445 = vmatprep.subr.mxu0 %v3597_v2  ;;  %v2455_v41 = vld [vmem:[#allocation4 + $0x1d98] sm:$0xff]  ;;  %v2454_v2 = vld [vmem:[#allocation4 + $0x1d90] sm:$0xff] }
 0x305   : > { %3505 = vmatpush1.msra.mxu1 %v2340_v10  ;;  %4446 = vmatpush3.msra.mxu0 %v3581_v44  ;;  %v2449_v10 = vld [vmem:[#allocation4 + $0x1d68] sm:$0xff]  ;;  %v2448_v44 = vld [vmem:[#allocation4 + $0x1d60] sm:$0xff] }
 0x306   : > { %3506 = vmatprep.subr.mxu1 %v2335_v46  ;;  %4447 = vmatprep.subr.mxu0 %v3596_v8  ;;  %v2443_v46 = vld [vmem:[#allocation4 + $0x1d38] sm:$0xff]  ;;  %v2442_v8 = vld [vmem:[#allocation4 + $0x1d30] sm:$0xff] }
 0x307   : > { %3507 = vmatpush1.msra.mxu1 %v2334_v53  ;;  %4448 = vmatpush3.msra.mxu0 %v3580_v47  ;;  %v2437_v53 = vld [vmem:[#allocation4 + $0x1d08] sm:$0xff]  ;;  %v2436_v47 = vld [vmem:[#allocation4 + $0x1d00] sm:$0xff] }
 0x308   : > { %3508 = vmatprep.subr.mxu1 %v2329_v48  ;;  %4449 = vmatprep.subr.mxu0 %v3595_v51  ;;  %v2431_v48 = vld [vmem:[#allocation4 + $0x1cd8] sm:$0xff]  ;;  %v2430_v51 = vld [vmem:[#allocation4 + $0x1cd0] sm:$0xff] }
 0x309   : > { %3509 = vmatpush1.msra.mxu1 %v2328_v52  ;;  %4450 = vmatpush3.msra.mxu0 %v3579_v55  ;;  %v2425_v52 = vld [vmem:[#allocation4 + $0x1ca8] sm:$0xff]  ;;  %v2424_v55 = vld [vmem:[#allocation4 + $0x1ca0] sm:$0xff] }
 0x30a   : > { %3510 = vmatprep.subr.mxu1 %v2323_v57  ;;  %4451 = vmatprep.subr.mxu0 %v3594_v59  ;;  %v2419_v57 = vld [vmem:[#allocation4 + $0x1c78] sm:$0xff]  ;;  %v5112_v59 = vpop.f32.mrf.mxu0 }
 0x30b   : > { %3511 = vmatpush1.msra.mxu1 %v2322_v61  ;;  %4452 = vmatpush3.msra.mxu0 %v3578_v62  ;;  %v2413_v61 = vld [vmem:[#allocation4 + $0x1c48] sm:$0xff]  ;;  %v5114_v62 = vpop.f32.mrf.mxu1 }
 0x30c   : > { %3512 = vmatprep.subr.mxu1 %v2317_v1  ;;  %4453 = vmatprep.subr.mxu0 %v3593_v3  ;;  %v2412_v1 = vld [vmem:[#allocation4 + $0x1c40] sm:$0xff]  ;;  %v2485_v3 = vrot.slane %v4996_v35, %v748_v58  ;;  %v2389_v58 = vld [vmem:[#allocation4 + $0x1b88] sm:$0xff] }
 0x30d   : > { %3513 = vmatpush1.msra.mxu1 %v2316_v5  ;;  %4454 = vmatpush3.msra.mxu0 %v3577_v7  ;;  %v2407_v5 = vld [vmem:[#allocation4 + $0x1c18] sm:$0xff]  ;;  %v2923_v7 = vpop.f32.mrf.mxu0 }
 0x30e   : > { %3514 = vmatprep.subr.mxu1 %v2311_v9  ;;  %4455 = vmatprep.subr.mxu0 %v3592_v11  ;;  %v2406_v9 = vld [vmem:[#allocation4 + $0x1c10] sm:$0xff]  ;;  %v2401_v11 = vld [vmem:[#allocation4 + $0x1be8] sm:$0xff] }
 0x30f   : > { %3515 = vmatpush1.msra.mxu1 %v2310_v13  ;;  %4456 = vmatpush3.msra.mxu0 %v3576_v39  ;;  %v5119_v12 = vpop.f32.mrf.mxu0  ;;  %v2994_v13 = vpop.f32.mrf.mxu1  ;;  %v2400_v39 = vld [vmem:[#allocation4 + $0x1be0] sm:$0xff] }
 0x310   : > { %3516 = vmatprep.subr.mxu1 %v2305_v14  ;;  %4457 = vmatprep.subr.mxu0 %v3591_v15  ;;  %v2924_v14 = vadd.f32 %v2923_v7, %v2485_v3  ;;  %v2395_v15 = vld [vmem:[#allocation4 + $0x1bb8] sm:$0xff]  ;;  %v3621_v3 = vld [vmem:[%s5410_s4 + $0x190] sm:$0xff]  ;;  %v3620_v7 = vld [vmem:[%s5410_s4 + $0x188] sm:$0xff] }
 0x311   : > { %3517 = vmatpush1.msra.mxu1 %v2304_v17  ;;  %4458 = vmatpush3.msra.mxu0 %v3575_v31  ;;  %v3065_v31 = vpop.f32.mrf.mxu0 }
 0x312   : > { %3518 = vmatprep.subr.mxu1 %v2299_v18  ;;  %4459 = vmatprep.subr.mxu0 %v3590_v20  ;;  %v2995_v17 = vadd.f32 %v2994_v13, %v2924_v14  ;;  %v2388_v18 = vld [vmem:[#allocation4 + $0x1b80] sm:$0xff]  ;;  %v2383_v20 = vld [vmem:[#allocation4 + $0x1b58] sm:$0xff] }
 0x313   : > { %3519 = vmatpush1.msra.mxu1 %v2298_v23  ;;  %4460 = vmatpush3.msra.mxu0 %v3574_v27  ;;  %v3603_v13 = vld [vmem:[%s5410_s4 + $0x100] sm:$0xff]  ;;  %v3666_v14 = vld [vmem:[%s5410_s4 + $0x2f8] sm:$0xff] }
 0x314   : > { %3520 = vmatprep.subr.mxu1 %v2293_v24  ;;  %4461 = vmatprep.subr.mxu0 %v3589_v26  ;;  %v3066_v24 = vadd.f32 %v3065_v31, %v2995_v17  ;;  %v2377_v26 = vld [vmem:[#allocation4 + $0x1b28] sm:$0xff]  ;;  %v3649_v17 = vld [vmem:[%s5410_s4 + $0x270] sm:$0xff] }
 0x315   : > { %3521 = vmatpush1.msra.mxu1 %v2292_v56  ;;  %4462 = vmatpush3.msra.mxu0 %v3573_v36  ;;  %v3634_v36 = vld [vmem:[%s5410_s4 + $0x1f8] sm:$0xff]  ;;  %v3648_v31 = vld [vmem:[%s5410_s4 + $0x268] sm:$0xff] }
 0x316   : > { %3522 = vmatprep.subr.mxu1 %v2287_v50  ;;  %4463 = vmatprep.subr.mxu0 %v3588_v32  ;;  %v3618_v32 = vld [vmem:[%s5410_s4 + $0x178] sm:$0xff] }
 0x317   : > { %3523 = vmatpush1.msra.mxu1 %v2286_v34  ;;  %4464 = vmatpush3.msra.mxu0 %v3572_v45  ;;  %v3633_v45 = vld [vmem:[%s5410_s4 + $0x1f0] sm:$0xff] }
 0x318   : > { %3524 = vmatprep.subr.mxu1 %v2281_v19  ;;  %4465 = vmatprep.subr.mxu0 %v3587_v37  ;;  %v3617_v19 = vld [vmem:[%s5410_s4 + $0x170] sm:$0xff] }
 0x319   : > { %3525 = vmatpush1.msra.mxu1 %v2280_v38  ;;  %4466 = vmatpush3.msra.mxu0 %v3571_v49  ;;  %v3632_v38 = vld [vmem:[%s5410_s4 + $0x1e8] sm:$0xff] }
 0x31a   : > { %3526 = vmatprep.subr.mxu1 %v2467_v40  ;;  %3739 = vmatmul.mubr.f32.vlgmr.msra.gmra.mxu0 %v3565_v4  ;;  %v3616_v49 = vld [vmem:[%s5410_s4 + $0x168] sm:$0xff]  ;;  %v3615_v40 = vld [vmem:[%s5410_s4 + $0x160] sm:$0xff]  ;;  %v3630_v4 = vld [vmem:[%s5410_s4 + $0x1d8] sm:$0xff] }
 0x31b   : > { %3527 = vmatpush2.msra.mxu1 %v2466_v42  ;;  %v3614_v42 = vld [vmem:[%s5410_s4 + $0x158] sm:$0xff]  ;;  %4505 = vmatprep.subr.mxu0 %v3666_v14 }
 0x31c   : > { %3528 = vmatprep.subr.mxu1 %v2461_v43  ;;  %v3629_v43 = vld [vmem:[%s5410_s4 + $0x1d0] sm:$0xff] }
 0x31d   : > { %3529 = vmatpush2.msra.mxu1 %v2460_v6  ;;  %v3613_v6 = vld [vmem:[%s5410_s4 + $0x150] sm:$0xff] }
 0x31e   : > { %3530 = vmatprep.subr.mxu1 %v2455_v41  ;;  %v3628_v41 = vld [vmem:[%s5410_s4 + $0x1c8] sm:$0xff] }
 0x31f   : > { %3531 = vmatpush2.msra.mxu1 %v2454_v2  ;;  %v2481_v2 = vrot.slane %v4996_v35, %v744_v30  ;;  %v3626_v30 = vld [vmem:[%s5410_s4 + $0x1b8] sm:$0xff] }
 0x320   : > { %3532 = vmatprep.subr.mxu1 %v2449_v10  ;;  %v3612_v10 = vld [vmem:[%s5410_s4 + $0x148] sm:$0xff] }
 0x321   : > { %3533 = vmatpush2.msra.mxu1 %v2448_v44  ;;  %v3627_v44 = vld [vmem:[%s5410_s4 + $0x1c0] sm:$0xff] }
 0x322   : > { %3534 = vmatprep.subr.mxu1 %v2443_v46  ;;  %v3611_v46 = vld [vmem:[%s5410_s4 + $0x140] sm:$0xff] }
 0x323   : > { %3535 = vmatpush2.msra.mxu1 %v2442_v8  ;;  %v2922_v8 = vadd.f32 %v5112_v59, %v2481_v2 }
 0x324   : > { %3536 = vmatprep.subr.mxu1 %v2437_v53  ;;  %v3610_v53 = vld [vmem:[%s5410_s4 + $0x138] sm:$0xff] }
 0x325   : > { %3537 = vmatpush2.msra.mxu1 %v2436_v47  ;;  %v3625_v47 = vld [vmem:[%s5410_s4 + $0x1b0] sm:$0xff] }
 0x326   : > { %3538 = vmatprep.subr.mxu1 %v2431_v48  ;;  %v2993_v48 = vadd.f32 %v5114_v62, %v2922_v8 }
 0x327   : > { %3539 = vmatpush2.msra.mxu1 %v2430_v51  ;;  %v3609_v51 = vld [vmem:[%s5410_s4 + $0x130] sm:$0xff] }
 0x328   : > { %3540 = vmatprep.subr.mxu1 %v2425_v52  ;;  %v3624_v52 = vld [vmem:[%s5410_s4 + $0x1a8] sm:$0xff]  ;;  %v3064_v59 = vadd.f32 %v5119_v12, %v2993_v48  ;;  %v3619_v12 = vld [vmem:[%s5410_s4 + $0x180] sm:$0xff] }
 0x329   : > { %3541 = vmatpush2.msra.mxu1 %v2424_v55  ;;  %v3608_v55 = vld [vmem:[%s5410_s4 + $0x128] sm:$0xff] }
 0x32a   : > { %3542 = vmatprep.subr.mxu1 %v2419_v57  ;;  %v3623_v57 = vld [vmem:[%s5410_s4 + $0x1a0] sm:$0xff] }
 0x32b   : > { %3543 = vmatpush2.msra.mxu1 %v2418_v60  ;;  %v3607_v60 = vld [vmem:[%s5410_s4 + $0x120] sm:$0xff] }
 0x32c   : > { %3544 = vmatprep.subr.mxu1 %v2413_v61  ;;  %v3622_v61 = vld [vmem:[%s5410_s4 + $0x198] sm:$0xff] }
 0x32d   : > { %3545 = vmatpush2.msra.mxu1 %v2412_v1  ;;  %v3606_v1 = vld [vmem:[%s5410_s4 + $0x118] sm:$0xff] }
 0x32e   : > { %3546 = vmatprep.subr.mxu1 %v2407_v5  ;;  %v3605_v5 = vld [vmem:[%s5410_s4 + $0x110] sm:$0xff] }
 0x32f   : > { %3547 = vmatpush2.msra.mxu1 %v2406_v9 }
 0x330   : > { %3548 = vmatprep.subr.mxu1 %v2401_v11  ;;  %v3604_v11 = vld [vmem:[%s5410_s4 + $0x108] sm:$0xff] }
 0x331   : > { %3549 = vmatpush2.msra.mxu1 %v2400_v39 }
 0x332   : > { %3550 = vmatprep.subr.mxu1 %v2395_v15  ;;  %v3650_v15 = vld [vmem:[%s5410_s4 + $0x278] sm:$0xff] }
 0x333   : > { %3551 = vmatpush2.msra.mxu1 %v2394_v16  ;;  %v3665_v16 = vld [vmem:[%s5410_s4 + $0x2f0] sm:$0xff]  ;;  %4506 = vmatpush3.msra.mxu0 %v3650_v15 }
 0x334   : > { %3552 = vmatprep.subr.mxu1 %v2389_v58  ;;  %v5121_v23 = vpop.f32.mrf.mxu1  ;;  %v5123_v27 = vpop.f32.mrf.mxu0  ;;  %v3664_v58 = vld [vmem:[%s5410_s4 + $0x2e8] sm:$0xff]  ;;  %4507 = vmatprep.subr.mxu0 %v3665_v16 }
 0x335   : > { %3553 = vmatpush2.msra.mxu1 %v2388_v18  ;;  %v3135_v62 = vadd.f32 %v5121_v23, %v3064_v59  ;;  %4508 = vmatpush3.msra.mxu0 %v3649_v17  ;;  %v3663_v18 = vld [vmem:[%s5410_s4 + $0x2e0] sm:$0xff]  ;;  %v3646_v23 = vld [vmem:[%s5410_s4 + $0x258] sm:$0xff]  ;;  %v4422_v17 = vld [vmem:[#allocation6 + $0x10] ss:$0 sm:$0xff] }
 0x336   : > { %3554 = vmatprep.subr.mxu1 %v2383_v20  ;;  %v3136_v56 = vpop.f32.mrf.mxu1  ;;  %v3207_v33 = vpop.f32.mrf.mxu0  ;;  %4509 = vmatprep.subr.mxu0 %v3664_v58  ;;  %v3647_v20 = vld [vmem:[%s5410_s4 + $0x260] sm:$0xff] }
 0x337   : > { %3555 = vmatpush2.msra.mxu1 %v2382_v22  ;;  %v3137_v50 = vadd.f32 %v3136_v56, %v3066_v24  ;;  %v3206_v9 = vadd.f32 %v5123_v27, %v3135_v62  ;;  %4510 = vmatpush3.msra.mxu0 %v3648_v31  ;;  %v3662_v22 = vld [vmem:[%s5410_s4 + $0x2d8] sm:$0xff]  ;;  %v3661_v27 = vld [vmem:[%s5410_s4 + $0x2d0] sm:$0xff]  ;;  %v3659_v56 = vld [vmem:[%s5410_s4 + $0x2c0] sm:$0xff] }
 0x338   : > { %3556 = vmatprep.subr.mxu1 %v2377_v26  ;;  %4511 = vmatprep.subr.mxu0 %v3663_v18  ;;  %v3645_v24 = vld [vmem:[%s5410_s4 + $0x250] sm:$0xff]  ;;  %v3660_v26 = vld [vmem:[%s5410_s4 + $0x2c8] sm:$0xff] }
 0x339   : > { %3557 = vmatpush2.msra.mxu1 %v2376_v29  ;;  %v3208_v34 = vadd.f32 %v3207_v33, %v3137_v50  ;;  %v3567_v39 = vmax.f32 %v3206_v9, 0.0  ;;  %4512 = vmatpush3.msra.mxu0 %v3647_v20  ;;  %v3644_v29 = vld [vmem:[%s5410_s4 + $0x248] sm:$0xff]  ;;  %v3658_v50 = vld [vmem:[%s5410_s4 + $0x2b8] sm:$0xff]  ;;  %v3657_v33 = vld [vmem:[%s5410_s4 + $0x2b0] sm:$0xff] }
 0x33a   : > { %3559 = vmatmul.mubr.f32.vlgmr.msra.gmra.mxu1 %v4973_v21  ;;  %4470 = vmatprep.subr.mxu1 %v3634_v36  ;;  %v3631_v21 = vld [vmem:[%s5410_s4 + $0x1e0] sm:$0xff] }
 0x33b   : > { %4471 = vmatpush3.msra.mxu1 %v3618_v32  ;;  %v3568_v37 = vmax.f32 %v3208_v34, 0.0  ;;  %4513 = vmatprep.subr.mxu0 %v3662_v22  ;;  %v3643_v36 = vld [vmem:[%s5410_s4 + $0x240] sm:$0xff]  ;;  %v3642_v32 = vld [vmem:[%s5410_s4 + $0x238] sm:$0xff]  ;;  %v3641_v34 = vld [vmem:[%s5410_s4 + $0x230] sm:$0xff] }
 0x33c   : > { %4472 = vmatprep.subr.mxu1 %v3633_v45  ;;  %4514 = vmatpush3.msra.mxu0 %v3646_v23  ;;  %v3656_v45 = vld [vmem:[%s5410_s4 + $0x2a8] sm:$0xff]  ;;  %v3887_v9 = vld [vmem:[%s303_s26] sm:$0xff] }
 0x33d   : > { %4473 = vmatpush3.msra.mxu1 %v3617_v19  ;;  %3808 = vmatprep.mubr.f32.mxu1 %v3568_v37  ;;  %v3640_v19 = vld [vmem:[%s5410_s4 + $0x228] sm:$0xff]  ;;  %v3655_v37 = vld [vmem:[%s5410_s4 + $0x2a0] sm:$0xff] }
 0x33e   : > { %4474 = vmatprep.subr.mxu1 %v3632_v38  ;;  %4515 = vmatprep.subr.mxu0 %v3661_v27  ;;  %v3639_v38 = vld [vmem:[%s5410_s4 + $0x220] sm:$0xff] }
 0x33f   : > { %4475 = vmatpush3.msra.mxu1 %v3616_v49  ;;  %4516 = vmatpush3.msra.mxu0 %v3645_v24  ;;  %v3654_v49 = vld [vmem:[%s5410_s4 + $0x298] sm:$0xff] }
 0x340   : > { %4476 = vmatprep.subr.mxu1 %v3631_v21  ;;  %4517 = vmatprep.subr.mxu0 %v3660_v26  ;;  %v3638_v21 = vld [vmem:[%s5410_s4 + $0x218] sm:$0xff] }
 0x341   : > { %4477 = vmatpush3.msra.mxu1 %v3615_v40  ;;  %4518 = vmatpush3.msra.mxu0 %v3644_v29  ;;  %v3653_v40 = vld [vmem:[%s5410_s4 + $0x290] sm:$0xff] }
 0x342   : > { %4478 = vmatprep.subr.mxu1 %v3630_v4  ;;  %4519 = vmatprep.subr.mxu0 %v3659_v56  ;;  %v3637_v4 = vld [vmem:[%s5410_s4 + $0x210] sm:$0xff] }
 0x343   : > { %4479 = vmatpush3.msra.mxu1 %v3614_v42  ;;  %4520 = vmatpush3.msra.mxu0 %v3643_v36  ;;  %v3652_v42 = vld [vmem:[%s5410_s4 + $0x288] sm:$0xff]  ;;  %v4053_v56 = vld [vmem:[%s5410_s4 + $0x330] sm:$0xff] }
 0x344   : > { %4480 = vmatprep.subr.mxu1 %v3629_v43  ;;  %4521 = vmatprep.subr.mxu0 %v3658_v50  ;;  %v3636_v43 = vld [vmem:[%s5410_s4 + $0x208] sm:$0xff]  ;;  %v4051_v50 = vld [vmem:[%s5410_s4 + $0x320] sm:$0xff] }
 0x345   : > { %4481 = vmatpush3.msra.mxu1 %v3613_v6  ;;  %4522 = vmatpush3.msra.mxu0 %v3642_v32  ;;  %v3651_v6 = vld [vmem:[%s5410_s4 + $0x280] sm:$0xff]  ;;  %v4052_v36 = vld [vmem:[%s5410_s4 + $0x328] sm:$0xff]  ;;  %v4050_v32 = vld [vmem:[%s5410_s4 + $0x318] sm:$0xff] }
 0x346   : > { %4482 = vmatprep.subr.mxu1 %v3628_v41  ;;  %4523 = vmatprep.subr.mxu0 %v3657_v33  ;;  %v3635_v41 = vld [vmem:[%s5410_s4 + $0x200] sm:$0xff]  ;;  %v4139_v33 = vld [vmem:[%s5410_s4 + $0x350] sm:$0xff] }
 0x347   : > { %4483 = vmatpush3.msra.mxu1 %v3612_v10  ;;  %4524 = vmatpush3.msra.mxu0 %v3641_v34  ;;  %v2489_v10 = vrot.slane %v4996_v35, %v752_v25 }
 0x348   : > { %4484 = vmatprep.subr.mxu1 %v3627_v44  ;;  %4525 = vmatprep.subr.mxu0 %v3656_v45  ;;  %v2493_v44 = vrot.slane %v4996_v35, %v756_v28  ;;  %v4426_v45 = vld [vmem:[#allocation6 + $0x11] ss:$0 sm:$0xff] }
 0x349   : > { %4485 = vmatpush3.msra.mxu1 %v3611_v46  ;;  %4526 = vmatpush3.msra.mxu0 %v3640_v19 }
 0x34a   : > { %4486 = vmatprep.subr.mxu1 %v3626_v30  ;;  %4527 = vmatprep.subr.mxu0 %v3655_v37 }
 0x34b   : > { %4487 = vmatpush3.msra.mxu1 %v3610_v53  ;;  %4528 = vmatpush3.msra.mxu0 %v3639_v38 }
 0x34c   : > { %4488 = vmatprep.subr.mxu1 %v3625_v47  ;;  %4529 = vmatprep.subr.mxu0 %v3654_v49 }
 0x34d   : > { %4489 = vmatpush3.msra.mxu1 %v3609_v51  ;;  %4530 = vmatpush3.msra.mxu0 %v3638_v21  ;;  %v4138_v21 = vld [vmem:[%s5410_s4 + $0x348] sm:$0xff] }
 0x34e   : > { %4490 = vmatprep.subr.mxu1 %v3624_v52  ;;  %4531 = vmatprep.subr.mxu0 %v3653_v40  ;;  %v4137_v40 = vld [vmem:[%s5410_s4 + $0x340] sm:$0xff] }
 0x34f   : > { %4491 = vmatpush3.msra.mxu1 %v3608_v55  ;;  %4532 = vmatpush3.msra.mxu0 %v3637_v4  ;;  %v4136_v4 = vld [vmem:[%s5410_s4 + $0x338] sm:$0xff] }
 0x350   : > { %4492 = vmatprep.subr.mxu1 %v3623_v57  ;;  %4533 = vmatprep.subr.mxu0 %v3652_v42  ;;  %v4427_v42 = vld [vmem:[#allocation6 + $0x12] ss:$0 sm:$0xff] }
 0x351   : > { %4493 = vmatpush3.msra.mxu1 %v3607_v60  ;;  %4534 = vmatpush3.msra.mxu0 %v3636_v43 }
 0x352   : > { %4494 = vmatprep.subr.mxu1 %v3622_v61  ;;  %4535 = vmatprep.subr.mxu0 %v3651_v6 }
 0x353   : > { %4495 = vmatpush3.msra.mxu1 %v3606_v1  ;;  %4536 = vmatpush3.msra.mxu0 %v3635_v41 }
 0x354   : > { %4496 = vmatprep.subr.mxu1 %v3621_v3  ;;  %4580 = vmatprep.subr.mxu0 %v4748_v0 }
 0x355   : > { %4497 = vmatpush3.msra.mxu1 %v3605_v5 }
 0x356   : > { %4498 = vmatprep.subr.mxu1 %v3620_v7  ;;  %v3888_v7 = vld [vmem:[%s5410_s4 + $0x310] sm:$0xf] }
 0x357   : > { %4499 = vmatpush3.msra.mxu1 %v3604_v11  ;;  %v3886_v11 = vld [vmem:[%s5410_s4 + $0x308] sm:$0xff] }
 0x358   : > { %4500 = vmatprep.subr.mxu1 %v3619_v12  ;;  %v3885_v12 = vld [vmem:[%s5410_s4 + $0x300] sm:$0xff] }
 0x359   : > { %4501 = vmatpush3.msra.mxu1 %v3603_v13 }
 0x35a   : > { %3809 = vmatmul.mubr.f32.vlgmr.msra.gmra.mxu1 %v3567_v39  ;;  %4557 = vmatprep.subr.mxu1 %v4748_v0 }
 0x35b   : > { %4558 = vmatpush3.msk.msra.mxu1 %vm3893_vm1, %v3888_v7  ;;  %4559 = vmatprep.mubr.msk.f32.mxu1 %vm4749_vm2, %v4748_v0 }
 0x35c   : > { %4562 = vmatprep.subr.mxu1 %v4748_v0 }
 0x35e   : > { %4560 = vmatmul.mubr.msk.f32.vlgmr.msra.gmra.mxu1 %vm3889_vm3, %v3887_v9 }
 0x35f   : > { %4566 = vmatprep.mubr.msk.f32.mxu1 %vm4749_vm2, %v4748_v0  ;;  %4563 = vmatpush3.msra.mxu1 %v3886_v11 }
 0x360   : > { %4564 = vmatprep.subr.mxu1 %v4748_v0 }
 0x361   : > { %4565 = vmatpush3.msra.mxu1 %v3885_v12 }
 0x362   : > { %4569 = vmatprep.subr.mxu1 %v4748_v0 }
 0x376   : > { %v3276_v2 = vpop.f32.mrf.mxu1  ;;  %v3347_v8 = vpop.f32.mrf.mxu0 }
 0x377   : > { %v3277_v30 = vadd.f32 %v3276_v2, %v2489_v10  ;;  %v4226_v10 = vld [vmem:[#allocation6 + $0x14] sm:$0x1] }
 0x378   : > { %v3278_v46 = vpop.f32.mrf.mxu1  ;;  %v3349_v51 = vpop.f32.mrf.mxu0 }
 0x379   : > { %v3279_v47 = vadd.f32 %v3278_v46, %v2493_v44  ;;  %v3348_v48 = vadd.f32 %v3347_v8, %v3277_v30  ;;  %v4750_v44 = vmov 0   ;;  %v4429_v46 = vld [vmem:[#allocation6 + $0x13] ss:$0 sm:$0xff] }
 0x37a   : > { %4643 = vset.pattern.permute.xlu0 %v4750_v44 }
 0x37b   : > { %v3350_v55 = vadd.f32 %v3349_v51, %v3279_v47  ;;  %4229 = vperm.xlu0 %4643, %v4226_v10  }
 0x3b8   : > { %v3418_v53 = vpop.f32.mrf.mxu1  ;;  %v3489_v59 = vpop.f32.mrf.mxu0 }
 0x3b9   : > { %v3419_v57 = vadd.f32 %v3418_v53, %v3348_v48 }
 0x3ba   : > { %v3420_v52 = vpop.f32.mrf.mxu1  ;;  %v3491_v62 = vpop.f32.mrf.mxu0 }
 0x3bb   : > { %v3421_v60 = vadd.f32 %v3420_v52, %v3350_v55  ;;  %v3490_v61 = vadd.f32 %v3489_v59, %v3419_v57  ;;  %v4225_v55 = vld [vmem:[%s5410_s4 + $0x358] sm:$0x1] }
 0x3bd   : > { %v3492_v1 = vadd.f32 %v3491_v62, %v3421_v60 }
 0x3da   : > { %v4467_v13 = vpop.f32.mrf.mxu0 }
 0x3dc   : > { %v4468_v14 = vpop.f32.mrf.mxu0 }
 0x3dd   : > { %v4469_v16 = vadd.f32 %v4468_v14, %v4467_v13 }
 0x3df   : > { %v3741_v18 = vadd.f32 %v4469_v16, %v4422_v17 }
 0x3f6   : > { %v4230_v57 = vpop.permute.xlu0 %4229 }
 0x3f7   : > { %v4235_v59 = vrot.slane %v4230_v57, %v4907_v63 }
 0x3fa   : > { %v3560_v25 = vpop.f32.mrf.mxu1 }
 0x3fb   : > { %v3561_v54 = vadd.f32 %v3560_v25, %v3490_v61 }
 0x3fc   : > { %v3562_v3 = vpop.f32.mrf.mxu1 }
 0x3fd   : > { %v3563_v28 = vadd.f32 %v3562_v3, %v3492_v1  ;;  %v3569_v5 = vmax.f32 %v3561_v54, 0.0 }
 0x3ff   : > { %v3570_v35 = vmax.f32 %v3563_v28, 0.0 }
 0x401   : > { %3878 = vmatprep.mubr.f32.mxu0 %v3570_v35 }
 0x402   : > { %3879 = vmatmul.mubr.f32.vlgmr.msra.gmra.mxu0 %v3569_v5 }
 0x403   : > { %4588 = vmatprep.mubr.msk.f32.mxu0 %vm4749_vm2, %v4748_v0  ;;  %4581 = vmatpush3.msra.mxu0 %v4139_v33 }
 0x404   : > { %4582 = vmatprep.subr.mxu0 %v4748_v0 }
 0x405   : > { %4583 = vmatpush3.msra.mxu0 %v4138_v21 }
 0x406   : > { %4584 = vmatprep.subr.mxu0 %v4748_v0 }
 0x407   : > { %4585 = vmatpush3.msra.mxu0 %v4137_v40 }
 0x408   : > { %4586 = vmatprep.subr.mxu0 %v4748_v0 }
 0x409   : > { %4587 = vmatpush3.msra.mxu0 %v4136_v4 }
 0x41a   : > { %v4502_v39 = vpop.f32.mrf.mxu1 }
 0x41c   : > { %v4503_v15 = vpop.f32.mrf.mxu1 }
 0x41d   : > { %v4504_v58 = vadd.f32 %v4503_v15, %v4502_v39 }
 0x41e   : > { %v3963_v26 = vpop.f32.mrf.mxu1 }
 0x41f   : > { %v3811_v22 = vadd.f32 %v4504_v58, %v3741_v18 }
 0x420   : > { %v4561_v29 = vpop.f32.mrf.mxu1 }
 0x4c2   : > { %v4537_v31 = vpop.f32.mrf.mxu0 }
 0x4c4   : > { %v4538_v20 = vpop.f32.mrf.mxu0 }
 0x4c5   : > { %v4539_v23 = vadd.f32 %v4538_v20, %v4537_v31 }
 0x4c7   : > { %v3881_v27 = vadd.f32 %v4539_v23, %v3811_v22 }
 0x4c9   : > { %v3884_v24 = vmax.f32 %v3881_v27, 0.0 }
 0x4cb   : > { %4567 = vmatmul.mubr.msk.f32.vlgmr.msra.gmra.mxu1 %vm3967_vm4, %v3884_v24 }
 0x4cc   : > { %4577 = vmatprep.mubr.msk.f32.mxu1 %vm4749_vm2, %v4748_v0  ;;  %4570 = vmatpush3.msra.mxu1 %v4053_v56 }
 0x4cd   : > { %4571 = vmatprep.subr.mxu1 %v4748_v0 }
 0x4ce   : > { %4572 = vmatpush3.msra.mxu1 %v4052_v36 }
 0x4cf   : > { %4573 = vmatprep.subr.mxu1 %v4748_v0 }
 0x4d0   : > { %4574 = vmatpush3.msra.mxu1 %v4051_v50 }
 0x4d1   : > { %4575 = vmatprep.subr.mxu1 %v4748_v0 }
 0x4d2   : > { %4576 = vmatpush3.msra.mxu1 %v4050_v32 }
 0x4d3   : > { %4591 = vmatprep.subr.mxu1 %v4748_v0 }
 0x58b   : > { %v4037_v34 = vpop.f32.mrf.mxu1 }
 0x58c   : > { %v4038_v19 = vadd.f32 %v4037_v34, %v3963_v26 }
 0x58d   : > { %v4568_v37 = vpop.f32.mrf.mxu1 }
 0x58e   : > { %v4048_v38 = vadd.f32 %v4426_v45, %v4038_v19 }
 0x590   : > { %v4049_v49 = vmax.f32 %v4048_v38, 0.0 }
 0x592   : > { %4578 = vmatmul.mubr.msk.f32.vlgmr.msra.gmra.mxu1 %vm4061_vm5, %v4049_v49 }
 0x593   : > { %4593 = vmatprep.mubr.msk.f32.mxu1 %vm4749_vm2, %v4748_v0 }
 0x652   : > { %v4131_v43 = vpop.f32.mrf.mxu1 }
 0x653   : > { %v4132_v6 = vadd.f32 %v4427_v42, %v4131_v43 }
 0x654   : > { %v4579_v41 = vpop.f32.mrf.mxu1 }
 0x655   : > { %v4135_v2 = vmax.f32 %v4132_v6, 0.0 }
 0x657   : > { %4589 = vmatmul.mubr.msk.f32.vlgmr.msra.gmra.mxu0 %vm4061_vm5, %v4135_v2 }
 0x717   : > { %v4216_v30 = vpop.f32.mrf.mxu0 }
 0x718   : > { %v4217_v0 = vadd.f32 %v4429_v46, %v4216_v30 }
 0x719   : > { %v4590_v8 = vpop.f32.mrf.mxu0 }
 0x71a   : > { %v4220_v53 = vadd.f32 3.0, %v4217_v0 }
 0x71c   : > { %v4221_v47 = vmax.f32 %v4220_v53, 0.0 }
 0x71e   : > { %v4222_v48 = vmin.f32 %v4221_v47, 6.0 }
 0x720   : > { %v4223_v51 = vmul.f32 %v4222_v48, %v4217_v0 }
 0x722   : > { %v4224_v52 = vmul.f32 0.16666667, %v4223_v51 }
 0x724   : > { %4592 = vmatpush3.xpose.msk.msra.mxu1 %vm4061_vm5, %v4224_v52 }
 0x727   : > { %4594 = vmatmul.mubr.msk.f32.vlgmr.msra.gmra.mxu1 %vm4061_vm5, %v4225_v55 }
 0x7e7   : > { %v4308_v60 = vpop.f32.mrf.mxu1 }
 0x7e8   : > { %v4309_v61 = vadd.f32 %v4308_v60, %v4235_v59 }
 0x7e9   : > { %v4595_v62 = vpop.f32.mrf.mxu1 }
 0x7ea   : > { %4313 = vst.msk [vmem:[%s306_s29] sm:$0x1] %vm4312_vm6, %v4309_v61 }
 0x7eb PF: > { %s18_s21 = sadd.s32 1, %s4739_s21  }
 0x7ec   : > { %p15_p3 = scmp.ge.s32.totalorder %s18_s21, 4  }
 0x7ee   :  { %17 = sbr.rel (!%p15_p3) target bundleno = 2 (0x2), region = 90 }
 0x7f3   :  { %4331 = vsyncpa [#allocation3], 1 }
 0x7f4   :  { %4333 = vsyncpa [#allocation3 + $0x1], 1 }
 0x7f5   :  { %4334 = vsyncpa [#allocation5], 1 }

</bundles_post_ra>
